<compile_context>
chip_gen: v7x
topology: tpu7x:2x2x1
jax: 0.10.0
libtpu: 0.0.40
codegen_flags: <defaults>
</compile_context>

<pallas_src>
import jax
import jax.numpy as jnp
from jax.experimental import pallas as pl
from jax.experimental.pallas import tpu as pltpu


# ---------------------------------------------------------------------------
# helpers
# ---------------------------------------------------------------------------

def _round_up(x, m):
    return (x + m - 1) // m * m


def _pick_lane_tile(M, K, cout, elem_bytes=2, budget=8 * 1024 * 1024):
    """Largest lane tile (M itself, or a multiple of 128 dividing M) whose
    double-buffered working set fits a conservative VMEM budget."""
    def need(tn):
        # patches block + output block are double-buffered; weight/bias resident
        return (2 * (4 * K * tn * elem_bytes + cout * tn * 4)
                + cout * (K * elem_bytes + 4))
    if M % 128 != 0 or need(M) <= budget:
        return M
    best = 128
    for tn in range(128, M, 128):
        if M % tn == 0 and need(tn) <= budget:
            best = tn
    return best


# ---------------------------------------------------------------------------
# Pallas kernels
# ---------------------------------------------------------------------------

def _conv_pool_kernel(w_ref, p_ref, b_ref, o_ref):
    # w_ref: (Cout, K) bf16  -- resident weight
    # p_ref: (4, K, tn) bf16 -- im2col columns grouped by 2x2 pool position
    # b_ref: (Cout, 1) f32
    # o_ref: (Cout, tn) f32  -- conv + maxpool output, lane-dense
    w = w_ref[...]
    acc = jnp.dot(w, p_ref[0], preferred_element_type=jnp.float32)
    for p in range(1, 4):
        acc = jnp.maximum(
            acc, jnp.dot(w, p_ref[p], preferred_element_type=jnp.float32))
    o_ref[...] = (acc + b_ref[...]).astype(o_ref.dtype)


def _fused_linear_kernel(x_ref, w1_ref, b1_ref, w2_ref, b2_ref, o_ref):
    # x: (N, F) bf16; w1: (F, H) bf16; b1: (1, H) f32; w2: (H, O) bf16; b2: (1, O) f32
    h = jnp.dot(x_ref[...], w1_ref[...], preferred_element_type=jnp.float32)
    h = h + b1_ref[...]
    o_ref[...] = (jnp.dot(h.astype(w2_ref.dtype), w2_ref[...],
                          preferred_element_type=jnp.float32)
                  + b2_ref[...]).astype(o_ref.dtype)


# ---------------------------------------------------------------------------
# layer wrappers
# ---------------------------------------------------------------------------

def conv5x5_pool2(x, w, b):
    """Fused SAME 5x5 conv (pad=2) + 2x2/stride-2 max pool.

    x: (Cin, N, H, W) channel-major activations
    w: (Cout, Cin, 5, 5), b: (Cout,)
    returns (Cout, N, H//2, W//2)
    """
    Cin, N, H, W = x.shape
    Cout = w.shape[0]
    k, pad = 5, 2
    Ho, Wo = H // 2, W // 2
    M4 = N * Ho * Wo
    K = Cin * k * k
    Kp = _round_up(K, 128) if K <= 128 else _round_up(K, 16)

    # im2col (XLA glue), columns ordered pool-window-position-major:
    #   patches[p, ci*25 + dy*5 + dx, n*Ho*Wo + ho*Wo + wo]
    #     = xpad[ci, n, 2*ho + wy + dy, 2*wo + wx + dx],  p = wy*2 + wx
    xp = jnp.pad(x, ((0, 0), (0, 0), (pad, pad), (pad, pad)))
    taps = [xp[:, :, dy:dy + H, dx:dx + W] for dy in range(k) for dx in range(k)]
    t = jnp.stack(taps, axis=1).reshape(K, N, Ho, 2, Wo, 2)
    patches = t.transpose(3, 5, 0, 1, 2, 4).reshape(4, K, M4)
    patches = jnp.pad(patches, ((0, 0), (0, Kp - K), (0, 0))).astype(jnp.bfloat16)

    wm = jnp.pad(w.reshape(Cout, K), ((0, 0), (0, Kp - K))).astype(jnp.bfloat16)
    b2 = b.reshape(Cout, 1).astype(jnp.float32)

    tn = _pick_lane_tile(M4, Kp, Cout)
    grid = (M4 // tn,)

    out = pl.pallas_call(
        _conv_pool_kernel,
        out_shape=jax.ShapeDtypeStruct((Cout, M4), jnp.float32),
        grid=grid,
        in_specs=[
            pl.BlockSpec((Cout, Kp), lambda i: (0, 0)),       # resident weight
            pl.BlockSpec((4, Kp, tn), lambda i: (0, 0, i)),   # lane-tiled patches
            pl.BlockSpec((Cout, 1), lambda i: (0, 0)),        # bias
        ],
        out_specs=pl.BlockSpec((Cout, tn), lambda i: (0, i)),
        compiler_params=pltpu.CompilerParams(dimension_semantics=("parallel",)),
    )(wm, patches, b2)
    return out.reshape(Cout, N, Ho, Wo)


def fused_linear(x, w1, b1, w2, b2):
    """Linear(F->H) followed by Linear(H->O) in a single pallas_call.

    x: (N, F) f32, w1: (H, F), b1: (H,), w2: (O, H), b2: (O,) -> (N, O) f32
    """
    N, F = x.shape
    Hd = w1.shape[0]
    O = w2.shape[0]
    return pl.pallas_call(
        _fused_linear_kernel,
        out_shape=jax.ShapeDtypeStruct((N, O), jnp.float32),
        grid=(1,),
        in_specs=[
            pl.BlockSpec((N, F), lambda i: (0, 0)),
            pl.BlockSpec((F, Hd), lambda i: (0, 0)),
            pl.BlockSpec((1, Hd), lambda i: (0, 0)),
            pl.BlockSpec((Hd, O), lambda i: (0, 0)),
            pl.BlockSpec((1, O), lambda i: (0, 0)),
        ],
        out_specs=pl.BlockSpec((N, O), lambda i: (0, 0)),
        compiler_params=pltpu.CompilerParams(dimension_semantics=("arbitrary",)),
    )(
        x.astype(jnp.bfloat16),
        w1.T.astype(jnp.bfloat16),
        b1.reshape(1, Hd).astype(jnp.float32),
        w2.T.astype(jnp.bfloat16),
        b2.reshape(1, O).astype(jnp.float32),
    )


# ---------------------------------------------------------------------------
# Parameter init (deterministic, PyTorch-default-like uniform(-1/sqrt(fan_in)))
# ---------------------------------------------------------------------------

def _conv_init(key, cout, cin, k):
    k1, k2 = jax.random.split(key)
    s = float(cin * k * k) ** -0.5
    w = jax.random.uniform(k1, (cout, cin, k, k), jnp.float32, -s, s)
    b = jax.random.uniform(k2, (cout,), jnp.float32, -s, s)
    return w, b


def _linear_init(key, cout, cin):
    k1, k2 = jax.random.split(key)
    s = float(cin) ** -0.5
    w = jax.random.uniform(k1, (cout, cin), jnp.float32, -s, s)  # (out, in) like torch
    b = jax.random.uniform(k2, (cout,), jnp.float32, -s, s)
    return w, b


def init_params(key):
    ks = jax.random.split(key, 5)
    return (
        _conv_init(ks[0], 32, 3, 5),
        _conv_init(ks[1], 32, 32, 5),
        _conv_init(ks[2], 64, 32, 5),
        _linear_init(ks[3], 64, 1024),
        _linear_init(ks[4], 10, 64),
    )


# ---------------------------------------------------------------------------
# Forward pass (== Tudui.forward)
# ---------------------------------------------------------------------------

def tudui_forward(params, x):
    # x is NCHW (N, 3, 32, 32), identical to the PyTorch module.
    (w1, b1), (w2, b2), (w3, b3), (wf1, bf1), (wf2, bf2) = params
    a = jnp.transpose(x, (1, 0, 2, 3))          # channel-major (C, N, H, W)
    a = conv5x5_pool2(a, w1, b1)                # (32, N, 16, 16)
    a = conv5x5_pool2(a, w2, b2)                # (32, N, 8, 8)
    a = conv5x5_pool2(a, w3, b3)                # (64, N, 4, 4)
    # Flatten: PyTorch per-sample (C, H, W) order -> (N, 1024)
    flat = jnp.transpose(a, (1, 0, 2, 3)).reshape(x.shape[0], -1)
    return fused_linear(flat, wf1, bf1, wf2, bf2)  # Linear(1024,64) -> Linear(64,10)


if __name__ == "__main__":
    key = jax.random.PRNGKey(0)
    kx, kp = jax.random.split(key)
    # Flatten -> Linear(1024, ...) implies 64*4*4, i.e. 32x32 spatial input.
    x = jax.random.normal(kx, (2, 3, 32, 32), jnp.float32)
    params = init_params(kp)

    fwd = jax.jit(tudui_forward)
    out = fwd(params, x)
    out = jax.block_until_ready(out)

    assert out.shape == (2, 10), out.shape
    assert out.dtype == jnp.float32
    assert bool(jnp.all(jnp.isfinite(out)))
    print("KERNEL_OK")
</pallas_src>

<mosaic_0001>
module attributes {stable_mosaic.version = 11 : i64} {
  func.func @_conv_pool_kernel(%arg0: i32, %arg1: memref<32x128xbf16, #tpu.memory_space<vmem>>, %arg2: memref<4x128x512xbf16, #tpu.memory_space<vmem>>, %arg3: memref<32x1xf32, #tpu.memory_space<vmem>>, %arg4: memref<32x512xf32, #tpu.memory_space<vmem>>) attributes {dimension_semantics = [#tpu.dimension_semantics<parallel>], iteration_bounds = array<i64: 1>, scalar_prefetch = 0 : i64, scratch_operands = 0 : i64, tpu.core_type = #tpu.core_type<tc>, window_params = [{pipeline_mode = #tpu.pipeline_mode<synchronous>, transform_indices = @transform_0, window_bounds = array<i64: 32, 128>}, {transform_indices = @transform_1, window_bounds = array<i64: 4, 128, 512>}, {pipeline_mode = #tpu.pipeline_mode<synchronous>, transform_indices = @transform_2, window_bounds = array<i64: 32, 1>}, {transform_indices = @transform_3, window_bounds = array<i64: 32, 512>}]} {
    %c0 = arith.constant 0 : index
    %c0_0 = arith.constant 0 : index
    %0 = vector.load %arg1[%c0, %c0_0] : memref<32x128xbf16, #tpu.memory_space<vmem>>, vector<32x128xbf16>
    %c0_1 = arith.constant 0 : index
    %c0_2 = arith.constant 0 : index
    %c0_3 = arith.constant 0 : index
    %1 = vector.load %arg2[%c0_1, %c0_2, %c0_3] : memref<4x128x512xbf16, #tpu.memory_space<vmem>>, vector<1x128x512xbf16>
    %2 = vector.shape_cast %1 : vector<1x128x512xbf16> to vector<128x512xbf16>
    %cst = arith.constant dense<0.000000e+00> : vector<32x512xf32>
    %3 = tpu.matmul %0, %2, %cst {dimension_numbers = #tpu.dot_dimension_numbers<[1], [0], [0], [1], [0, 0, 1, 1], [], []>} : vector<32x128xbf16>, vector<128x512xbf16>, vector<32x512xf32> -> vector<32x512xf32>
    %c1 = arith.constant 1 : index
    %c0_4 = arith.constant 0 : index
    %c0_5 = arith.constant 0 : index
    %4 = vector.load %arg2[%c1, %c0_4, %c0_5] : memref<4x128x512xbf16, #tpu.memory_space<vmem>>, vector<1x128x512xbf16>
    %5 = vector.shape_cast %4 : vector<1x128x512xbf16> to vector<128x512xbf16>
    %cst_6 = arith.constant dense<0.000000e+00> : vector<32x512xf32>
    %6 = tpu.matmul %0, %5, %cst_6 {dimension_numbers = #tpu.dot_dimension_numbers<[1], [0], [0], [1], [0, 0, 1, 1], [], []>} : vector<32x128xbf16>, vector<128x512xbf16>, vector<32x512xf32> -> vector<32x512xf32>
    %7 = arith.maximumf %3, %6 : vector<32x512xf32>
    %c2 = arith.constant 2 : index
    %c0_7 = arith.constant 0 : index
    %c0_8 = arith.constant 0 : index
    %8 = vector.load %arg2[%c2, %c0_7, %c0_8] : memref<4x128x512xbf16, #tpu.memory_space<vmem>>, vector<1x128x512xbf16>
    %9 = vector.shape_cast %8 : vector<1x128x512xbf16> to vector<128x512xbf16>
    %cst_9 = arith.constant dense<0.000000e+00> : vector<32x512xf32>
    %10 = tpu.matmul %0, %9, %cst_9 {dimension_numbers = #tpu.dot_dimension_numbers<[1], [0], [0], [1], [0, 0, 1, 1], [], []>} : vector<32x128xbf16>, vector<128x512xbf16>, vector<32x512xf32> -> vector<32x512xf32>
    %11 = arith.maximumf %7, %10 : vector<32x512xf32>
    %c3 = arith.constant 3 : index
    %c0_10 = arith.constant 0 : index
    %c0_11 = arith.constant 0 : index
    %12 = vector.load %arg2[%c3, %c0_10, %c0_11] : memref<4x128x512xbf16, #tpu.memory_space<vmem>>, vector<1x128x512xbf16>
    %13 = vector.shape_cast %12 : vector<1x128x512xbf16> to vector<128x512xbf16>
    %cst_12 = arith.constant dense<0.000000e+00> : vector<32x512xf32>
    %14 = tpu.matmul %0, %13, %cst_12 {dimension_numbers = #tpu.dot_dimension_numbers<[1], [0], [0], [1], [0, 0, 1, 1], [], []>} : vector<32x128xbf16>, vector<128x512xbf16>, vector<32x512xf32> -> vector<32x512xf32>
    %15 = arith.maximumf %11, %14 : vector<32x512xf32>
    %c0_13 = arith.constant 0 : index
    %c0_14 = arith.constant 0 : index
    %16 = vector.load %arg3[%c0_13, %c0_14] : memref<32x1xf32, #tpu.memory_space<vmem>>, vector<32x1xf32>
    %17 = vector.broadcast %16 : vector<32x1xf32> to vector<32x512xf32>
    %18 = arith.addf %15, %17 : vector<32x512xf32>
    %c0_15 = arith.constant 0 : index
    %c0_16 = arith.constant 0 : index
    %19 = vector.load %arg4[%c0_15, %c0_16] : memref<32x512xf32, #tpu.memory_space<vmem>>, vector<32x512xf32>
    tpu.vector_store %arg4[%c0_15, %c0_16], %18 {strides = array<i32>} : memref<32x512xf32, #tpu.memory_space<vmem>>, vector<32x512xf32>,
    return
  }
  func.func @transform_0(%arg0: i32) -> (i32, i32) {
    %c0_i32 = arith.constant 0 : i32
    %c0_i32_0 = arith.constant 0 : i32
    %c0_i32_1 = arith.constant 0 : i32
    return %c0_i32, %c0_i32_0 : i32, i32
  }
  func.func @transform_1(%arg0: i32) -> (i32, i32, i32) {
    %c0_i32 = arith.constant 0 : i32
    %c0_i32_0 = arith.constant 0 : i32
    %c0_i32_1 = arith.constant 0 : i32
    return %c0_i32, %c0_i32_0, %arg0 : i32, i32, i32
  }
  func.func @transform_2(%arg0: i32) -> (i32, i32) {
    %c0_i32 = arith.constant 0 : i32
    %c0_i32_0 = arith.constant 0 : i32
    %c0_i32_1 = arith.constant 0 : i32
    return %c0_i32, %c0_i32_0 : i32, i32
  }
  func.func @transform_3(%arg0: i32) -> (i32, i32) {
    %c0_i32 = arith.constant 0 : i32
    %c0_i32_0 = arith.constant 0 : i32
    return %c0_i32, %arg0 : i32, i32
  }
}

module attributes {stable_mosaic.version = 11 : i64} {
  func.func @_conv_pool_kernel(%arg0: i32, %arg1: memref<32x800xbf16, #tpu.memory_space<vmem>>, %arg2: memref<4x800x128xbf16, #tpu.memory_space<vmem>>, %arg3: memref<32x1xf32, #tpu.memory_space<vmem>>, %arg4: memref<32x128xf32, #tpu.memory_space<vmem>>) attributes {dimension_semantics = [#tpu.dimension_semantics<parallel>], iteration_bounds = array<i64: 1>, scalar_prefetch = 0 : i64, scratch_operands = 0 : i64, tpu.core_type = #tpu.core_type<tc>, window_params = [{pipeline_mode = #tpu.pipeline_mode<synchronous>, transform_indices = @transform_0, window_bounds = array<i64: 32, 800>}, {transform_indices = @transform_1, window_bounds = array<i64: 4, 800, 128>}, {pipeline_mode = #tpu.pipeline_mode<synchronous>, transform_indices = @transform_2, window_bounds = array<i64: 32, 1>}, {transform_indices = @transform_3, window_bounds = array<i64: 32, 128>}]} {
    %c0 = arith.constant 0 : index
    %c0_0 = arith.constant 0 : index
    %0 = vector.load %arg1[%c0, %c0_0] : memref<32x800xbf16, #tpu.memory_space<vmem>>, vector<32x800xbf16>
    %c0_1 = arith.constant 0 : index
    %c0_2 = arith.constant 0 : index
    %c0_3 = arith.constant 0 : index
    %1 = vector.load %arg2[%c0_1, %c0_2, %c0_3] : memref<4x800x128xbf16, #tpu.memory_space<vmem>>, vector<1x800x128xbf16>
    %2 = vector.shape_cast %1 : vector<1x800x128xbf16> to vector<800x128xbf16>
    %cst = arith.constant dense<0.000000e+00> : vector<32x128xf32>
    %3 = tpu.matmul %0, %2, %cst {dimension_numbers = #tpu.dot_dimension_numbers<[1], [0], [0], [1], [0, 0, 1, 1], [], []>} : vector<32x800xbf16>, vector<800x128xbf16>, vector<32x128xf32> -> vector<32x128xf32>
    %c1 = arith.constant 1 : index
    %c0_4 = arith.constant 0 : index
    %c0_5 = arith.constant 0 : index
    %4 = vector.load %arg2[%c1, %c0_4, %c0_5] : memref<4x800x128xbf16, #tpu.memory_space<vmem>>, vector<1x800x128xbf16>
    %5 = vector.shape_cast %4 : vector<1x800x128xbf16> to vector<800x128xbf16>
    %cst_6 = arith.constant dense<0.000000e+00> : vector<32x128xf32>
    %6 = tpu.matmul %0, %5, %cst_6 {dimension_numbers = #tpu.dot_dimension_numbers<[1], [0], [0], [1], [0, 0, 1, 1], [], []>} : vector<32x800xbf16>, vector<800x128xbf16>, vector<32x128xf32> -> vector<32x128xf32>
    %7 = arith.maximumf %3, %6 : vector<32x128xf32>
    %c2 = arith.constant 2 : index
    %c0_7 = arith.constant 0 : index
    %c0_8 = arith.constant 0 : index
    %8 = vector.load %arg2[%c2, %c0_7, %c0_8] : memref<4x800x128xbf16, #tpu.memory_space<vmem>>, vector<1x800x128xbf16>
    %9 = vector.shape_cast %8 : vector<1x800x128xbf16> to vector<800x128xbf16>
    %cst_9 = arith.constant dense<0.000000e+00> : vector<32x128xf32>
    %10 = tpu.matmul %0, %9, %cst_9 {dimension_numbers = #tpu.dot_dimension_numbers<[1], [0], [0], [1], [0, 0, 1, 1], [], []>} : vector<32x800xbf16>, vector<800x128xbf16>, vector<32x128xf32> -> vector<32x128xf32>
    %11 = arith.maximumf %7, %10 : vector<32x128xf32>
    %c3 = arith.constant 3 : index
    %c0_10 = arith.constant 0 : index
    %c0_11 = arith.constant 0 : index
    %12 = vector.load %arg2[%c3, %c0_10, %c0_11] : memref<4x800x128xbf16, #tpu.memory_space<vmem>>, vector<1x800x128xbf16>
    %13 = vector.shape_cast %12 : vector<1x800x128xbf16> to vector<800x128xbf16>
    %cst_12 = arith.constant dense<0.000000e+00> : vector<32x128xf32>
    %14 = tpu.matmul %0, %13, %cst_12 {dimension_numbers = #tpu.dot_dimension_numbers<[1], [0], [0], [1], [0, 0, 1, 1], [], []>} : vector<32x800xbf16>, vector<800x128xbf16>, vector<32x128xf32> -> vector<32x128xf32>
    %15 = arith.maximumf %11, %14 : vector<32x128xf32>
    %c0_13 = arith.constant 0 : index
    %c0_14 = arith.constant 0 : index
    %16 = vector.load %arg3[%c0_13, %c0_14] : memref<32x1xf32, #tpu.memory_space<vmem>>, vector<32x1xf32>
    %17 = vector.broadcast %16 : vector<32x1xf32> to vector<32x128xf32>
    %18 = arith.addf %15, %17 : vector<32x128xf32>
    %c0_15 = arith.constant 0 : index
    %c0_16 = arith.constant 0 : index
    %19 = vector.load %arg4[%c0_15, %c0_16] : memref<32x128xf32, #tpu.memory_space<vmem>>, vector<32x128xf32>
    tpu.vector_store %arg4[%c0_15, %c0_16], %18 {strides = array<i32>} : memref<32x128xf32, #tpu.memory_space<vmem>>, vector<32x128xf32>,
    return
  }
  func.func @transform_0(%arg0: i32) -> (i32, i32) {
    %c0_i32 = arith.constant 0 : i32
    %c0_i32_0 = arith.constant 0 : i32
    %c0_i32_1 = arith.constant 0 : i32
    return %c0_i32, %c0_i32_0 : i32, i32
  }
  func.func @transform_1(%arg0: i32) -> (i32, i32, i32) {
    %c0_i32 = arith.constant 0 : i32
    %c0_i32_0 = arith.constant 0 : i32
    %c0_i32_1 = arith.constant 0 : i32
    return %c0_i32, %c0_i32_0, %arg0 : i32, i32, i32
  }
  func.func @transform_2(%arg0: i32) -> (i32, i32) {
    %c0_i32 = arith.constant 0 : i32
    %c0_i32_0 = arith.constant 0 : i32
    %c0_i32_1 = arith.constant 0 : i32
    return %c0_i32, %c0_i32_0 : i32, i32
  }
  func.func @transform_3(%arg0: i32) -> (i32, i32) {
    %c0_i32 = arith.constant 0 : i32
    %c0_i32_0 = arith.constant 0 : i32
    return %c0_i32, %arg0 : i32, i32
  }
}

module attributes {stable_mosaic.version = 11 : i64} {
  func.func @_conv_pool_kernel(%arg0: i32, %arg1: memref<64x800xbf16, #tpu.memory_space<vmem>>, %arg2: memref<4x800x32xbf16, #tpu.memory_space<vmem>>, %arg3: memref<64x1xf32, #tpu.memory_space<vmem>>, %arg4: memref<64x32xf32, #tpu.memory_space<vmem>>) attributes {dimension_semantics = [#tpu.dimension_semantics<parallel>], iteration_bounds = array<i64: 1>, scalar_prefetch = 0 : i64, scratch_operands = 0 : i64, tpu.core_type = #tpu.core_type<tc>, window_params = [{pipeline_mode = #tpu.pipeline_mode<synchronous>, transform_indices = @transform_0, window_bounds = array<i64: 64, 800>}, {transform_indices = @transform_1, window_bounds = array<i64: 4, 800, 32>}, {pipeline_mode = #tpu.pipeline_mode<synchronous>, transform_indices = @transform_2, window_bounds = array<i64: 64, 1>}, {transform_indices = @transform_3, window_bounds = array<i64: 64, 32>}]} {
    %c0 = arith.constant 0 : index
    %c0_0 = arith.constant 0 : index
    %0 = vector.load %arg1[%c0, %c0_0] : memref<64x800xbf16, #tpu.memory_space<vmem>>, vector<64x800xbf16>
    %c0_1 = arith.constant 0 : index
    %c0_2 = arith.constant 0 : index
    %c0_3 = arith.constant 0 : index
    %1 = vector.load %arg2[%c0_1, %c0_2, %c0_3] : memref<4x800x32xbf16, #tpu.memory_space<vmem>>, vector<1x800x32xbf16>
    %2 = vector.shape_cast %1 : vector<1x800x32xbf16> to vector<800x32xbf16>
    %cst = arith.constant dense<0.000000e+00> : vector<64x32xf32>
    %3 = tpu.matmul %0, %2, %cst {dimension_numbers = #tpu.dot_dimension_numbers<[1], [0], [0], [1], [0, 0, 1, 1], [], []>} : vector<64x800xbf16>, vector<800x32xbf16>, vector<64x32xf32> -> vector<64x32xf32>
    %c1 = arith.constant 1 : index
    %c0_4 = arith.constant 0 : index
    %c0_5 = arith.constant 0 : index
    %4 = vector.load %arg2[%c1, %c0_4, %c0_5] : memref<4x800x32xbf16, #tpu.memory_space<vmem>>, vector<1x800x32xbf16>
    %5 = vector.shape_cast %4 : vector<1x800x32xbf16> to vector<800x32xbf16>
    %cst_6 = arith.constant dense<0.000000e+00> : vector<64x32xf32>
    %6 = tpu.matmul %0, %5, %cst_6 {dimension_numbers = #tpu.dot_dimension_numbers<[1], [0], [0], [1], [0, 0, 1, 1], [], []>} : vector<64x800xbf16>, vector<800x32xbf16>, vector<64x32xf32> -> vector<64x32xf32>
    %7 = arith.maximumf %3, %6 : vector<64x32xf32>
    %c2 = arith.constant 2 : index
    %c0_7 = arith.constant 0 : index
    %c0_8 = arith.constant 0 : index
    %8 = vector.load %arg2[%c2, %c0_7, %c0_8] : memref<4x800x32xbf16, #tpu.memory_space<vmem>>, vector<1x800x32xbf16>
    %9 = vector.shape_cast %8 : vector<1x800x32xbf16> to vector<800x32xbf16>
    %cst_9 = arith.constant dense<0.000000e+00> : vector<64x32xf32>
    %10 = tpu.matmul %0, %9, %cst_9 {dimension_numbers = #tpu.dot_dimension_numbers<[1], [0], [0], [1], [0, 0, 1, 1], [], []>} : vector<64x800xbf16>, vector<800x32xbf16>, vector<64x32xf32> -> vector<64x32xf32>
    %11 = arith.maximumf %7, %10 : vector<64x32xf32>
    %c3 = arith.constant 3 : index
    %c0_10 = arith.constant 0 : index
    %c0_11 = arith.constant 0 : index
    %12 = vector.load %arg2[%c3, %c0_10, %c0_11] : memref<4x800x32xbf16, #tpu.memory_space<vmem>>, vector<1x800x32xbf16>
    %13 = vector.shape_cast %12 : vector<1x800x32xbf16> to vector<800x32xbf16>
    %cst_12 = arith.constant dense<0.000000e+00> : vector<64x32xf32>
    %14 = tpu.matmul %0, %13, %cst_12 {dimension_numbers = #tpu.dot_dimension_numbers<[1], [0], [0], [1], [0, 0, 1, 1], [], []>} : vector<64x800xbf16>, vector<800x32xbf16>, vector<64x32xf32> -> vector<64x32xf32>
    %15 = arith.maximumf %11, %14 : vector<64x32xf32>
    %c0_13 = arith.constant 0 : index
    %c0_14 = arith.constant 0 : index
    %16 = vector.load %arg3[%c0_13, %c0_14] : memref<64x1xf32, #tpu.memory_space<vmem>>, vector<64x1xf32>
    %17 = vector.broadcast %16 : vector<64x1xf32> to vector<64x32xf32>
    %18 = arith.addf %15, %17 : vector<64x32xf32>
    %c0_15 = arith.constant 0 : index
    %c0_16 = arith.constant 0 : index
    %19 = vector.load %arg4[%c0_15, %c0_16] : memref<64x32xf32, #tpu.memory_space<vmem>>, vector<64x32xf32>
    tpu.vector_store %arg4[%c0_15, %c0_16], %18 {strides = array<i32>} : memref<64x32xf32, #tpu.memory_space<vmem>>, vector<64x32xf32>,
    return
  }
  func.func @transform_0(%arg0: i32) -> (i32, i32) {
    %c0_i32 = arith.constant 0 : i32
    %c0_i32_0 = arith.constant 0 : i32
    %c0_i32_1 = arith.constant 0 : i32
    return %c0_i32, %c0_i32_0 : i32, i32
  }
  func.func @transform_1(%arg0: i32) -> (i32, i32, i32) {
    %c0_i32 = arith.constant 0 : i32
    %c0_i32_0 = arith.constant 0 : i32
    %c0_i32_1 = arith.constant 0 : i32
    return %c0_i32, %c0_i32_0, %arg0 : i32, i32, i32
  }
  func.func @transform_2(%arg0: i32) -> (i32, i32) {
    %c0_i32 = arith.constant 0 : i32
    %c0_i32_0 = arith.constant 0 : i32
    %c0_i32_1 = arith.constant 0 : i32
    return %c0_i32, %c0_i32_0 : i32, i32
  }
  func.func @transform_3(%arg0: i32) -> (i32, i32) {
    %c0_i32 = arith.constant 0 : i32
    %c0_i32_0 = arith.constant 0 : i32
    return %c0_i32, %arg0 : i32, i32
  }
}

module attributes {stable_mosaic.version = 11 : i64} {
  func.func @_fused_linear_kernel(%arg0: i32, %arg1: memref<2x1024xbf16, #tpu.memory_space<vmem>>, %arg2: memref<1024x64xbf16, #tpu.memory_space<vmem>>, %arg3: memref<1x64xf32, #tpu.memory_space<vmem>>, %arg4: memref<64x10xbf16, #tpu.memory_space<vmem>>, %arg5: memref<1x10xf32, #tpu.memory_space<vmem>>, %arg6: memref<2x10xf32, #tpu.memory_space<vmem>>) attributes {dimension_semantics = [#tpu.dimension_semantics<arbitrary>], iteration_bounds = array<i64: 1>, scalar_prefetch = 0 : i64, scratch_operands = 0 : i64, tpu.core_type = #tpu.core_type<tc>, window_params = [{pipeline_mode = #tpu.pipeline_mode<synchronous>, transform_indices = @transform_0, window_bounds = array<i64: 2, 1024>}, {pipeline_mode = #tpu.pipeline_mode<synchronous>, transform_indices = @transform_1, window_bounds = array<i64: 1024, 64>}, {pipeline_mode = #tpu.pipeline_mode<synchronous>, transform_indices = @transform_2, window_bounds = array<i64: 1, 64>}, {pipeline_mode = #tpu.pipeline_mode<synchronous>, transform_indices = @transform_3, window_bounds = array<i64: 64, 10>}, {pipeline_mode = #tpu.pipeline_mode<synchronous>, transform_indices = @transform_4, window_bounds = array<i64: 1, 10>}, {pipeline_mode = #tpu.pipeline_mode<synchronous>, transform_indices = @transform_5, window_bounds = array<i64: 2, 10>}]} {
    %c0 = arith.constant 0 : index
    %c0_0 = arith.constant 0 : index
    %0 = vector.load %arg1[%c0, %c0_0] : memref<2x1024xbf16, #tpu.memory_space<vmem>>, vector<2x1024xbf16>
    %c0_1 = arith.constant 0 : index
    %c0_2 = arith.constant 0 : index
    %1 = vector.load %arg2[%c0_1, %c0_2] : memref<1024x64xbf16, #tpu.memory_space<vmem>>, vector<1024x64xbf16>
    %cst = arith.constant dense<0.000000e+00> : vector<2x64xf32>
    %2 = tpu.matmul %0, %1, %cst {dimension_numbers = #tpu.dot_dimension_numbers<[1], [0], [0], [1], [0, 0, 1, 1], [], []>} : vector<2x1024xbf16>, vector<1024x64xbf16>, vector<2x64xf32> -> vector<2x64xf32>
    %c0_3 = arith.constant 0 : index
    %c0_4 = arith.constant 0 : index
    %3 = vector.load %arg3[%c0_3, %c0_4] : memref<1x64xf32, #tpu.memory_space<vmem>>, vector<1x64xf32>
    %4 = vector.broadcast %3 : vector<1x64xf32> to vector<2x64xf32>
    %5 = arith.addf %2, %4 : vector<2x64xf32>
    %6 = arith.truncf %5 : vector<2x64xf32> to vector<2x64xbf16>
    %c0_5 = arith.constant 0 : index
    %c0_6 = arith.constant 0 : index
    %7 = vector.load %arg4[%c0_5, %c0_6] : memref<64x10xbf16, #tpu.memory_space<vmem>>, vector<64x10xbf16>
    %cst_7 = arith.constant dense<0.000000e+00> : vector<2x10xf32>
    %8 = tpu.matmul %6, %7, %cst_7 {dimension_numbers = #tpu.dot_dimension_numbers<[1], [0], [0], [1], [0, 0, 1, 1], [], []>} : vector<2x64xbf16>, vector<64x10xbf16>, vector<2x10xf32> -> vector<2x10xf32>
    %c0_8 = arith.constant 0 : index
    %c0_9 = arith.constant 0 : index
    %9 = vector.load %arg5[%c0_8, %c0_9] : memref<1x10xf32, #tpu.memory_space<vmem>>, vector<1x10xf32>
    %10 = vector.broadcast %9 : vector<1x10xf32> to vector<2x10xf32>
    %11 = arith.addf %8, %10 : vector<2x10xf32>
    %c0_10 = arith.constant 0 : index
    %c0_11 = arith.constant 0 : index
    %12 = vector.load %arg6[%c0_10, %c0_11] : memref<2x10xf32, #tpu.memory_space<vmem>>, vector<2x10xf32>
    tpu.vector_store %arg6[%c0_10, %c0_11], %11 {strides = array<i32>} : memref<2x10xf32, #tpu.memory_space<vmem>>, vector<2x10xf32>,
    return
  }
  func.func @transform_0(%arg0: i32) -> (i32, i32) {
    %c0_i32 = arith.constant 0 : i32
    %c0_i32_0 = arith.constant 0 : i32
    %c0_i32_1 = arith.constant 0 : i32
    return %c0_i32, %c0_i32_0 : i32, i32
  }
  func.func @transform_1(%arg0: i32) -> (i32, i32) {
    %c0_i32 = arith.constant 0 : i32
    %c0_i32_0 = arith.constant 0 : i32
    %c0_i32_1 = arith.constant 0 : i32
    return %c0_i32, %c0_i32_0 : i32, i32
  }
  func.func @transform_2(%arg0: i32) -> (i32, i32) {
    %c0_i32 = arith.constant 0 : i32
    %c0_i32_0 = arith.constant 0 : i32
    %c0_i32_1 = arith.constant 0 : i32
    return %c0_i32, %c0_i32_0 : i32, i32
  }
  func.func @transform_3(%arg0: i32) -> (i32, i32) {
    %c0_i32 = arith.constant 0 : i32
    %c0_i32_0 = arith.constant 0 : i32
    %c0_i32_1 = arith.constant 0 : i32
    return %c0_i32, %c0_i32_0 : i32, i32
  }
  func.func @transform_4(%arg0: i32) -> (i32, i32) {
    %c0_i32 = arith.constant 0 : i32
    %c0_i32_0 = arith.constant 0 : i32
    %c0_i32_1 = arith.constant 0 : i32
    return %c0_i32, %c0_i32_0 : i32, i32
  }
  func.func @transform_5(%arg0: i32) -> (i32, i32) {
    %c0_i32 = arith.constant 0 : i32
    %c0_i32_0 = arith.constant 0 : i32
    %c0_i32_1 = arith.constant 0 : i32
    return %c0_i32, %c0_i32_0 : i32, i32
  }
}

</mosaic_0001>

<bundles_post_ra>
// kernel: tudui_forward.4
= control target key start
LH: loop header
LB: loop body
LE: loop exit
PB: predicated region body
PF: predicated region fallthrough
CT: control target
= control target key end

     0   :  { %v1757_v1 = vmov 0   ;;  %s2296_s1 = inlined_call_operand.vmem [shape: bf16[4,128,512], index: 1, kind: input, shape index: {}]   ;;  %s2297_s0 = inlined_call_operand.vmem [shape: bf16[32,128], index: 0, kind: input, shape index: {}]   ;;  %s2298_s2 = inlined_call_operand.vmem [shape: f32[32,1], index: 2, kind: input, shape index: {}]   ;;  %s2299_s3 = inlined_call_operand.vmem [shape: f32[32,512], index: 3, kind: output, shape index: {}]  }
   0x1   :  { %v1563_v0 = vld [vmem:[%s2296_s1 + $0x4] ss:$16 sps:$4 sm:$0xff]   ;;  %255 = vmatprep.mubr.bf16.mxu0 %v1757_v1  ;;  %308 = vmatprep.mubr.bf16.mxu1 %v1757_v1  ;;  %v1565_v2 = vld [vmem:[%s2296_s1 + $0xc] ss:$16 sps:$4 sm:$0xff]   ;;  %v1567_v3 = vld [vmem:[%s2296_s1] ss:$16 sps:$4 sm:$0xff]  }
   0x2   :  { %1561 = vset.pattern.permute.xlu0 %v1757_v1  ;;  %1562 = vset.pattern.permute.xlu1 %v1757_v1  ;;  %v1568_v4 = vld [vmem:[%s2296_s1 + $0x8] ss:$16 sps:$4 sm:$0xff]   ;;  %v1569_v5 = vld [vmem:[%s2296_s1 + $0x24] ss:$16 sps:$4 sm:$0xff]   ;;  %v1571_v6 = vld [vmem:[%s2296_s1 + $0x2c] ss:$16 sps:$4 sm:$0xff]  }
   0x3   :  { %223 = vmatprep.subr.bf16.mxu0 %v1563_v0  ;;  %276 = vmatprep.subr.bf16.mxu1 %v1565_v2  ;;  %v1573_v7 = vld [vmem:[%s2296_s1 + $0x20] ss:$16 sps:$4 sm:$0xff]   ;;  %v1574_v8 = vld [vmem:[%s2296_s1 + $0x28] ss:$16 sps:$4 sm:$0xff]   ;;  %v1575_v9 = vld [vmem:[%s2296_s1 + $0x44] ss:$16 sps:$4 sm:$0xff]  }
   0x4   :  { %224 = vmatpush1.bf16.msra.mxu0 %v1567_v3  ;;  %277 = vmatpush1.bf16.msra.mxu1 %v1568_v4  ;;  %v1577_v10 = vld [vmem:[%s2296_s1 + $0x4c] ss:$16 sps:$4 sm:$0xff]   ;;  %v1579_v11 = vld [vmem:[%s2296_s1 + $0x40] ss:$16 sps:$4 sm:$0xff]   ;;  %v1580_v12 = vld [vmem:[%s2296_s1 + $0x48] ss:$16 sps:$4 sm:$0xff]  }
   0x5   :  { %225 = vmatprep.subr.bf16.mxu0 %v1569_v5  ;;  %278 = vmatprep.subr.bf16.mxu1 %v1571_v6  ;;  %v1581_v13 = vld [vmem:[%s2296_s1 + $0x64] ss:$16 sps:$4 sm:$0xff]   ;;  %v1583_v14 = vld [vmem:[%s2296_s1 + $0x6c] ss:$16 sps:$4 sm:$0xff]   ;;  %v1585_v15 = vld [vmem:[%s2296_s1 + $0x60] ss:$16 sps:$4 sm:$0xff]  }
   0x6   :  { %v1586_v16 = vld [vmem:[%s2296_s1 + $0x68] ss:$16 sps:$4 sm:$0xff]   ;;  %v1587_v17 = vld [vmem:[%s2296_s1 + $0x84] ss:$16 sps:$4 sm:$0xff]   ;;  %v1589_v18 = vld [vmem:[%s2296_s1 + $0x8c] ss:$16 sps:$4 sm:$0xff]  }
   0x7   :  { %v1591_v19 = vld [vmem:[%s2296_s1 + $0x80] ss:$16 sps:$4 sm:$0xff]   ;;  %v1592_v20 = vld [vmem:[%s2296_s1 + $0x88] ss:$16 sps:$4 sm:$0xff]   ;;  %v1593_v21 = vld [vmem:[%s2296_s1 + $0xa4] ss:$16 sps:$4 sm:$0xff]  }
   0x8   :  { %226 = vmatpush1.bf16.msra.mxu0 %v1573_v7  ;;  %279 = vmatpush1.bf16.msra.mxu1 %v1574_v8  ;;  %v1595_v22 = vld [vmem:[%s2296_s1 + $0xac] ss:$16 sps:$4 sm:$0xff]   ;;  %v1597_v23 = vld [vmem:[%s2296_s1 + $0xa0] ss:$16 sps:$4 sm:$0xff]   ;;  %v1598_v24 = vld [vmem:[%s2296_s1 + $0xa8] ss:$16 sps:$4 sm:$0xff]  }
   0x9   :  { %227 = vmatprep.subr.bf16.mxu0 %v1575_v9  ;;  %280 = vmatprep.subr.bf16.mxu1 %v1577_v10  ;;  %v1599_v25 = vld [vmem:[%s2296_s1 + $0xc4] ss:$16 sps:$4 sm:$0xff]   ;;  %v1601_v26 = vld [vmem:[%s2296_s1 + $0xcc] ss:$16 sps:$4 sm:$0xff]   ;;  %v1603_v27 = vld [vmem:[%s2296_s1 + $0xc0] ss:$16 sps:$4 sm:$0xff]  }
   0xa   :  { %v1604_v28 = vld [vmem:[%s2296_s1 + $0xc8] ss:$16 sps:$4 sm:$0xff]   ;;  %v1605_v29 = vld [vmem:[%s2296_s1 + $0xe4] ss:$16 sps:$4 sm:$0xff]   ;;  %v1607_v30 = vld [vmem:[%s2296_s1 + $0xec] ss:$16 sps:$4 sm:$0xff]  }
   0xb   :  { %v1609_v31 = vld [vmem:[%s2296_s1 + $0xe0] ss:$16 sps:$4 sm:$0xff]   ;;  %v1610_v32 = vld [vmem:[%s2296_s1 + $0xe8] ss:$16 sps:$4 sm:$0xff]   ;;  %v1614_v33 = vld [vmem:[%s2296_s1 + $0x104] ss:$16 sps:$4 sm:$0xff]  }
   0xc   :  { %228 = vmatpush1.bf16.msra.mxu0 %v1579_v11  ;;  %281 = vmatpush1.bf16.msra.mxu1 %v1580_v12  ;;  %v1617_v34 = vld [vmem:[%s2296_s1 + $0x10c] ss:$16 sps:$4 sm:$0xff]   ;;  %v1887_v35 = vld [vmem:[%s2297_s0] sm:$0xff]   ;;  %v1615_v37 = vld [vmem:[%s2296_s1 + $0x108] ss:$16 sps:$4 sm:$0xff]  }
   0xd   :  { %229 = vmatprep.subr.bf16.mxu0 %v1581_v13  ;;  %282 = vmatprep.subr.bf16.mxu1 %v1583_v14  ;;  %v1612_v36 = vld [vmem:[%s2296_s1 + $0x100] ss:$16 sps:$4 sm:$0xff]   ;;  %v1620_v38 = vld [vmem:[%s2296_s1 + $0x124] ss:$16 sps:$4 sm:$0xff]   ;;  %v1623_v39 = vld [vmem:[%s2296_s1 + $0x12c] ss:$16 sps:$4 sm:$0xff]  }
   0xe   :  { %v1618_v40 = vld [vmem:[%s2296_s1 + $0x120] ss:$16 sps:$4 sm:$0xff]   ;;  %v1621_v41 = vld [vmem:[%s2296_s1 + $0x128] ss:$16 sps:$4 sm:$0xff]   ;;  %v1626_v42 = vld [vmem:[%s2296_s1 + $0x144] ss:$16 sps:$4 sm:$0xff]  }
   0xf   :  { %v1629_v43 = vld [vmem:[%s2296_s1 + $0x14c] ss:$16 sps:$4 sm:$0xff]   ;;  %v1624_v45 = vld [vmem:[%s2296_s1 + $0x140] ss:$16 sps:$4 sm:$0xff]   ;;  %v1627_v46 = vld [vmem:[%s2296_s1 + $0x148] ss:$16 sps:$4 sm:$0xff]  }
  0x10   :  { %230 = vmatpush1.bf16.msra.mxu0 %v1585_v15  ;;  %283 = vmatpush1.bf16.msra.mxu1 %v1586_v16  ;;  %v1920_v44 = vld [vmem:[%s2297_s0 + $0x8] sm:$0xff]   ;;  %v1632_v47 = vld [vmem:[%s2296_s1 + $0x164] ss:$16 sps:$4 sm:$0xff]   ;;  %v1630_v49 = vld [vmem:[%s2296_s1 + $0x160] ss:$16 sps:$4 sm:$0xff]  }
  0x11   :  { %231 = vmatprep.subr.bf16.mxu0 %v1587_v17  ;;  %284 = vmatprep.subr.bf16.mxu1 %v1589_v18  ;;  %v1635_v48 = vld [vmem:[%s2296_s1 + $0x16c] ss:$16 sps:$4 sm:$0xff]   ;;  %v1633_v50 = vld [vmem:[%s2296_s1 + $0x168] ss:$16 sps:$4 sm:$0xff]   ;;  %v1638_v51 = vld [vmem:[%s2296_s1 + $0x184] ss:$16 sps:$4 sm:$0xff]  }
  0x12   :  { %v1641_v52 = vld [vmem:[%s2296_s1 + $0x18c] ss:$16 sps:$4 sm:$0xff]   ;;  %v1636_v53 = vld [vmem:[%s2296_s1 + $0x180] ss:$16 sps:$4 sm:$0xff]   ;;  %v1639_v54 = vld [vmem:[%s2296_s1 + $0x188] ss:$16 sps:$4 sm:$0xff]  }
  0x13   :  { %v1644_v55 = vld [vmem:[%s2296_s1 + $0x1a4] ss:$16 sps:$4 sm:$0xff]   ;;  %v1647_v56 = vld [vmem:[%s2296_s1 + $0x1ac] ss:$16 sps:$4 sm:$0xff]   ;;  %v1642_v57 = vld [vmem:[%s2296_s1 + $0x1a0] ss:$16 sps:$4 sm:$0xff]  }
  0x14   :  { %232 = vmatpush1.bf16.msra.mxu0 %v1591_v19  ;;  %285 = vmatpush1.bf16.msra.mxu1 %v1592_v20  ;;  %v1645_v58 = vld [vmem:[%s2296_s1 + $0x1a8] ss:$16 sps:$4 sm:$0xff]   ;;  %v1651_v59 = vld [vmem:[%s2296_s1 + $0x1c4] ss:$16 sps:$4 sm:$0xff]   ;;  %v1654_v60 = vld [vmem:[%s2296_s1 + $0x1cc] ss:$16 sps:$4 sm:$0xff]  }
  0x15   :  { %233 = vmatprep.subr.bf16.mxu0 %v1593_v21  ;;  %286 = vmatprep.subr.bf16.mxu1 %v1595_v22  ;;  %v1649_v61 = vld [vmem:[%s2296_s1 + $0x1c0] ss:$16 sps:$4 sm:$0xff]   ;;  %v1652_v62 = vld [vmem:[%s2296_s1 + $0x1c8] ss:$16 sps:$4 sm:$0xff]   ;;  %v1657_v63 = vld [vmem:[%s2296_s1 + $0x1e4] ss:$16 sps:$4 sm:$0xff]  }
  0x16   :  { %v1660_v0 = vld [vmem:[%s2296_s1 + $0x1ec] ss:$16 sps:$4 sm:$0xff]   ;;  %v1655_v2 = vld [vmem:[%s2296_s1 + $0x1e0] ss:$16 sps:$4 sm:$0xff]   ;;  %v1658_v3 = vld [vmem:[%s2296_s1 + $0x1e8] ss:$16 sps:$4 sm:$0xff]  }
  0x17   :  { %v1663_v4 = vld [vmem:[%s2296_s1 + $0x204] ss:$16 sps:$4 sm:$0xff]   ;;  %v1666_v5 = vld [vmem:[%s2296_s1 + $0x20c] ss:$16 sps:$4 sm:$0xff]   ;;  %v1661_v6 = vld [vmem:[%s2296_s1 + $0x200] ss:$16 sps:$4 sm:$0xff]  }
  0x18   :  { %234 = vmatpush1.bf16.msra.mxu0 %v1597_v23  ;;  %287 = vmatpush1.bf16.msra.mxu1 %v1598_v24  ;;  %v1664_v7 = vld [vmem:[%s2296_s1 + $0x208] ss:$16 sps:$4 sm:$0xff]   ;;  %v1669_v8 = vld [vmem:[%s2296_s1 + $0x224] ss:$16 sps:$4 sm:$0xff]   ;;  %v1672_v9 = vld [vmem:[%s2296_s1 + $0x22c] ss:$16 sps:$4 sm:$0xff]  }
  0x19   :  { %235 = vmatprep.subr.bf16.mxu0 %v1599_v25  ;;  %288 = vmatprep.subr.bf16.mxu1 %v1601_v26  ;;  %v1667_v10 = vld [vmem:[%s2296_s1 + $0x220] ss:$16 sps:$4 sm:$0xff]   ;;  %v1670_v11 = vld [vmem:[%s2296_s1 + $0x228] ss:$16 sps:$4 sm:$0xff]   ;;  %v1675_v12 = vld [vmem:[%s2296_s1 + $0x244] ss:$16 sps:$4 sm:$0xff]  }
  0x1a   :  { %v1678_v13 = vld [vmem:[%s2296_s1 + $0x24c] ss:$16 sps:$4 sm:$0xff]   ;;  %v1673_v14 = vld [vmem:[%s2296_s1 + $0x240] ss:$16 sps:$4 sm:$0xff]   ;;  %v1676_v15 = vld [vmem:[%s2296_s1 + $0x248] ss:$16 sps:$4 sm:$0xff]  }
  0x1b   :  { %v1681_v16 = vld [vmem:[%s2296_s1 + $0x264] ss:$16 sps:$4 sm:$0xff]   ;;  %v1684_v17 = vld [vmem:[%s2296_s1 + $0x26c] ss:$16 sps:$4 sm:$0xff]   ;;  %v1679_v18 = vld [vmem:[%s2296_s1 + $0x260] ss:$16 sps:$4 sm:$0xff]  }
  0x1c   :  { %236 = vmatpush1.bf16.msra.mxu0 %v1603_v27  ;;  %289 = vmatpush1.bf16.msra.mxu1 %v1604_v28  ;;  %v1682_v19 = vld [vmem:[%s2296_s1 + $0x268] ss:$16 sps:$4 sm:$0xff]   ;;  %v1687_v20 = vld [vmem:[%s2296_s1 + $0x284] ss:$16 sps:$4 sm:$0xff]   ;;  %v1690_v21 = vld [vmem:[%s2296_s1 + $0x28c] ss:$16 sps:$4 sm:$0xff]  }
  0x1d   :  { %237 = vmatprep.subr.bf16.mxu0 %v1605_v29  ;;  %290 = vmatprep.subr.bf16.mxu1 %v1607_v30  ;;  %v1685_v22 = vld [vmem:[%s2296_s1 + $0x280] ss:$16 sps:$4 sm:$0xff]   ;;  %v1688_v23 = vld [vmem:[%s2296_s1 + $0x288] ss:$16 sps:$4 sm:$0xff]   ;;  %v1693_v24 = vld [vmem:[%s2296_s1 + $0x2a4] ss:$16 sps:$4 sm:$0xff]  }
  0x1e   :  { %v1696_v25 = vld [vmem:[%s2296_s1 + $0x2ac] ss:$16 sps:$4 sm:$0xff]   ;;  %v1691_v26 = vld [vmem:[%s2296_s1 + $0x2a0] ss:$16 sps:$4 sm:$0xff]   ;;  %v1694_v27 = vld [vmem:[%s2296_s1 + $0x2a8] ss:$16 sps:$4 sm:$0xff]  }
  0x1f   :  { %v1699_v28 = vld [vmem:[%s2296_s1 + $0x2c4] ss:$16 sps:$4 sm:$0xff]   ;;  %v1702_v29 = vld [vmem:[%s2296_s1 + $0x2cc] ss:$16 sps:$4 sm:$0xff]  }
  0x20   :  { %238 = vmatpush1.bf16.msra.mxu0 %v1609_v31  ;;  %291 = vmatpush1.bf16.msra.mxu1 %v1610_v32  ;;  %v1274_v30 = vld [vmem:[%s2298_s2] sm:$0xff]  ;;  %v1700_v32 = vld [vmem:[%s2296_s1 + $0x2c8] ss:$16 sps:$4 sm:$0xff]  }
  0x21   :  { %522 = vmatprep.subr.bf16.mxu0 %v1614_v33  ;;  %575 = vmatprep.subr.bf16.mxu1 %v1617_v34  ;;  %v1697_v31 = vld [vmem:[%s2296_s1 + $0x2c0] ss:$16 sps:$4 sm:$0xff]   ;;  %v1705_v34 = vld [vmem:[%s2296_s1 + $0x2e4] ss:$16 sps:$4 sm:$0xff]  }
  0x22   :  { %v1276_v33 = vld [vmem:[%s2298_s2 + $0x10] sm:$0xff]  ;;  %1280 = vperm.xlu0 %1561, %v1274_v30  }
  0x23   :  { %256 = vmatmul.mubr.bf16.vlgmr.msra.gmra.mrb[0].mxu0 %v1887_v35  ;;  %309 = vmatmul.mubr.bf16.vlgmr.msra.gmra.mrb[0].mxu1 %v1887_v35 }
  0x24   :  { %523 = vmatpush1.bf16.msra.mxu0 %v1612_v36  ;;  %576 = vmatpush1.bf16.msra.mxu1 %v1615_v37  ;;  %v1708_v36 = vld [vmem:[%s2296_s1 + $0x2ec] ss:$16 sps:$4 sm:$0xff]  }
  0x25   :  { %524 = vmatprep.subr.bf16.mxu0 %v1620_v38  ;;  %577 = vmatprep.subr.bf16.mxu1 %v1623_v39  ;;  %v1275_v37 = vld [vmem:[%s2298_s2 + $0x8] sm:$0xff]  ;;  %v1277_v38 = vld [vmem:[%s2298_s2 + $0x18] sm:$0xff]  ;;  %v1703_v39 = vld [vmem:[%s2296_s1 + $0x2e0] ss:$16 sps:$4 sm:$0xff]  }
  0x26   :  { %265 = vmatprep.mubr.bf16.mxu0 %v1757_v1  ;;  %318 = vmatprep.mubr.bf16.mxu1 %v1757_v1 }
  0x27   :  { %1290 = vperm.xlu1 %1562, %v1276_v33   ;;  %1285 = vperm.xlu0 %1561, %v1275_v37  }
  0x28   :  { %525 = vmatpush1.bf16.msra.mxu0 %v1618_v40  ;;  %578 = vmatpush1.bf16.msra.mxu1 %v1621_v41  ;;  %v1706_v40 = vld [vmem:[%s2296_s1 + $0x2e8] ss:$16 sps:$4 sm:$0xff]   ;;  %v1711_v41 = vld [vmem:[%s2296_s1 + $0x304] ss:$16 sps:$4 sm:$0xff]  }
  0x29   :  { %526 = vmatprep.subr.bf16.mxu0 %v1626_v42  ;;  %579 = vmatprep.subr.bf16.mxu1 %v1629_v43  ;;  %v1714_v42 = vld [vmem:[%s2296_s1 + $0x30c] ss:$16 sps:$4 sm:$0xff]   ;;  %v1709_v43 = vld [vmem:[%s2296_s1 + $0x300] ss:$16 sps:$4 sm:$0xff]  }
  0x2b   :  { %266 = vmatmul.mubr.bf16.gmra.mrb[4].mxu0 %v1920_v44  ;;  %319 = vmatmul.mubr.bf16.gmra.mrb[4].mxu1 %v1920_v44 }
  0x2c   :  { %527 = vmatpush1.bf16.msra.mxu0 %v1624_v45  ;;  %580 = vmatpush1.bf16.msra.mxu1 %v1627_v46  ;;  %v1712_v45 = vld [vmem:[%s2296_s1 + $0x308] ss:$16 sps:$4 sm:$0xff]   ;;  %v1717_v46 = vld [vmem:[%s2296_s1 + $0x324] ss:$16 sps:$4 sm:$0xff]  }
  0x2d   :  { %528 = vmatprep.subr.bf16.mxu0 %v1632_v47  ;;  %581 = vmatprep.subr.bf16.mxu1 %v1635_v48  ;;  %v1720_v47 = vld [vmem:[%s2296_s1 + $0x32c] ss:$16 sps:$4 sm:$0xff]   ;;  %v1715_v48 = vld [vmem:[%s2296_s1 + $0x320] ss:$16 sps:$4 sm:$0xff]  }
  0x2e   :  { %554 = vmatprep.mubr.bf16.mxu0 %v1757_v1  ;;  %607 = vmatprep.mubr.bf16.mxu1 %v1757_v1 }
  0x2f   :  { %1295 = vperm.xlu1 %1562, %v1277_v38  }
  0x30   :  { %529 = vmatpush1.bf16.msra.mxu0 %v1630_v49  ;;  %582 = vmatpush1.bf16.msra.mxu1 %v1633_v50  ;;  %v1718_v49 = vld [vmem:[%s2296_s1 + $0x328] ss:$16 sps:$4 sm:$0xff]   ;;  %v1723_v50 = vld [vmem:[%s2296_s1 + $0x344] ss:$16 sps:$4 sm:$0xff]  }
  0x31   :  { %530 = vmatprep.subr.bf16.mxu0 %v1638_v51  ;;  %583 = vmatprep.subr.bf16.mxu1 %v1641_v52  ;;  %v1726_v51 = vld [vmem:[%s2296_s1 + $0x34c] ss:$16 sps:$4 sm:$0xff]   ;;  %v1721_v52 = vld [vmem:[%s2296_s1 + $0x340] ss:$16 sps:$4 sm:$0xff]  }
  0x34   :  { %531 = vmatpush1.bf16.msra.mxu0 %v1636_v53  ;;  %584 = vmatpush1.bf16.msra.mxu1 %v1639_v54  ;;  %v1724_v53 = vld [vmem:[%s2296_s1 + $0x348] ss:$16 sps:$4 sm:$0xff]   ;;  %v1729_v54 = vld [vmem:[%s2296_s1 + $0x364] ss:$16 sps:$4 sm:$0xff]  }
  0x35   :  { %532 = vmatprep.subr.bf16.mxu0 %v1644_v55  ;;  %585 = vmatprep.subr.bf16.mxu1 %v1647_v56  ;;  %v1732_v55 = vld [vmem:[%s2296_s1 + $0x36c] ss:$16 sps:$4 sm:$0xff]   ;;  %v1727_v56 = vld [vmem:[%s2296_s1 + $0x360] ss:$16 sps:$4 sm:$0xff]  }
  0x38   :  { %533 = vmatpush1.bf16.msra.mxu0 %v1642_v57  ;;  %586 = vmatpush1.bf16.msra.mxu1 %v1645_v58  ;;  %v1730_v57 = vld [vmem:[%s2296_s1 + $0x368] ss:$16 sps:$4 sm:$0xff]   ;;  %v1735_v58 = vld [vmem:[%s2296_s1 + $0x384] ss:$16 sps:$4 sm:$0xff]  }
  0x39   :  { %534 = vmatprep.subr.bf16.mxu0 %v1651_v59  ;;  %587 = vmatprep.subr.bf16.mxu1 %v1654_v60  ;;  %v1738_v59 = vld [vmem:[%s2296_s1 + $0x38c] ss:$16 sps:$4 sm:$0xff]   ;;  %v1733_v60 = vld [vmem:[%s2296_s1 + $0x380] ss:$16 sps:$4 sm:$0xff]  }
  0x3c   :  { %535 = vmatpush1.bf16.msra.mxu0 %v1649_v61  ;;  %588 = vmatpush1.bf16.msra.mxu1 %v1652_v62  ;;  %v1736_v61 = vld [vmem:[%s2296_s1 + $0x388] ss:$16 sps:$4 sm:$0xff]   ;;  %v1741_v62 = vld [vmem:[%s2296_s1 + $0x3a4] ss:$16 sps:$4 sm:$0xff]  }
  0x3d   :  { %536 = vmatprep.subr.bf16.mxu0 %v1657_v63  ;;  %589 = vmatprep.subr.bf16.mxu1 %v1660_v0  ;;  %v1744_v63 = vld [vmem:[%s2296_s1 + $0x3ac] ss:$16 sps:$4 sm:$0xff]   ;;  %v1739_v0 = vld [vmem:[%s2296_s1 + $0x3a0] ss:$16 sps:$4 sm:$0xff]  }
  0x40   :  { %537 = vmatpush1.bf16.msra.mxu0 %v1655_v2  ;;  %590 = vmatpush1.bf16.msra.mxu1 %v1658_v3  ;;  %v1742_v2 = vld [vmem:[%s2296_s1 + $0x3a8] ss:$16 sps:$4 sm:$0xff]   ;;  %v1747_v3 = vld [vmem:[%s2296_s1 + $0x3c4] ss:$16 sps:$4 sm:$0xff]  }
  0x41   :  { %837 = vmatprep.subr.bf16.mxu0 %v1663_v4  ;;  %890 = vmatprep.subr.bf16.mxu1 %v1666_v5  ;;  %v1750_v4 = vld [vmem:[%s2296_s1 + $0x3cc] ss:$16 sps:$4 sm:$0xff]   ;;  %v1745_v5 = vld [vmem:[%s2296_s1 + $0x3c0] ss:$16 sps:$4 sm:$0xff]  }
  0x43   :  { %555 = vmatmul.mubr.bf16.vlgmr.msra.gmra.mrb[8].mxu0 %v1887_v35  ;;  %608 = vmatmul.mubr.bf16.vlgmr.msra.gmra.mrb[8].mxu1 %v1887_v35 }
  0x44   :  { %838 = vmatpush1.bf16.msra.mxu0 %v1661_v6  ;;  %891 = vmatpush1.bf16.msra.mxu1 %v1664_v7  ;;  %v1748_v6 = vld [vmem:[%s2296_s1 + $0x3c8] ss:$16 sps:$4 sm:$0xff]   ;;  %v1753_v7 = vld [vmem:[%s2296_s1 + $0x3e4] ss:$16 sps:$4 sm:$0xff]  }
  0x45   :  { %839 = vmatprep.subr.bf16.mxu0 %v1669_v8  ;;  %892 = vmatprep.subr.bf16.mxu1 %v1672_v9  ;;  %v1756_v8 = vld [vmem:[%s2296_s1 + $0x3ec] ss:$16 sps:$4 sm:$0xff]   ;;  %v1751_v9 = vld [vmem:[%s2296_s1 + $0x3e0] ss:$16 sps:$4 sm:$0xff]  }
  0x46   :  { %564 = vmatprep.mubr.bf16.mxu0 %v1757_v1  ;;  %617 = vmatprep.mubr.bf16.mxu1 %v1757_v1 }
  0x48   :  { %840 = vmatpush1.bf16.msra.mxu0 %v1667_v10  ;;  %893 = vmatpush1.bf16.msra.mxu1 %v1670_v11  ;;  %v1754_v10 = vld [vmem:[%s2296_s1 + $0x3e8] ss:$16 sps:$4 sm:$0xff]  }
  0x49   :  { %841 = vmatprep.subr.bf16.mxu0 %v1675_v12  ;;  %894 = vmatprep.subr.bf16.mxu1 %v1678_v13 }
  0x4b   :  { %565 = vmatmul.mubr.bf16.gmra.mrb[12].mxu0 %v1920_v44  ;;  %618 = vmatmul.mubr.bf16.gmra.mrb[12].mxu1 %v1920_v44 }
  0x4c   :  { %842 = vmatpush1.bf16.msra.mxu0 %v1673_v14  ;;  %895 = vmatpush1.bf16.msra.mxu1 %v1676_v15 }
  0x4d   :  { %843 = vmatprep.subr.bf16.mxu0 %v1681_v16  ;;  %896 = vmatprep.subr.bf16.mxu1 %v1684_v17 }
  0x4e   :  { %869 = vmatprep.mubr.bf16.mxu0 %v1757_v1  ;;  %922 = vmatprep.mubr.bf16.mxu1 %v1757_v1 }
  0x50   :  { %844 = vmatpush1.bf16.msra.mxu0 %v1679_v18  ;;  %897 = vmatpush1.bf16.msra.mxu1 %v1682_v19 }
  0x51   :  { %845 = vmatprep.subr.bf16.mxu0 %v1687_v20  ;;  %898 = vmatprep.subr.bf16.mxu1 %v1690_v21 }
  0x54   :  { %846 = vmatpush1.bf16.msra.mxu0 %v1685_v22  ;;  %899 = vmatpush1.bf16.msra.mxu1 %v1688_v23 }
  0x55   :  { %847 = vmatprep.subr.bf16.mxu0 %v1693_v24  ;;  %900 = vmatprep.subr.bf16.mxu1 %v1696_v25 }
  0x58   :  { %848 = vmatpush1.bf16.msra.mxu0 %v1691_v26  ;;  %901 = vmatpush1.bf16.msra.mxu1 %v1694_v27 }
  0x59   :  { %849 = vmatprep.subr.bf16.mxu0 %v1699_v28  ;;  %902 = vmatprep.subr.bf16.mxu1 %v1702_v29 }
  0x5c   :  { %850 = vmatpush1.bf16.msra.mxu0 %v1697_v31  ;;  %903 = vmatpush1.bf16.msra.mxu1 %v1700_v32 }
  0x5d   :  { %851 = vmatprep.subr.bf16.mxu0 %v1705_v34  ;;  %904 = vmatprep.subr.bf16.mxu1 %v1708_v36 }
  0x60   :  { %852 = vmatpush1.bf16.msra.mxu0 %v1703_v39  ;;  %905 = vmatpush1.bf16.msra.mxu1 %v1706_v40 }
  0x61   :  { %1152 = vmatprep.subr.bf16.mxu0 %v1711_v41  ;;  %1205 = vmatprep.subr.bf16.mxu1 %v1714_v42 }
  0x63   :  { %870 = vmatmul.mubr.bf16.vlgmr.msra.gmra.mrb[16].mxu0 %v1887_v35  ;;  %923 = vmatmul.mubr.bf16.vlgmr.msra.gmra.mrb[16].mxu1 %v1887_v35 }
  0x64   :  { %1153 = vmatpush1.bf16.msra.mxu0 %v1709_v43  ;;  %1206 = vmatpush1.bf16.msra.mxu1 %v1712_v45 }
  0x65   :  { %1154 = vmatprep.subr.bf16.mxu0 %v1717_v46  ;;  %1207 = vmatprep.subr.bf16.mxu1 %v1720_v47 }
  0x66   :  { %879 = vmatprep.mubr.bf16.mxu0 %v1757_v1  ;;  %932 = vmatprep.mubr.bf16.mxu1 %v1757_v1 }
  0x68   :  { %1155 = vmatpush1.bf16.msra.mxu0 %v1715_v48  ;;  %1208 = vmatpush1.bf16.msra.mxu1 %v1718_v49 }
  0x69   :  { %1156 = vmatprep.subr.bf16.mxu0 %v1723_v50  ;;  %1209 = vmatprep.subr.bf16.mxu1 %v1726_v51 }
  0x6b   :  { %880 = vmatmul.mubr.bf16.gmra.mrb[20].mxu0 %v1920_v44  ;;  %933 = vmatmul.mubr.bf16.gmra.mrb[20].mxu1 %v1920_v44 }
  0x6c   :  { %1157 = vmatpush1.bf16.msra.mxu0 %v1721_v52  ;;  %1210 = vmatpush1.bf16.msra.mxu1 %v1724_v53 }
  0x6d   :  { %1158 = vmatprep.subr.bf16.mxu0 %v1729_v54  ;;  %1211 = vmatprep.subr.bf16.mxu1 %v1732_v55 }
  0x6e   :  { %1184 = vmatprep.mubr.bf16.mxu0 %v1757_v1  ;;  %1237 = vmatprep.mubr.bf16.mxu1 %v1757_v1 }
  0x70   :  { %1159 = vmatpush1.bf16.msra.mxu0 %v1727_v56  ;;  %1212 = vmatpush1.bf16.msra.mxu1 %v1730_v57 }
  0x71   :  { %1160 = vmatprep.subr.bf16.mxu0 %v1735_v58  ;;  %1213 = vmatprep.subr.bf16.mxu1 %v1738_v59 }
  0x74   :  { %1161 = vmatpush1.bf16.msra.mxu0 %v1733_v60  ;;  %1214 = vmatpush1.bf16.msra.mxu1 %v1736_v61 }
  0x75   :  { %1162 = vmatprep.subr.bf16.mxu0 %v1741_v62  ;;  %1215 = vmatprep.subr.bf16.mxu1 %v1744_v63 }
  0x78   :  { %1163 = vmatpush1.bf16.msra.mxu0 %v1739_v0  ;;  %1216 = vmatpush1.bf16.msra.mxu1 %v1742_v2 }
  0x79   :  { %1164 = vmatprep.subr.bf16.mxu0 %v1747_v3  ;;  %1217 = vmatprep.subr.bf16.mxu1 %v1750_v4 }
  0x7c   :  { %1165 = vmatpush1.bf16.msra.mxu0 %v1745_v5  ;;  %1218 = vmatpush1.bf16.msra.mxu1 %v1748_v6 }
  0x7d   :  { %1166 = vmatprep.subr.bf16.mxu0 %v1753_v7  ;;  %1219 = vmatprep.subr.bf16.mxu1 %v1756_v8 }
  0x80   :  { %1167 = vmatpush1.bf16.msra.mxu0 %v1751_v9  ;;  %1220 = vmatpush1.bf16.msra.mxu1 %v1754_v10 }
  0x83   :  { %1185 = vmatmul.mubr.bf16.vlgmr.msra.gmra.mrb[24].mxu0 %v1887_v35  ;;  %1238 = vmatmul.mubr.bf16.vlgmr.msra.gmra.mrb[24].mxu1 %v1887_v35 }
  0x84   :  { %1194 = vmatprep.mubr.bf16.mxu0 %v1757_v1  ;;  %1247 = vmatprep.mubr.bf16.mxu1 %v1757_v1 }
  0x8b   :  { %1195 = vmatmul.mubr.bf16.gmra.mrb[28].mxu0 %v1920_v44  ;;  %1248 = vmatmul.mubr.bf16.gmra.mrb[28].mxu1 %v1920_v44 }
  0xf6   :  { %v257_v11 = vpop.f32.mrb[0].mxu0  ;;  %v310_v12 = vpop.f32.mrb[0].mxu1 }
  0xf7   :  { %v259_v13 = vpop.f32.mrb[1].mxu0  ;;  %v312_v14 = vpop.f32.mrb[1].mxu1 }
  0xf8   :  { %v261_v15 = vpop.f32.mrb[2].mxu0  ;;  %v314_v16 = vpop.f32.mrb[2].mxu1 }
  0xf9   :  { %v263_v17 = vpop.f32.mrb[3].mxu0  ;;  %v316_v18 = vpop.f32.mrb[3].mxu1 }
  0xfe   :  { %v267_v19 = vpop.f32.mrb[4].mxu0  ;;  %v320_v20 = vpop.f32.mrb[4].mxu1 }
  0xff   :  { %v269_v21 = vpop.f32.mrb[5].mxu0  ;;  %v322_v35 = vpop.f32.mrb[5].mxu1 }
 0x100   :  { %v2218_v22 = vpop.f32.mrb[6].mxu0  ;;  %v2220_v23 = vpop.f32.mrb[6].mxu1 }
 0x101   :  { %v2222_v1 = vpop.f32.mrb[7].mxu0  ;;  %v2224_v24 = vpop.f32.mrb[7].mxu1 }
 0x116   :  { %v556_v44 = vpop.f32.mrb[8].mxu0  ;;  %v609_v25 = vpop.f32.mrb[8].mxu1 }
 0x117   :  { %v628_v26 = vmax.f32 %v257_v11, %v556_v44  ;;  %v630_v27 = vmax.f32 %v310_v12, %v609_v25  ;;  %v558_v28 = vpop.f32.mrb[9].mxu0  ;;  %v611_v29 = vpop.f32.mrb[9].mxu1 }
 0x118   :  { %v629_v30 = vmax.f32 %v259_v13, %v558_v28  ;;  %v631_v31 = vmax.f32 %v312_v14, %v611_v29  ;;  %v560_v32 = vpop.f32.mrb[10].mxu0  ;;  %v613_v33 = vpop.f32.mrb[10].mxu1 }
 0x119   :  { %v632_v34 = vmax.f32 %v261_v15, %v560_v32  ;;  %v634_v36 = vmax.f32 %v314_v16, %v613_v33  ;;  %v562_v37 = vpop.f32.mrb[11].mxu0  ;;  %v615_v38 = vpop.f32.mrb[11].mxu1 }
 0x11a   :  { %v633_v39 = vmax.f32 %v263_v17, %v562_v37  ;;  %v635_v40 = vmax.f32 %v316_v18, %v615_v38  ;;  %v1281_v44 = vpop.permute.xlu0 %1280 }
 0x11e   :  { %v566_v41 = vpop.f32.mrb[12].mxu0  ;;  %v619_v42 = vpop.f32.mrb[12].mxu1 }
 0x11f   :  { %v636_v43 = vmax.f32 %v267_v19, %v566_v41  ;;  %v638_v45 = vmax.f32 %v320_v20, %v619_v42  ;;  %v568_v46 = vpop.f32.mrb[13].mxu0  ;;  %v621_v47 = vpop.f32.mrb[13].mxu1 }
 0x120   :  { %v637_v48 = vmax.f32 %v269_v21, %v568_v46  ;;  %v639_v49 = vmax.f32 %v322_v35, %v621_v47  ;;  %v570_v50 = vpop.f32.mrb[14].mxu0  ;;  %v623_v51 = vpop.f32.mrb[14].mxu1 }
 0x121   :  { %v640_v52 = vmax.f32 %v2218_v22, %v570_v50  ;;  %v642_v53 = vmax.f32 %v2220_v23, %v623_v51  ;;  %v572_v54 = vpop.f32.mrb[15].mxu0  ;;  %v625_v55 = vpop.f32.mrb[15].mxu1 }
 0x122   :  { %v641_v56 = vmax.f32 %v2222_v1, %v572_v54  ;;  %v643_v57 = vmax.f32 %v2224_v24, %v625_v55  ;;  %v1286_v25 = vpop.permute.xlu0 %1285 }
 0x136   :  { %v871_v58 = vpop.f32.mrb[16].mxu0  ;;  %v924_v59 = vpop.f32.mrb[16].mxu1 }
 0x137   :  { %v943_v60 = vmax.f32 %v628_v26, %v871_v58  ;;  %v945_v61 = vmax.f32 %v630_v27, %v924_v59  ;;  %v873_v62 = vpop.f32.mrb[17].mxu0  ;;  %v926_v63 = vpop.f32.mrb[17].mxu1 }
 0x138   :  { %v944_v0 = vmax.f32 %v629_v30, %v873_v62  ;;  %v946_v2 = vmax.f32 %v631_v31, %v926_v63  ;;  %v875_v3 = vpop.f32.mrb[18].mxu0  ;;  %v928_v4 = vpop.f32.mrb[18].mxu1 }
 0x139   :  { %v947_v5 = vmax.f32 %v632_v34, %v875_v3  ;;  %v949_v6 = vmax.f32 %v634_v36, %v928_v4  ;;  %v877_v7 = vpop.f32.mrb[19].mxu0  ;;  %v930_v8 = vpop.f32.mrb[19].mxu1 }
 0x13a   :  { %v948_v9 = vmax.f32 %v633_v39, %v877_v7  ;;  %v950_v10 = vmax.f32 %v635_v40, %v930_v8 }
 0x13e   :  { %v881_v11 = vpop.f32.mrb[20].mxu0  ;;  %v934_v12 = vpop.f32.mrb[20].mxu1 }
 0x13f   :  { %v951_v13 = vmax.f32 %v636_v43, %v881_v11  ;;  %v953_v14 = vmax.f32 %v638_v45, %v934_v12  ;;  %v883_v15 = vpop.f32.mrb[21].mxu0  ;;  %v936_v16 = vpop.f32.mrb[21].mxu1 }
 0x140   :  { %v2230_v17 = vmax.f32 %v637_v48, %v883_v15  ;;  %v2232_v18 = vmax.f32 %v639_v49, %v936_v16  ;;  %v885_v19 = vpop.f32.mrb[22].mxu0  ;;  %v938_v20 = vpop.f32.mrb[22].mxu1 }
 0x141   :  { %v2234_v21 = vmax.f32 %v640_v52, %v885_v19  ;;  %v2236_v35 = vmax.f32 %v642_v53, %v938_v20  ;;  %v887_v22 = vpop.f32.mrb[23].mxu0  ;;  %v940_v23 = vpop.f32.mrb[23].mxu1 }
 0x142   :  { %v2238_v1 = vmax.f32 %v641_v56, %v887_v22  ;;  %v2240_v24 = vmax.f32 %v643_v57, %v940_v23  ;;  %v1291_v52 = vpop.permute.xlu1 %1290 }
 0x156   :  { %v1186_v26 = vpop.f32.mrb[24].mxu0  ;;  %v1239_v27 = vpop.f32.mrb[24].mxu1 }
 0x157   :  { %v1258_v28 = vmax.f32 %v943_v60, %v1186_v26  ;;  %v1260_v29 = vmax.f32 %v945_v61, %v1239_v27  ;;  %v1188_v30 = vpop.f32.mrb[25].mxu0  ;;  %v1241_v31 = vpop.f32.mrb[25].mxu1 }
 0x158   :  { %v1259_v32 = vmax.f32 %v944_v0, %v1188_v30  ;;  %v1261_v33 = vmax.f32 %v946_v2, %v1241_v31  ;;  %v1190_v34 = vpop.f32.mrb[26].mxu0  ;;  %v1243_v36 = vpop.f32.mrb[26].mxu1 }
 0x159   :  { %v1298_v37 = vadd.f32 %v1281_v44, %v1258_v28  ;;  %v1300_v38 = vadd.f32 %v1281_v44, %v1260_v29  ;;  %v1262_v39 = vmax.f32 %v947_v5, %v1190_v34  ;;  %v1264_v40 = vmax.f32 %v949_v6, %v1243_v36  ;;  %v1192_v41 = vpop.f32.mrb[27].mxu0  ;;  %v1245_v42 = vpop.f32.mrb[27].mxu1 }
 0x15a   :  { %v1299_v43 = vadd.f32 %v1281_v44, %v1259_v32  ;;  %v1301_v45 = vadd.f32 %v1281_v44, %v1261_v33  ;;  %v1263_v46 = vmax.f32 %v948_v9, %v1192_v41  ;;  %v1265_v47 = vmax.f32 %v950_v10, %v1245_v42  ;;  %v1296_v6 = vpop.permute.xlu1 %1295 }
 0x15b   :  { %1314 = vst [vmem:[%s2299_s3] sm:$0xff] %v1298_v37  ;;  %1316 = vst [vmem:[%s2299_s3 + $0x10] sm:$0xff] %v1300_v38  ;;  %v1302_v48 = vadd.f32 %v1286_v25, %v1262_v39  ;;  %v1304_v49 = vadd.f32 %v1286_v25, %v1264_v40 }
 0x15c   :  { %1315 = vst [vmem:[%s2299_s3 + $0x8] sm:$0xff] %v1299_v43  ;;  %1317 = vst [vmem:[%s2299_s3 + $0x18] sm:$0xff] %v1301_v45  ;;  %v1303_v50 = vadd.f32 %v1286_v25, %v1263_v46  ;;  %v1305_v51 = vadd.f32 %v1286_v25, %v1265_v47 }
 0x15d   :  { %1318 = vst [vmem:[%s2299_s3 + $0x20] sm:$0xff] %v1302_v48  ;;  %1320 = vst [vmem:[%s2299_s3 + $0x30] sm:$0xff] %v1304_v49 }
 0x15e   :  { %1319 = vst [vmem:[%s2299_s3 + $0x28] sm:$0xff] %v1303_v50  ;;  %1321 = vst [vmem:[%s2299_s3 + $0x38] sm:$0xff] %v1305_v51  ;;  %v1196_v53 = vpop.f32.mrb[28].mxu0  ;;  %v1249_v54 = vpop.f32.mrb[28].mxu1 }
 0x15f   :  { %v1266_v55 = vmax.f32 %v951_v13, %v1196_v53  ;;  %v1268_v56 = vmax.f32 %v953_v14, %v1249_v54  ;;  %v1198_v57 = vpop.f32.mrb[29].mxu0  ;;  %v1251_v58 = vpop.f32.mrb[29].mxu1 }
 0x160   :  { %v1267_v59 = vmax.f32 %v2230_v17, %v1198_v57  ;;  %v1269_v60 = vmax.f32 %v2232_v18, %v1251_v58  ;;  %v1200_v61 = vpop.f32.mrb[30].mxu0  ;;  %v1253_v62 = vpop.f32.mrb[30].mxu1 }
 0x161   :  { %v1306_v63 = vadd.f32 %v1291_v52, %v1266_v55  ;;  %v1308_v0 = vadd.f32 %v1291_v52, %v1268_v56  ;;  %v1270_v2 = vmax.f32 %v2234_v21, %v1200_v61  ;;  %v1272_v3 = vmax.f32 %v2236_v35, %v1253_v62  ;;  %v1202_v4 = vpop.f32.mrb[31].mxu0  ;;  %v1255_v5 = vpop.f32.mrb[31].mxu1 }
 0x162   :  { %v1307_v7 = vadd.f32 %v1291_v52, %v1267_v59  ;;  %v1309_v8 = vadd.f32 %v1291_v52, %v1269_v60  ;;  %v1271_v9 = vmax.f32 %v2238_v1, %v1202_v4  ;;  %v1273_v10 = vmax.f32 %v2240_v24, %v1255_v5 }
 0x163   :  { %1322 = vst [vmem:[%s2299_s3 + $0x40] sm:$0xff] %v1306_v63  ;;  %1324 = vst [vmem:[%s2299_s3 + $0x50] sm:$0xff] %v1308_v0  ;;  %v1310_v11 = vadd.f32 %v1296_v6, %v1270_v2  ;;  %v1312_v12 = vadd.f32 %v1296_v6, %v1272_v3 }
 0x164   :  { %1323 = vst [vmem:[%s2299_s3 + $0x48] sm:$0xff] %v1307_v7  ;;  %1325 = vst [vmem:[%s2299_s3 + $0x58] sm:$0xff] %v1309_v8  ;;  %v1311_v13 = vadd.f32 %v1296_v6, %v1271_v9  ;;  %v1313_v14 = vadd.f32 %v1296_v6, %v1273_v10 }
 0x165   :  { %1326 = vst [vmem:[%s2299_s3 + $0x60] sm:$0xff] %v1310_v11  ;;  %1328 = vst [vmem:[%s2299_s3 + $0x70] sm:$0xff] %v1312_v12 }
 0x166   :  { %1327 = vst [vmem:[%s2299_s3 + $0x68] sm:$0xff] %v1311_v13  ;;  %1329 = vst [vmem:[%s2299_s3 + $0x78] sm:$0xff] %v1313_v14 }

// kernel: tudui_forward.5
= control target key start
LH: loop header
LB: loop body
LE: loop exit
PB: predicated region body
PF: predicated region fallthrough
CT: control target
= control target key end

     0   :  { %vm501_vm0 = vcmask 261120   ;;  %s4517_s1 = inlined_call_operand.vmem [shape: bf16[4,800,128], index: 1, kind: input, shape index: {}]   ;;  %s4518_s0 = inlined_call_operand.vmem [shape: bf16[32,800], index: 0, kind: input, shape index: {}]   ;;  %s4519_s2 = inlined_call_operand.vmem [shape: f32[32,1], index: 2, kind: input, shape index: {}]   ;;  %s4520_s3 = inlined_call_operand.vmem [shape: f32[32,128], index: 3, kind: output, shape index: {}]  }
   0x1   :  { %v3452_v0 = vld [vmem:[%s4517_s1 + $0x40] sm:$0xff]   ;;  %v3456_v4 = vld [vmem:[%s4517_s1 + $0x48] sm:$0xff]   ;;  %v3460_v8 = vld [vmem:[%s4517_s1 + $0x50] sm:$0xff]  }
   0x2   :  { %v3453_v1 = vld [vmem:[%s4517_s1 + $0xc0] sm:$0xff]   ;;  %3065 = vmatprep.subr.bf16.mxu0 %v3452_v0  ;;  %v3457_v5 = vld [vmem:[%s4517_s1 + $0xc8] sm:$0xff]   ;;  %v3461_v9 = vld [vmem:[%s4517_s1 + $0xd0] sm:$0xff]  }
   0x3   :  { %v3454_v2 = vld [vmem:[%s4517_s1] sm:$0xff]   ;;  %3093 = vmatprep.subr.bf16.mxu1 %v3453_v1  ;;  %v3458_v6 = vld [vmem:[%s4517_s1 + $0x8] sm:$0xff]   ;;  %v3462_v10 = vld [vmem:[%s4517_s1 + $0x10] sm:$0xff]  }
   0x4   :  { %v3455_v3 = vld [vmem:[%s4517_s1 + $0x80] sm:$0xff]   ;;  %3066 = vmatpush3.bf16.msra.mxu0 %v3454_v2  ;;  %v3459_v7 = vld [vmem:[%s4517_s1 + $0x88] sm:$0xff]   ;;  %v3463_v11 = vld [vmem:[%s4517_s1 + $0x90] sm:$0xff]  }
   0x5   :  { %3094 = vmatpush3.bf16.msra.mxu1 %v3455_v3  ;;  %3067 = vmatprep.subr.bf16.mxu0 %v3456_v4  ;;  %v3464_v12 = vld [vmem:[%s4517_s1 + $0x58] sm:$0xff]   ;;  %v3468_v16 = vld [vmem:[%s4517_s1 + $0x60] sm:$0xff]   ;;  %v3472_v20 = vld [vmem:[%s4517_s1 + $0x68] sm:$0xff]  }
   0x6   :  { %3095 = vmatprep.subr.bf16.mxu1 %v3457_v5  ;;  %v3465_v13 = vld [vmem:[%s4517_s1 + $0xd8] sm:$0xff]   ;;  %v3469_v17 = vld [vmem:[%s4517_s1 + $0xe0] sm:$0xff]   ;;  %v3473_v21 = vld [vmem:[%s4517_s1 + $0xe8] sm:$0xff]  }
   0x7   :  { %v3466_v14 = vld [vmem:[%s4517_s1 + $0x18] sm:$0xff]   ;;  %v3470_v18 = vld [vmem:[%s4517_s1 + $0x20] sm:$0xff]   ;;  %v3474_v22 = vld [vmem:[%s4517_s1 + $0x28] sm:$0xff]  }
   0x8   :  { %3068 = vmatpush3.bf16.msra.mxu0 %v3458_v6  ;;  %v3467_v15 = vld [vmem:[%s4517_s1 + $0x98] sm:$0xff]   ;;  %v3471_v19 = vld [vmem:[%s4517_s1 + $0xa0] sm:$0xff]   ;;  %v3475_v23 = vld [vmem:[%s4517_s1 + $0xa8] sm:$0xff]  }
   0x9   :  { %3096 = vmatpush3.bf16.msra.mxu1 %v3459_v7  ;;  %3069 = vmatprep.subr.bf16.mxu0 %v3460_v8  ;;  %v3476_v24 = vld [vmem:[%s4517_s1 + $0x70] sm:$0xff]   ;;  %v3480_v28 = vld [vmem:[%s4517_s1 + $0x78] sm:$0xff]   ;;  %v3806_v32 = vld [vmem:[%s4518_s0 + $0x4] ss:$28 sps:$4 sm:$0xff]  }
   0xa   :  { %3097 = vmatprep.subr.bf16.mxu1 %v3461_v9  ;;  %v3477_v25 = vld [vmem:[%s4517_s1 + $0xf0] sm:$0xff]   ;;  %v3481_v29 = vld [vmem:[%s4517_s1 + $0xf8] sm:$0xff]   ;;  %v3811_v33 = vld [vmem:[%s4518_s0 + $0xc] ss:$28 sps:$4 sm:$0xff]   ;;  %540 = vmatprep.mubr.bf16.mxu0 %v3806_v32 }
   0xb   :  { %v3478_v26 = vld [vmem:[%s4517_s1 + $0x30] sm:$0xff]   ;;  %v3482_v30 = vld [vmem:[%s4517_s1 + $0x38] sm:$0xff]   ;;  %v3822_v35 = vld [vmem:[%s4518_s0 + $0x8] ss:$28 sps:$4 sm:$0xff]   ;;  %589 = vmatprep.mubr.bf16.mxu1 %v3811_v33 }
   0xc   :  { %3070 = vmatpush3.bf16.msra.mxu0 %v3462_v10  ;;  %v3479_v27 = vld [vmem:[%s4517_s1 + $0xb0] sm:$0xff]   ;;  %v3483_v31 = vld [vmem:[%s4517_s1 + $0xb8] sm:$0xff]   ;;  %v3490_v36 = vld [vmem:[%s4517_s1 + $0x140] sm:$0xff]  }
   0xd   :  { %3098 = vmatpush3.bf16.msra.mxu1 %v3463_v11  ;;  %3071 = vmatprep.subr.bf16.mxu0 %v3464_v12  ;;  %v3817_v34 = vld [vmem:[%s4518_s0] ss:$28 sps:$4 sm:$0xff]   ;;  %v3493_v39 = vld [vmem:[%s4517_s1 + $0x148] sm:$0xff]   ;;  %v3855_v43 = vld [vmem:[%s4518_s0 + $0x38] ss:$28 sps:$4 sm:$0xff]  }
   0xe   :  { %3099 = vmatprep.subr.bf16.mxu1 %v3465_v13  ;;  %v3491_v37 = vld [vmem:[%s4517_s1 + $0x180] sm:$0xff]   ;;  %v3494_v40 = vld [vmem:[%s4517_s1 + $0x108] sm:$0xff]   ;;  %v3845_v41 = vld [vmem:[%s4518_s0 + $0x3c] ss:$28 sps:$4 sm:$0xff]  }
   0xf   :  { %v3492_v38 = vld [vmem:[%s4517_s1 + $0x100] sm:$0xff]   ;;  %v3501_v45 = vld [vmem:[%s4517_s1 + $0x150] sm:$0xff]   ;;  %v3502_v46 = vld [vmem:[%s4517_s1 + $0x188] sm:$0xff]  }
  0x10   :  { %3072 = vmatpush3.bf16.msra.mxu0 %v3466_v14  ;;  %v3850_v42 = vld [vmem:[%s4518_s0 + $0x44] ss:$28 sps:$4 sm:$0xff]   ;;  %v3503_v47 = vld [vmem:[%s4517_s1 + $0x110] sm:$0xff]   ;;  %v3504_v48 = vld [vmem:[%s4517_s1 + $0x158] sm:$0xff]  }
  0x11   :  { %3100 = vmatpush3.bf16.msra.mxu1 %v3467_v15  ;;  %3073 = vmatprep.subr.bf16.mxu0 %v3468_v16  ;;  %v3861_v44 = vld [vmem:[%s4518_s0 + $0x40] ss:$28 sps:$4 sm:$0xff]   ;;  %v3884_v50 = vld [vmem:[%s4518_s0 + $0x18] ss:$28 sps:$4 sm:$0xff]   ;;  %v3897_v53 = vld [vmem:[%s4518_s0 + $0x50] ss:$28 sps:$4 sm:$0xff]  }
  0x12   :  { %3101 = vmatprep.subr.bf16.mxu1 %v3469_v17  ;;  %v3505_v49 = vld [vmem:[%s4517_s1 + $0x118] sm:$0xff]   ;;  %v3507_v51 = vld [vmem:[%s4517_s1 + $0x1d0] sm:$0xff]   ;;  %v3508_v52 = vld [vmem:[%s4517_s1 + $0x160] sm:$0xff]  }
  0x13   :  { %v3510_v54 = vld [vmem:[%s4517_s1 + $0x190] sm:$0xff]   ;;  %v3511_v55 = vld [vmem:[%s4517_s1 + $0x120] sm:$0xff]   ;;  %v3512_v56 = vld [vmem:[%s4517_s1 + $0x1d8] sm:$0xff]  }
  0x14   :  { %3074 = vmatpush3.bf16.msra.mxu0 %v3470_v18  ;;  %v3513_v57 = vld [vmem:[%s4517_s1 + $0x168] sm:$0xff]   ;;  %v3514_v58 = vld [vmem:[%s4517_s1 + $0x198] sm:$0xff]   ;;  %v3516_v60 = vld [vmem:[%s4517_s1 + $0x1e0] sm:$0xff]  }
  0x15   :  { %3102 = vmatpush3.bf16.msra.mxu1 %v3471_v19  ;;  %3075 = vmatprep.subr.bf16.mxu0 %v3472_v20  ;;  %v3515_v59 = vld [vmem:[%s4517_s1 + $0x128] sm:$0xff]   ;;  %v3517_v61 = vld [vmem:[%s4517_s1 + $0x170] sm:$0xff]   ;;  %v3518_v62 = vld [vmem:[%s4517_s1 + $0x1a0] sm:$0xff]  }
  0x16   :  { %3103 = vmatprep.subr.bf16.mxu1 %v3473_v21  ;;  %v3519_v63 = vld [vmem:[%s4517_s1 + $0x130] sm:$0xff]   ;;  %v3520_v0 = vld [vmem:[%s4517_s1 + $0x1e8] sm:$0xff]   ;;  %v3521_v1 = vld [vmem:[%s4517_s1 + $0x178] sm:$0xff]  }
  0x17   :  { %v3522_v2 = vld [vmem:[%s4517_s1 + $0x1a8] sm:$0xff]   ;;  %v3523_v3 = vld [vmem:[%s4517_s1 + $0x138] sm:$0xff]   ;;  %v3952_v5 = vld [vmem:[%s4518_s0 + $0x14] ss:$28 sps:$4 sm:$0xff]  }
  0x18   :  { %3076 = vmatpush3.bf16.msra.mxu0 %v3474_v22  ;;  %v3947_v4 = vld [vmem:[%s4518_s0 + $0x10] ss:$28 sps:$4 sm:$0xff]   ;;  %v3531_v10 = vld [vmem:[%s4517_s1 + $0x1f8] sm:$0xff]   ;;  %v3537_v15 = vld [vmem:[%s4517_s1 + $0x200] sm:$0xff]  }
  0x19   :  { %3104 = vmatpush3.bf16.msra.mxu1 %v3475_v23  ;;  %3077 = vmatprep.subr.bf16.mxu0 %v3476_v24  ;;  %v3527_v6 = vld [vmem:[%s4517_s1 + $0x1f0] sm:$0xff]   ;;  %v3532_v11 = vld [vmem:[%s4517_s1 + $0x1b8] sm:$0xff]   ;;  %v3983_v14 = vld [vmem:[%s4518_s0 + $0x4c] ss:$28 sps:$4 sm:$0xff]  }
  0x1a   :  { %3105 = vmatprep.subr.bf16.mxu1 %v3477_v25  ;;  %v3528_v7 = vld [vmem:[%s4517_s1 + $0x1b0] sm:$0xff]   ;;  %v3533_v12 = vld [vmem:[%s4517_s1 + $0x258] sm:$0xff]   ;;  %v3991_v16 = vld [vmem:[%s4518_s0 + $0x48] ss:$28 sps:$4 sm:$0xff]  }
  0x1b   :  { %v3529_v8 = vld [vmem:[%s4517_s1 + $0x250] sm:$0xff]   ;;  %v3534_v13 = vld [vmem:[%s4517_s1 + $0x218] sm:$0xff]   ;;  %v3539_v17 = vld [vmem:[%s4517_s1 + $0x1c0] sm:$0xff]  }
  0x1c   :  { %3078 = vmatpush3.bf16.msra.mxu0 %v3478_v26  ;;  %v3530_v9 = vld [vmem:[%s4517_s1 + $0x210] sm:$0xff]   ;;  %v3540_v18 = vld [vmem:[%s4517_s1 + $0x260] sm:$0xff]   ;;  %v3542_v20 = vld [vmem:[%s4517_s1 + $0x208] sm:$0xff]  }
  0x1d   :  { %3106 = vmatpush3.bf16.msra.mxu1 %v3479_v27  ;;  %3079 = vmatprep.subr.bf16.mxu0 %v3480_v28  ;;  %v3541_v19 = vld [vmem:[%s4517_s1 + $0x220] sm:$0xff]   ;;  %v3543_v21 = vld [vmem:[%s4517_s1 + $0x1c8] sm:$0xff]   ;;  %v3546_v24 = vld [vmem:[%s4517_s1 + $0x2d0] sm:$0xff]  }
  0x1e   :  { %3107 = vmatprep.subr.bf16.mxu1 %v3481_v29  ;;  %v3544_v22 = vld [vmem:[%s4517_s1 + $0x268] sm:$0xff]   ;;  %v3547_v25 = vld [vmem:[%s4517_s1 + $0x270] sm:$0xff]   ;;  %v3550_v28 = vld [vmem:[%s4517_s1 + $0x2d8] sm:$0xff]  }
  0x1f   :  { %v3545_v23 = vld [vmem:[%s4517_s1 + $0x228] sm:$0xff]   ;;  %v3548_v26 = vld [vmem:[%s4517_s1 + $0x290] sm:$0xff]   ;;  %v3551_v29 = vld [vmem:[%s4517_s1 + $0x278] sm:$0xff]  }
  0x20   :  { %3080 = vmatpush3.bf16.msra.mxu0 %v3482_v30  ;;  %v3549_v27 = vld [vmem:[%s4517_s1 + $0x230] sm:$0xff]   ;;  %v3552_v30 = vld [vmem:[%s4517_s1 + $0x298] sm:$0xff]  }
  0x21   :  { %3108 = vmatpush3.bf16.msra.mxu1 %v3483_v31  ;;  %3121 = vmatprep.subr.bf16.mxu0 %v3490_v36  ;;  %v3553_v31 = vld [vmem:[%s4517_s1 + $0x238] sm:$0xff]   ;;  %v3554_v36 = vld [vmem:[%s4517_s1 + $0x2e0] sm:$0xff]  }
  0x22   :  { %3417 = vmatprep.subr.bf16.mxu1 %v3491_v37 }
  0x23   :  { %541 = vmatmul.mubr.bf16.vlgmr.msra.gmra.mrb[0].mxu0 %v3817_v34 }
  0x24   :  { %590 = vmatmul.mubr.bf16.vlgmr.msra.gmra.mrb[0].mxu1 %v3822_v35  ;;  %3122 = vmatpush3.bf16.msra.mxu0 %v3492_v38  ;;  %v3556_v38 = vld [vmem:[%s4517_s1 + $0x2a0] sm:$0xff]  }
  0x25   :  { %3418 = vmatpush3.bf16.msra.mxu1 %v3491_v37  ;;  %3123 = vmatprep.subr.bf16.mxu0 %v3493_v39  ;;  %v3555_v37 = vld [vmem:[%s4517_s1 + $0x280] sm:$0xff]  }
  0x26   :  { %548 = vmatprep.mubr.bf16.mxu0 %v3845_v41  ;;  %597 = vmatprep.mubr.bf16.mxu1 %v3850_v42  ;;  %v3557_v39 = vld [vmem:[%s4517_s1 + $0x240] sm:$0xff]  }
  0x27   :  { %3419 = vmatprep.subr.bf16.mxu1 %v3502_v46 }
  0x28   :  { %3124 = vmatpush3.bf16.msra.mxu0 %v3494_v40  ;;  %v3558_v40 = vld [vmem:[%s4517_s1 + $0x2e8] sm:$0xff]  }
  0x29   :  { %3125 = vmatprep.subr.bf16.mxu0 %v3501_v45  ;;  %3420 = vmatpush3.bf16.msra.mxu1 %v3502_v46  ;;  %v3559_v45 = vld [vmem:[%s4517_s1 + $0x288] sm:$0xff]  }
  0x2a   :  { %3153 = vmatprep.subr.bf16.mxu1 %v3507_v51  ;;  %v3560_v46 = vld [vmem:[%s4517_s1 + $0x2a8] sm:$0xff]   ;;  %v3564_v51 = vld [vmem:[%s4517_s1 + $0x2f8] sm:$0xff]  }
  0x2b   :  { %549 = vmatmul.mubr.bf16.gmra.mrb[4].mxu0 %v3855_v43 }
  0x2c   :  { %598 = vmatmul.mubr.bf16.gmra.mrb[4].mxu1 %v3861_v44  ;;  %3126 = vmatpush3.bf16.msra.mxu0 %v3503_v47  ;;  %v3561_v47 = vld [vmem:[%s4517_s1 + $0x248] sm:$0xff]  }
  0x2d   :  { %3127 = vmatprep.subr.bf16.mxu0 %v3504_v48  ;;  %3421 = vmatprep.mubr.msk.bf16.mxu1 %vm501_vm0, %v3884_v50  ;;  %v3562_v48 = vld [vmem:[%s4517_s1 + $0x2f0] sm:$0xff]  }
  0x2e   :  { %638 = vmatprep.mubr.bf16.mxu0 %v3952_v5 }
  0x30   :  { %3128 = vmatpush3.bf16.msra.mxu0 %v3505_v49  ;;  %v3563_v49 = vld [vmem:[%s4517_s1 + $0x2b0] sm:$0xff]  }
  0x31   :  { %3129 = vmatprep.subr.bf16.mxu0 %v3508_v52  ;;  %v3565_v52 = vld [vmem:[%s4517_s1 + $0x2b8] sm:$0xff]  }
  0x34   :  { %3422 = vmatmul.mubr.msk.bf16.vlgmr.msra.gmra.mrb[8].mxu1 %vm501_vm0, %v3897_v53  ;;  %3130 = vmatpush3.bf16.msra.mxu0 %v3511_v55  ;;  %v3567_v55 = vld [vmem:[%s4517_s1 + $0x310] sm:$0xff]  }
  0x35   :  { %3154 = vmatpush3.bf16.msra.mxu1 %v3510_v54  ;;  %1137 = vmatprep.mubr.bf16.mxu1 %v3806_v32  ;;  %v3566_v54 = vld [vmem:[%s4517_s1 + $0x300] sm:$0xff]  }
  0x36   :  { %3155 = vmatprep.subr.bf16.mxu1 %v3512_v56  ;;  %3131 = vmatprep.subr.bf16.mxu0 %v3513_v57  ;;  %v3568_v56 = vld [vmem:[%s4517_s1 + $0x2c0] sm:$0xff]   ;;  %v3570_v57 = vld [vmem:[%s4517_s1 + $0x318] sm:$0xff]  }
  0x38   :  { %3132 = vmatpush3.bf16.msra.mxu0 %v3515_v59  ;;  %v3572_v59 = vld [vmem:[%s4517_s1 + $0x360] sm:$0xff]  }
  0x39   :  { %3156 = vmatpush3.bf16.msra.mxu1 %v3514_v58  ;;  %3133 = vmatprep.subr.bf16.mxu0 %v3517_v61  ;;  %v3569_v58 = vld [vmem:[%s4517_s1 + $0x308] sm:$0xff]   ;;  %v3573_v61 = vld [vmem:[%s4517_s1 + $0x3e0] sm:$0xff]  }
  0x3a   :  { %3157 = vmatprep.subr.bf16.mxu1 %v3516_v60  ;;  %v3571_v60 = vld [vmem:[%s4517_s1 + $0x2c8] sm:$0xff]  }
  0x3c   :  { %3134 = vmatpush3.bf16.msra.mxu0 %v3519_v63  ;;  %v3575_v63 = vld [vmem:[%s4517_s1 + $0x3a0] sm:$0xff]  }
  0x3d   :  { %3158 = vmatpush3.bf16.msra.mxu1 %v3518_v62  ;;  %3135 = vmatprep.subr.bf16.mxu0 %v3521_v1  ;;  %v3574_v62 = vld [vmem:[%s4517_s1 + $0x320] sm:$0xff]   ;;  %v3576_v1 = vld [vmem:[%s4517_s1 + $0x368] sm:$0xff]  }
  0x3e   :  { %3159 = vmatprep.subr.bf16.mxu1 %v3520_v0  ;;  %v3577_v0 = vld [vmem:[%s4517_s1 + $0x3e8] sm:$0xff]  }
  0x40   :  { %3136 = vmatpush3.bf16.msra.mxu0 %v3523_v3  ;;  %v3579_v3 = vld [vmem:[%s4517_s1 + $0x3a8] sm:$0xff]  }
  0x41   :  { %3160 = vmatpush3.bf16.msra.mxu1 %v3522_v2  ;;  %3181 = vmatprep.subr.bf16.mxu0 %v3529_v8  ;;  %v3578_v2 = vld [vmem:[%s4517_s1 + $0x328] sm:$0xff]   ;;  %v3582_v8 = vld [vmem:[%s4517_s1 + $0x330] sm:$0xff]  }
  0x42   :  { %3161 = vmatprep.subr.bf16.mxu1 %v3527_v6  ;;  %v3581_v6 = vld [vmem:[%s4517_s1 + $0x3f0] sm:$0xff]  }
  0x43   :  { %639 = vmatmul.mubr.bf16.vlgmr.msra.gmra.mrb[8].mxu0 %v3947_v4 }
  0x44   :  { %3182 = vmatpush3.bf16.msra.mxu0 %v3530_v9  ;;  %646 = vmatprep.mubr.bf16.mxu0 %v3983_v14  ;;  %v3583_v9 = vld [vmem:[%s4517_s1 + $0x3b0] sm:$0xff]  }
  0x45   :  { %3162 = vmatpush3.bf16.msra.mxu1 %v3528_v7  ;;  %3183 = vmatprep.subr.bf16.mxu0 %v3533_v12  ;;  %v3580_v7 = vld [vmem:[%s4517_s1 + $0x370] sm:$0xff]   ;;  %v3587_v12 = vld [vmem:[%s4517_s1 + $0x3b8] sm:$0xff]  }
  0x46   :  { %3163 = vmatprep.subr.bf16.mxu1 %v3531_v10  ;;  %v3585_v10 = vld [vmem:[%s4517_s1 + $0x3f8] sm:$0xff]  }
  0x48   :  { %3184 = vmatpush3.bf16.msra.mxu0 %v3534_v13  ;;  %v3589_v13 = vld [vmem:[%s4517_s1 + $0x400] sm:$0xff]  }
  0x49   :  { %3164 = vmatpush3.bf16.msra.mxu1 %v3532_v11  ;;  %3185 = vmatprep.subr.bf16.mxu0 %v3540_v18  ;;  %v3584_v11 = vld [vmem:[%s4517_s1 + $0x378] sm:$0xff]   ;;  %v3593_v18 = vld [vmem:[%s4517_s1 + $0x408] sm:$0xff]  }
  0x4a   :  { %3165 = vmatprep.subr.bf16.mxu1 %v3537_v15  ;;  %v3588_v15 = vld [vmem:[%s4517_s1 + $0x380] sm:$0xff]  }
  0x4b   :  { %647 = vmatmul.mubr.bf16.gmra.mrb[12].mxu0 %v3991_v16 }
  0x4c   :  { %1186 = vmatprep.mubr.bf16.mxu0 %v3811_v33  ;;  %3186 = vmatpush3.bf16.msra.mxu0 %v3541_v19  ;;  %v3592_v19 = vld [vmem:[%s4517_s1 + $0x388] sm:$0xff]  }
  0x4d   :  { %3166 = vmatpush3.bf16.msra.mxu1 %v3539_v17  ;;  %3187 = vmatprep.subr.bf16.mxu0 %v3544_v22  ;;  %v3590_v17 = vld [vmem:[%s4517_s1 + $0x340] sm:$0xff]   ;;  %v3597_v22 = vld [vmem:[%s4517_s1 + $0x410] sm:$0xff]  }
  0x4e   :  { %3167 = vmatprep.subr.bf16.mxu1 %v3542_v20  ;;  %v3594_v20 = vld [vmem:[%s4517_s1 + $0x348] sm:$0xff]  }
  0x50   :  { %3188 = vmatpush3.bf16.msra.mxu0 %v3545_v23  ;;  %v3596_v23 = vld [vmem:[%s4517_s1 + $0x390] sm:$0xff]  }
  0x51   :  { %3168 = vmatpush3.bf16.msra.mxu1 %v3543_v21  ;;  %3189 = vmatprep.subr.bf16.mxu0 %v3547_v25  ;;  %v3595_v21 = vld [vmem:[%s4517_s1 + $0x3c8] sm:$0xff]   ;;  %v3599_v25 = vld [vmem:[%s4517_s1 + $0x3d0] sm:$0xff]  }
  0x52   :  { %3209 = vmatprep.subr.bf16.mxu1 %v3546_v24  ;;  %v3598_v24 = vld [vmem:[%s4517_s1 + $0x350] sm:$0xff]  }
  0x54   :  { %1138 = vmatmul.mubr.bf16.vlgmr.msra.gmra.mrb[12].mxu1 %v3817_v34  ;;  %3190 = vmatpush3.bf16.msra.mxu0 %v3549_v27  ;;  %v3600_v27 = vld [vmem:[%s4517_s1 + $0x398] sm:$0xff]  }
  0x55   :  { %1145 = vmatprep.mubr.bf16.mxu1 %v3845_v41  ;;  %3210 = vmatpush3.bf16.msra.mxu1 %v3548_v26  ;;  %v3601_v26 = vld [vmem:[%s4517_s1 + $0x418] sm:$0xff]  }
  0x56   :  { %3211 = vmatprep.subr.bf16.mxu1 %v3550_v28  ;;  %3191 = vmatprep.subr.bf16.mxu0 %v3551_v29  ;;  %v3602_v28 = vld [vmem:[%s4517_s1 + $0x358] sm:$0xff]  }
  0x57   :  { %v3603_v29 = vld [vmem:[%s4517_s1 + $0x3d8] sm:$0xff]  }
  0x58   :  { %3192 = vmatpush3.bf16.msra.mxu0 %v3553_v31  ;;  %v3604_v31 = vld [vmem:[%s4517_s1 + $0x460] sm:$0xff]  }
  0x59   :  { %3212 = vmatpush3.bf16.msra.mxu1 %v3552_v30  ;;  %3193 = vmatprep.subr.bf16.mxu0 %v3555_v37  ;;  %v3605_v30 = vld [vmem:[%s4517_s1 + $0x4a0] sm:$0xff]   ;;  %v3607_v37 = vld [vmem:[%s4517_s1 + $0x468] sm:$0xff]  }
  0x5a   :  { %3213 = vmatprep.subr.bf16.mxu1 %v3554_v36  ;;  %v3606_v36 = vld [vmem:[%s4517_s1 + $0x420] sm:$0xff]  }
  0x5c   :  { %1146 = vmatmul.mubr.bf16.gmra.mrb[16].mxu1 %v3855_v43  ;;  %3194 = vmatpush3.bf16.msra.mxu0 %v3557_v39  ;;  %v3608_v39 = vld [vmem:[%s4517_s1 + $0x428] sm:$0xff]  }
  0x5d   :  { %1235 = vmatprep.mubr.bf16.mxu1 %v3952_v5  ;;  %3214 = vmatpush3.bf16.msra.mxu1 %v3556_v38  ;;  %v3610_v38 = vld [vmem:[%s4517_s1 + $0x4a8] sm:$0xff]  }
  0x5e   :  { %3215 = vmatprep.subr.bf16.mxu1 %v3558_v40  ;;  %3195 = vmatprep.subr.bf16.mxu0 %v3559_v45  ;;  %v3614_v40 = vld [vmem:[%s4517_s1 + $0x4f0] sm:$0xff]   ;;  %v3615_v45 = vld [vmem:[%s4517_s1 + $0x480] sm:$0xff]  }
  0x60   :  { %3196 = vmatpush3.bf16.msra.mxu0 %v3561_v47  ;;  %v3621_v47 = vld [vmem:[%s4517_s1 + $0x448] sm:$0xff]  }
  0x61   :  { %3216 = vmatpush3.bf16.msra.mxu1 %v3560_v46  ;;  %3425 = vmatprep.subr.bf16.mxu0 %v3567_v55  ;;  %v3620_v46 = vld [vmem:[%s4517_s1 + $0x4b8] sm:$0xff]  }
  0x62   :  { %3217 = vmatprep.subr.bf16.mxu1 %v3562_v48  ;;  %v3672_v48 = vld [vmem:[%s4518_s0 + $0x4] ss:$28 sps:$4 sm:$0xff]  }
  0x63   :  { %1187 = vmatmul.mubr.bf16.vlgmr.msra.gmra.mrb[16].mxu0 %v3822_v35 }
  0x64   :  { %1194 = vmatprep.mubr.bf16.mxu0 %v3850_v42  ;;  %3426 = vmatpush3.bf16.msra.mxu0 %v3567_v55  ;;  %v3627_v55 = vld [vmem:[%s4517_s1 + $0x498] sm:$0xff]  }
  0x65   :  { %3218 = vmatpush3.bf16.msra.mxu1 %v3563_v49  ;;  %3427 = vmatprep.subr.bf16.mxu0 %v3570_v57  ;;  %v3623_v49 = vld [vmem:[%s4517_s1 + $0x490] sm:$0xff]  }
  0x66   :  { %3219 = vmatprep.subr.bf16.mxu1 %v3564_v51  ;;  %v3624_v51 = vld [vmem:[%s4517_s1 + $0x4c0] sm:$0xff]  }
  0x68   :  { %3428 = vmatpush3.bf16.msra.mxu0 %v3570_v57  ;;  %v3629_v57 = vld [vmem:[%s4517_s1 + $0x458] sm:$0xff]  }
  0x69   :  { %3220 = vmatpush3.bf16.msra.mxu1 %v3565_v52  ;;  %3241 = vmatprep.subr.bf16.mxu0 %v3572_v59  ;;  %v3625_v52 = vld [vmem:[%s4517_s1 + $0x450] sm:$0xff]  }
  0x6a   :  { %3221 = vmatprep.subr.bf16.mxu1 %v3566_v54  ;;  %v3626_v54 = vld [vmem:[%s4517_s1 + $0x508] sm:$0xff]   ;;  %v3632_v59 = vld [vmem:[%s4517_s1 + $0x570] sm:$0xff]  }
  0x6b   :  { %1195 = vmatmul.mubr.bf16.gmra.mrb[20].mxu0 %v3861_v44 }
  0x6c   :  { %3429 = vmatprep.mubr.msk.bf16.mxu0 %vm501_vm0, %v3884_v50 }
  0x6d   :  { %3222 = vmatpush3.bf16.msra.mxu1 %v3568_v56  ;;  %v3628_v56 = vld [vmem:[%s4517_s1 + $0x4c8] sm:$0xff]  }
  0x6e   :  { %3223 = vmatprep.subr.bf16.mxu1 %v3569_v58  ;;  %v3630_v58 = vld [vmem:[%s4517_s1 + $0x510] sm:$0xff]  }
  0x71   :  { %3224 = vmatpush3.bf16.msra.mxu1 %v3571_v60  ;;  %v3631_v60 = vld [vmem:[%s4517_s1 + $0x4d0] sm:$0xff]  }
  0x72   :  { %3269 = vmatprep.subr.bf16.mxu1 %v3573_v61  ;;  %v3633_v61 = vld [vmem:[%s4517_s1 + $0x530] sm:$0xff]  }
  0x73   :  { %3430 = vmatmul.mubr.msk.bf16.vlgmr.msra.gmra.mrb[24].mxu0 %vm501_vm0, %v3897_v53 }
  0x74   :  { %1236 = vmatmul.mubr.bf16.vlgmr.msra.gmra.mrb[20].mxu1 %v3947_v4  ;;  %3242 = vmatpush3.bf16.msra.mxu0 %v3574_v62  ;;  %v3634_v62 = vld [vmem:[%s4517_s1 + $0x518] sm:$0xff]  }
  0x75   :  { %3270 = vmatpush3.bf16.msra.mxu1 %v3575_v63  ;;  %3243 = vmatprep.subr.bf16.mxu0 %v3576_v1  ;;  %v3636_v63 = vld [vmem:[%s4517_s1 + $0x578] sm:$0xff]  }
  0x76   :  { %3271 = vmatprep.subr.bf16.mxu1 %v3577_v0  ;;  %1243 = vmatprep.mubr.bf16.mxu1 %v3983_v14  ;;  %v3635_v0 = vld [vmem:[%s4517_s1 + $0x4d8] sm:$0xff]  }
  0x77   :  { %1738 = vmatprep.mubr.bf16.mxu0 %v3806_v32  ;;  %v3586_v32 = vld [vmem:[%s4517_s1 + $0x338] sm:$0xff]  }
  0x78   :  { %3244 = vmatpush3.bf16.msra.mxu0 %v3578_v2  ;;  %v3637_v1 = vld [vmem:[%s4517_s1 + $0x538] sm:$0xff]   ;;  %v3638_v2 = vld [vmem:[%s4517_s1 + $0x520] sm:$0xff]  }
  0x79   :  { %3272 = vmatpush3.bf16.msra.mxu1 %v3579_v3  ;;  %3245 = vmatprep.subr.bf16.mxu0 %v3580_v7  ;;  %v3640_v3 = vld [vmem:[%s4517_s1 + $0x580] sm:$0xff]   ;;  %v3642_v7 = vld [vmem:[%s4517_s1 + $0x528] sm:$0xff]  }
  0x7a   :  { %3273 = vmatprep.subr.bf16.mxu1 %v3581_v6  ;;  %v3641_v6 = vld [vmem:[%s4517_s1 + $0x540] sm:$0xff]  }
  0x7c   :  { %1244 = vmatmul.mubr.bf16.gmra.mrb[24].mxu1 %v3991_v16  ;;  %3246 = vmatpush3.bf16.msra.mxu0 %v3582_v8  ;;  %v3643_v8 = vld [vmem:[%s4517_s1 + $0x4e8] sm:$0xff]  }
  0x7d   :  { %3274 = vmatpush3.bf16.msra.mxu1 %v3583_v9  ;;  %1787 = vmatprep.mubr.bf16.mxu1 %v3811_v33  ;;  %v3591_v33 = vld [vmem:[%s4517_s1 + $0x3c0] sm:$0xff]   ;;  %v3645_v9 = vld [vmem:[%s4517_s1 + $0x548] sm:$0xff]  }
  0x7e   :  { %3275 = vmatprep.subr.bf16.mxu1 %v3585_v10  ;;  %3247 = vmatprep.subr.bf16.mxu0 %v3584_v11  ;;  %v3646_v10 = vld [vmem:[%s4517_s1 + $0x5f0] sm:$0xff]  }
  0x7f   :  { %v3647_v11 = vld [vmem:[%s4517_s1 + $0x590] sm:$0xff]  }
  0x80   :  { %3248 = vmatpush3.bf16.msra.mxu0 %v3586_v32  ;;  %v3648_v32 = vld [vmem:[%s4517_s1 + $0x5b0] sm:$0xff]  }
  0x81   :  { %3276 = vmatpush3.bf16.msra.mxu1 %v3587_v12  ;;  %3249 = vmatprep.subr.bf16.mxu0 %v3588_v15  ;;  %v3686_v12 = vmov 0   ;;  %v3650_v15 = vld [vmem:[%s4517_s1 + $0x5f8] sm:$0xff]  }
  0x82   :  { %3277 = vmatprep.subr.bf16.mxu1 %v3589_v13  ;;  %3450 = vset.pattern.permute.xlu0 %v3686_v12  ;;  %v3649_v13 = vld [vmem:[%s4517_s1 + $0x550] sm:$0xff]  }
  0x83   :  { %3451 = vset.pattern.permute.xlu1 %v3686_v12 }
  0x84   :  { %3250 = vmatpush3.bf16.msra.mxu0 %v3590_v17  ;;  %v3651_v17 = vld [vmem:[%s4517_s1 + $0x598] sm:$0xff]  }
  0x85   :  { %3278 = vmatpush3.bf16.msra.mxu1 %v3591_v33  ;;  %3251 = vmatprep.subr.bf16.mxu0 %v3592_v19  ;;  %v3674_v33 = vld [vmem:[%s4518_s0] ss:$28 sps:$4 sm:$0xff]  }
  0x86   :  { %3279 = vmatprep.subr.bf16.mxu1 %v3593_v18  ;;  %v3652_v18 = vld [vmem:[%s4517_s1 + $0x5b8] sm:$0xff]  }
  0x87   :  { %v3653_v19 = vld [vmem:[%s4517_s1 + $0x558] sm:$0xff]  }
  0x88   :  { %3252 = vmatpush3.bf16.msra.mxu0 %v3594_v20  ;;  %v3675_v20 = vld [vmem:[%s4518_s0 + $0x3c] ss:$28 sps:$4 sm:$0xff]  }
  0x89   :  { %3280 = vmatpush3.bf16.msra.mxu1 %v3595_v21  ;;  %3253 = vmatprep.subr.bf16.mxu0 %v3596_v23  ;;  %v3654_v21 = vld [vmem:[%s4517_s1 + $0x600] sm:$0xff]  }
  0x8a   :  { %3281 = vmatprep.subr.bf16.mxu1 %v3597_v22  ;;  %v3655_v22 = vld [vmem:[%s4517_s1 + $0x5a0] sm:$0xff]  }
  0x8b   :  { %v3656_v23 = vld [vmem:[%s4517_s1 + $0x5c0] sm:$0xff]  }
  0x8c   :  { %3254 = vmatpush3.bf16.msra.mxu0 %v3598_v24  ;;  %v3657_v24 = vld [vmem:[%s4517_s1 + $0x560] sm:$0xff]  }
  0x8d   :  { %3282 = vmatpush3.bf16.msra.mxu1 %v3599_v25  ;;  %3255 = vmatprep.subr.bf16.mxu0 %v3600_v27  ;;  %v3658_v25 = vld [vmem:[%s4517_s1 + $0x608] sm:$0xff]  }
  0x8e   :  { %3283 = vmatprep.subr.bf16.mxu1 %v3601_v26  ;;  %v3659_v26 = vld [vmem:[%s4517_s1 + $0x5a8] sm:$0xff]  }
  0x8f   :  { %v3660_v27 = vld [vmem:[%s4517_s1 + $0x5c8] sm:$0xff]  }
  0x90   :  { %3256 = vmatpush3.bf16.msra.mxu0 %v3602_v28  ;;  %v3676_v28 = vld [vmem:[%s4518_s0 + $0x38] ss:$28 sps:$4 sm:$0xff]  }
  0x91   :  { %3284 = vmatpush3.bf16.msra.mxu1 %v3603_v29  ;;  %3297 = vmatprep.subr.bf16.mxu0 %v3604_v31  ;;  %v3661_v29 = vld [vmem:[%s4517_s1 + $0x568] sm:$0xff]   ;;  %v3662_v31 = vld [vmem:[%s4517_s1 + $0x610] sm:$0xff]  }
  0x92   :  { %3433 = vmatprep.subr.bf16.mxu1 %v3605_v30 }
  0x93   :  { %1739 = vmatmul.mubr.bf16.vlgmr.msra.gmra.mrb[28].mxu0 %v3817_v34  ;;  %v3611_v34 = vld [vmem:[%s4517_s1 + $0x430] sm:$0xff]  }
  0x94   :  { %1788 = vmatmul.mubr.bf16.vlgmr.msra.gmra.mrb[28].mxu1 %v3822_v35  ;;  %3298 = vmatpush3.bf16.msra.mxu0 %v3606_v36  ;;  %v3609_v35 = vld [vmem:[%s4517_s1 + $0x470] sm:$0xff]  }
  0x95   :  { %3434 = vmatpush3.bf16.msra.mxu1 %v3605_v30  ;;  %1746 = vmatprep.mubr.bf16.mxu0 %v3845_v41  ;;  %v3612_v41 = vld [vmem:[%s4517_s1 + $0x478] sm:$0xff]   ;;  %v3677_v30 = vld [vmem:[%s4518_s0 + $0x14] ss:$28 sps:$4 sm:$0xff]  }
  0x96   :  { %3299 = vmatprep.subr.bf16.mxu0 %v3607_v37  ;;  %1795 = vmatprep.mubr.bf16.mxu1 %v3850_v42  ;;  %v3613_v42 = vld [vmem:[%s4517_s1 + $0x438] sm:$0xff]   ;;  %v3669_v36 = vld [vmem:[%s4517_s1 + $0x630] sm:$0xff]   ;;  %v2507_v37 = vld [vmem:[%s4519_s2] sm:$0xff] }
  0x97   :  { %3435 = vmatprep.subr.bf16.mxu1 %v3610_v38  ;;  %2513 = vperm.xlu0 %3450, %v2507_v37  }
  0x98   :  { %3300 = vmatpush3.bf16.msra.mxu0 %v3608_v39  ;;  %v3663_v39 = vld [vmem:[%s4517_s1 + $0x5d0] sm:$0xff]  }
  0x99   :  { %3436 = vmatpush3.bf16.msra.mxu1 %v3610_v38  ;;  %3301 = vmatprep.subr.bf16.mxu0 %v3609_v35  ;;  %v2509_v38 = vld [vmem:[%s4519_s2 + $0x10] sm:$0xff]  ;;  %v2510_v35 = vld [vmem:[%s4519_s2 + $0x18] sm:$0xff] }
  0x9a   :  { %3329 = vmatprep.subr.bf16.mxu1 %v3614_v40  ;;  %2523 = vperm.xlu1 %3451, %v2509_v38   ;;  %v2508_v40 = vld [vmem:[%s4519_s2 + $0x8] sm:$0xff] }
  0x9b   :  { %1747 = vmatmul.mubr.bf16.gmra.mrb[32].mxu0 %v3855_v43  ;;  %v3617_v43 = vld [vmem:[%s4517_s1 + $0x440] sm:$0xff]   ;;  %2518 = vperm.xlu0 %3450, %v2508_v40  }
  0x9c   :  { %1796 = vmatmul.mubr.bf16.gmra.mrb[32].mxu1 %v3861_v44  ;;  %3302 = vmatpush3.bf16.msra.mxu0 %v3611_v34  ;;  %v3616_v44 = vld [vmem:[%s4517_s1 + $0x4b0] sm:$0xff]   ;;  %v3664_v34 = vld [vmem:[%s4517_s1 + $0x618] sm:$0xff]  }
  0x9d   :  { %3437 = vmatprep.mubr.msk.bf16.mxu1 %vm501_vm0, %v3884_v50  ;;  %1836 = vmatprep.mubr.bf16.mxu0 %v3952_v5  ;;  %v3618_v50 = vld [vmem:[%s4517_s1 + $0x4f8] sm:$0xff]   ;;  %v3619_v5 = vld [vmem:[%s4517_s1 + $0x488] sm:$0xff]  }
  0x9e   :  { %3303 = vmatprep.subr.bf16.mxu0 %v3612_v41  ;;  %v3671_v41 = vld [vmem:[%s4517_s1 + $0x638] sm:$0xff]   ;;  %2528 = vperm.xlu1 %3451, %v2510_v35  }
  0xa0   :  { %3304 = vmatpush3.bf16.msra.mxu0 %v3613_v42  ;;  %v3678_v42 = vld [vmem:[%s4518_s0 + $0x8] ss:$28 sps:$4 sm:$0xff]  }
  0xa1   :  { %3305 = vmatprep.subr.bf16.mxu0 %v3615_v45  ;;  %v3665_v45 = vld [vmem:[%s4517_s1 + $0x5d8] sm:$0xff]  }
  0xa4   :  { %3438 = vmatmul.mubr.msk.bf16.vlgmr.msra.gmra.mrb[36].mxu1 %vm501_vm0, %v3897_v53  ;;  %3306 = vmatpush3.bf16.msra.mxu0 %v3617_v43  ;;  %v3622_v53 = vld [vmem:[%s4517_s1 + $0x500] sm:$0xff]  }
  0xa5   :  { %3330 = vmatpush3.bf16.msra.mxu1 %v3616_v44  ;;  %2339 = vmatprep.mubr.bf16.mxu1 %v3672_v48  ;;  %v3679_v44 = vld [vmem:[%s4518_s0 + $0x44] ss:$28 sps:$4 sm:$0xff]   ;;  %v3681_v48 = vld [vmem:[%s4518_s0 + $0x18] ss:$28 sps:$4 sm:$0xff]  }
  0xa6   :  { %3331 = vmatprep.subr.bf16.mxu1 %v3618_v50  ;;  %3307 = vmatprep.subr.bf16.mxu0 %v3619_v5  ;;  %v3666_v43 = vld [vmem:[%s4517_s1 + $0x620] sm:$0xff]   ;;  %v3668_v5 = vld [vmem:[%s4517_s1 + $0x628] sm:$0xff]  }
  0xa7   :  { %v3667_v50 = vld [vmem:[%s4517_s1 + $0x5e0] sm:$0xff]  }
  0xa8   :  { %3308 = vmatpush3.bf16.msra.mxu0 %v3621_v47  ;;  %v3670_v47 = vld [vmem:[%s4517_s1 + $0x5e8] sm:$0xff]  }
  0xa9   :  { %3332 = vmatpush3.bf16.msra.mxu1 %v3620_v46  ;;  %3309 = vmatprep.subr.bf16.mxu0 %v3623_v49  ;;  %v3680_v46 = vld [vmem:[%s4518_s0 + $0x40] ss:$28 sps:$4 sm:$0xff]   ;;  %v3683_v49 = vld [vmem:[%s4518_s0 + $0x50] ss:$28 sps:$4 sm:$0xff]  }
  0xaa   :  { %3333 = vmatprep.subr.bf16.mxu1 %v3622_v53  ;;  %v3682_v53 = vld [vmem:[%s4518_s0 + $0x10] ss:$28 sps:$4 sm:$0xff]  }
  0xac   :  { %3310 = vmatpush3.bf16.msra.mxu0 %v3625_v52  ;;  %v3685_v52 = vld [vmem:[%s4518_s0 + $0x48] ss:$28 sps:$4 sm:$0xff]  }
  0xad   :  { %3334 = vmatpush3.bf16.msra.mxu1 %v3624_v51  ;;  %3311 = vmatprep.subr.bf16.mxu0 %v3627_v55  ;;  %v3684_v51 = vld [vmem:[%s4518_s0 + $0x4c] ss:$28 sps:$4 sm:$0xff]  }
  0xae   :  { %3335 = vmatprep.subr.bf16.mxu1 %v3626_v54 }
  0xb0   :  { %3312 = vmatpush3.bf16.msra.mxu0 %v3629_v57 }
  0xb1   :  { %3336 = vmatpush3.bf16.msra.mxu1 %v3628_v56  ;;  %3357 = vmatprep.subr.bf16.mxu0 %v3632_v59 }
  0xb2   :  { %3337 = vmatprep.subr.bf16.mxu1 %v3630_v58 }
  0xb3   :  { %1837 = vmatmul.mubr.bf16.vlgmr.msra.gmra.mrb[36].mxu0 %v3947_v4  ;;  %v3639_v4 = vld [vmem:[%s4517_s1 + $0x4e0] sm:$0xff]  }
  0xb4   :  { %3358 = vmatpush3.bf16.msra.mxu0 %v3633_v61  ;;  %1844 = vmatprep.mubr.bf16.mxu0 %v3983_v14  ;;  %v3644_v14 = vld [vmem:[%s4517_s1 + $0x588] sm:$0xff]  }
  0xb5   :  { %3338 = vmatpush3.bf16.msra.mxu1 %v3631_v60  ;;  %3359 = vmatprep.subr.bf16.mxu0 %v3636_v63 }
  0xb6   :  { %3339 = vmatprep.subr.bf16.mxu1 %v3634_v62 }
  0xb8   :  { %3360 = vmatpush3.bf16.msra.mxu0 %v3637_v1 }
  0xb9   :  { %3340 = vmatpush3.bf16.msra.mxu1 %v3635_v0  ;;  %3361 = vmatprep.subr.bf16.mxu0 %v3640_v3 }
  0xba   :  { %3341 = vmatprep.subr.bf16.mxu1 %v3638_v2 }
  0xbb   :  { %1845 = vmatmul.mubr.bf16.gmra.mrb[40].mxu0 %v3991_v16  ;;  %v3673_v16 = vld [vmem:[%s4518_s0 + $0xc] ss:$28 sps:$4 sm:$0xff]  }
  0xbc   :  { %3362 = vmatpush3.bf16.msra.mxu0 %v3641_v6  ;;  %2388 = vmatprep.mubr.bf16.mxu0 %v3673_v16 }
  0xbd   :  { %3342 = vmatpush3.bf16.msra.mxu1 %v3639_v4  ;;  %3363 = vmatprep.subr.bf16.mxu0 %v3644_v14 }
  0xbe   :  { %3343 = vmatprep.subr.bf16.mxu1 %v3642_v7 }
  0xc0   :  { %3364 = vmatpush3.bf16.msra.mxu0 %v3645_v9 }
  0xc1   :  { %3344 = vmatpush3.bf16.msra.mxu1 %v3643_v8  ;;  %3365 = vmatprep.subr.bf16.mxu0 %v3647_v11 }
  0xc2   :  { %3385 = vmatprep.subr.bf16.mxu1 %v3646_v10 }
  0xc4   :  { %2340 = vmatmul.mubr.bf16.vlgmr.msra.gmra.mrb[40].mxu1 %v3674_v33  ;;  %3366 = vmatpush3.bf16.msra.mxu0 %v3649_v13 }
  0xc5   :  { %3386 = vmatpush3.bf16.msra.mxu1 %v3648_v32  ;;  %2347 = vmatprep.mubr.bf16.mxu1 %v3675_v20 }
  0xc6   :  { %3387 = vmatprep.subr.bf16.mxu1 %v3650_v15  ;;  %3367 = vmatprep.subr.bf16.mxu0 %v3651_v17 }
  0xc8   :  { %3368 = vmatpush3.bf16.msra.mxu0 %v3653_v19 }
  0xc9   :  { %3388 = vmatpush3.bf16.msra.mxu1 %v3652_v18  ;;  %3369 = vmatprep.subr.bf16.mxu0 %v3655_v22 }
  0xca   :  { %3389 = vmatprep.subr.bf16.mxu1 %v3654_v21 }
  0xcc   :  { %2348 = vmatmul.mubr.bf16.gmra.mrb[44].mxu1 %v3676_v28  ;;  %3370 = vmatpush3.bf16.msra.mxu0 %v3657_v24 }
  0xcd   :  { %3390 = vmatpush3.bf16.msra.mxu1 %v3656_v23  ;;  %2437 = vmatprep.mubr.bf16.mxu1 %v3677_v30 }
  0xce   :  { %3391 = vmatprep.subr.bf16.mxu1 %v3658_v25  ;;  %3371 = vmatprep.subr.bf16.mxu0 %v3659_v26 }
  0xd0   :  { %3372 = vmatpush3.bf16.msra.mxu0 %v3661_v29 }
  0xd1   :  { %3392 = vmatpush3.bf16.msra.mxu1 %v3660_v27  ;;  %3441 = vmatprep.subr.bf16.mxu0 %v3669_v36 }
  0xd2   :  { %3393 = vmatprep.subr.bf16.mxu1 %v3662_v31 }
  0xd3   :  { %2389 = vmatmul.mubr.bf16.vlgmr.msra.gmra.mrb[44].mxu0 %v3678_v42 }
  0xd4   :  { %2396 = vmatprep.mubr.bf16.mxu0 %v3679_v44  ;;  %3442 = vmatpush3.bf16.msra.mxu0 %v3669_v36 }
  0xd5   :  { %3394 = vmatpush3.bf16.msra.mxu1 %v3663_v39  ;;  %3443 = vmatprep.subr.bf16.mxu0 %v3671_v41 }
  0xd6   :  { %3395 = vmatprep.subr.bf16.mxu1 %v3664_v34 }
  0xd8   :  { %3444 = vmatpush3.bf16.msra.mxu0 %v3671_v41 }
  0xd9   :  { %3396 = vmatpush3.bf16.msra.mxu1 %v3665_v45 }
  0xda   :  { %3397 = vmatprep.subr.bf16.mxu1 %v3666_v43 }
  0xdb   :  { %2397 = vmatmul.mubr.bf16.gmra.mrb[48].mxu0 %v3680_v46 }
  0xdc   :  { %3445 = vmatprep.mubr.msk.bf16.mxu0 %vm501_vm0, %v3681_v48 }
  0xdd   :  { %3398 = vmatpush3.bf16.msra.mxu1 %v3667_v50 }
  0xde   :  { %3399 = vmatprep.subr.bf16.mxu1 %v3668_v5 }
  0xe1   :  { %3400 = vmatpush3.bf16.msra.mxu1 %v3670_v47 }
  0xe3   :  { %3446 = vmatmul.mubr.msk.bf16.vlgmr.msra.gmra.mrb[52].mxu0 %vm501_vm0, %v3683_v49 }
  0xe4   :  { %2438 = vmatmul.mubr.bf16.vlgmr.msra.gmra.mrb[48].mxu1 %v3682_v53 }
  0xe5   :  { %2445 = vmatprep.mubr.bf16.mxu1 %v3684_v51 }
  0xec   :  { %2446 = vmatmul.mubr.bf16.gmra.mrb[52].mxu1 %v3685_v52 }
  0xf6   :  { %v3081_v54 = vpop.f32.mrb[0].mxu0 }
  0xf7   :  { %v3109_v55 = vpop.f32.mrb[0].mxu1  ;;  %v3082_v56 = vpop.f32.mrb[1].mxu0 }
  0xf8   :  { %v3110_v57 = vpop.f32.mrb[1].mxu1  ;;  %v3083_v58 = vadd.f32 %v3082_v56, %v3081_v54  ;;  %v3084_v60 = vpop.f32.mrb[2].mxu0 }
  0xf9   :  { %v3111_v59 = vadd.f32 %v3110_v57, %v3109_v55  ;;  %v3112_v61 = vpop.f32.mrb[2].mxu1  ;;  %v3085_v62 = vpop.f32.mrb[3].mxu0 }
  0xfa   :  { %v3113_v63 = vpop.f32.mrb[3].mxu1  ;;  %v3086_v1 = vadd.f32 %v3085_v62, %v3084_v60 }
  0xfb   :  { %v592_v0 = vadd.f32 %v3111_v59, %v3083_v58  ;;  %v3114_v2 = vadd.f32 %v3113_v63, %v3112_v61 }
  0xfd   :  { %v595_v3 = vadd.f32 %v3114_v2, %v3086_v1 }
  0xfe   :  { %v3087_v4 = vpop.f32.mrb[4].mxu0 }
  0xff   :  { %v3115_v6 = vpop.f32.mrb[4].mxu1  ;;  %v3088_v7 = vpop.f32.mrb[5].mxu0 }
 0x100   :  { %v3116_v14 = vpop.f32.mrb[5].mxu1  ;;  %v3089_v8 = vadd.f32 %v3088_v7, %v3087_v4  ;;  %v3090_v10 = vpop.f32.mrb[6].mxu0 }
 0x101   :  { %v3117_v9 = vadd.f32 %v3116_v14, %v3115_v6  ;;  %v3118_v11 = vpop.f32.mrb[6].mxu1  ;;  %v3091_v16 = vpop.f32.mrb[7].mxu0 }
 0x102   :  { %v3119_v32 = vpop.f32.mrb[7].mxu1  ;;  %v3092_v13 = vadd.f32 %v3091_v16, %v3090_v10 }
 0x103   :  { %v600_v12 = vadd.f32 %v3117_v9, %v3089_v8  ;;  %v3120_v15 = vadd.f32 %v3119_v32, %v3118_v11 }
 0x105   :  { %v603_v17 = vadd.f32 %v3120_v15, %v3092_v13 }
 0x107   :  { %v3423_v33 = vpop.f32.mrb[8].mxu1 }
 0x108   :  { %v689_v18 = vpop.f32.mrb[9].mxu1 }
 0x109   :  { %v3424_v19 = vpop.f32.mrb[10].mxu1 }
 0x10a   :  { %v692_v20 = vpop.f32.mrb[11].mxu1 }
 0x116   :  { %v3137_v21 = vpop.f32.mrb[8].mxu0 }
 0x117   :  { %v3138_v22 = vpop.f32.mrb[9].mxu0 }
 0x118   :  { %v3139_v23 = vadd.f32 %v3138_v22, %v3137_v21  ;;  %v3140_v24 = vpop.f32.mrb[10].mxu0 }
 0x119   :  { %v3141_v25 = vpop.f32.mrb[11].mxu0 }
 0x11a   :  { %v641_v26 = vadd.f32 %v3139_v23, %v592_v0  ;;  %v3142_v27 = vadd.f32 %v3141_v25, %v3140_v24 }
 0x11c   :  { %v644_v28 = vadd.f32 %v3142_v27, %v595_v3  ;;  %v4481_v29 = vadd.f32 %v689_v18, %v641_v26 }
 0x11e   :  { %v3143_v30 = vpop.f32.mrb[12].mxu0  ;;  %v4483_v31 = vadd.f32 %v692_v20, %v644_v28 }
 0x11f   :  { %v3144_v36 = vpop.f32.mrb[13].mxu0 }
 0x120   :  { %v3145_v37 = vadd.f32 %v3144_v36, %v3143_v30  ;;  %v3146_v38 = vpop.f32.mrb[14].mxu0 }
 0x121   :  { %v3147_v39 = vpop.f32.mrb[15].mxu0 }
 0x122   :  { %v649_v40 = vadd.f32 %v3145_v37, %v600_v12  ;;  %v3148_v35 = vadd.f32 %v3147_v39, %v3146_v38 }
 0x124   :  { %v4485_v34 = vadd.f32 %v3423_v33, %v649_v40  ;;  %v652_v41 = vadd.f32 %v3148_v35, %v603_v17 }
 0x126   :  { %v4487_v42 = vadd.f32 %v3424_v19, %v652_v41 }
 0x127   :  { %v3169_v45 = vpop.f32.mrb[12].mxu1 }
 0x128   :  { %v3170_v44 = vpop.f32.mrb[13].mxu1 }
 0x129   :  { %v3171_v43 = vadd.f32 %v3170_v44, %v3169_v45  ;;  %v3172_v50 = vpop.f32.mrb[14].mxu1 }
 0x12a   :  { %v3173_v5 = vpop.f32.mrb[15].mxu1 }
 0x12b   :  { %v3174_v46 = vadd.f32 %v3173_v5, %v3172_v50 }
 0x12f   :  { %v3175_v47 = vpop.f32.mrb[16].mxu1 }
 0x130   :  { %v3176_v48 = vpop.f32.mrb[17].mxu1 }
 0x131   :  { %v3177_v53 = vadd.f32 %v3176_v48, %v3175_v47  ;;  %v3178_v49 = vpop.f32.mrb[18].mxu1 }
 0x132   :  { %v3179_v51 = vpop.f32.mrb[19].mxu1 }
 0x133   :  { %v3180_v52 = vadd.f32 %v3179_v51, %v3178_v49 }
 0x136   :  { %v3197_v54 = vpop.f32.mrb[16].mxu0 }
 0x137   :  { %v3198_v55 = vpop.f32.mrb[17].mxu0 }
 0x138   :  { %v3199_v56 = vadd.f32 %v3198_v55, %v3197_v54  ;;  %v3200_v57 = vpop.f32.mrb[18].mxu0 }
 0x139   :  { %v3201_v58 = vpop.f32.mrb[19].mxu0 }
 0x13a   :  { %v1189_v59 = vadd.f32 %v3199_v56, %v3171_v43  ;;  %v3202_v60 = vadd.f32 %v3201_v58, %v3200_v57 }
 0x13c   :  { %v1192_v61 = vadd.f32 %v3202_v60, %v3174_v46 }
 0x13e   :  { %v3203_v62 = vpop.f32.mrb[20].mxu0 }
 0x13f   :  { %v3204_v63 = vpop.f32.mrb[21].mxu0 }
 0x140   :  { %v3205_v0 = vadd.f32 %v3204_v63, %v3203_v62  ;;  %v3206_v1 = vpop.f32.mrb[22].mxu0 }
 0x141   :  { %v3207_v2 = vpop.f32.mrb[23].mxu0 }
 0x142   :  { %v1197_v3 = vadd.f32 %v3205_v0, %v3177_v53  ;;  %v3208_v4 = vadd.f32 %v3207_v2, %v3206_v1 }
 0x144   :  { %v1200_v6 = vadd.f32 %v3208_v4, %v3180_v52 }
 0x146   :  { %v3431_v8 = vpop.f32.mrb[24].mxu0 }
 0x147   :  { %v3225_v7 = vpop.f32.mrb[20].mxu1  ;;  %v1286_v11 = vpop.f32.mrb[25].mxu0 }
 0x148   :  { %v3226_v14 = vpop.f32.mrb[21].mxu1  ;;  %v3432_v32 = vpop.f32.mrb[26].mxu0 }
 0x149   :  { %v3227_v9 = vadd.f32 %v3226_v14, %v3225_v7  ;;  %v3228_v10 = vpop.f32.mrb[22].mxu1  ;;  %v1289_v15 = vpop.f32.mrb[27].mxu0 }
 0x14a   :  { %v3229_v16 = vpop.f32.mrb[23].mxu1 }
 0x14b   :  { %v3230_v12 = vadd.f32 %v3229_v16, %v3228_v10  ;;  %v1238_v13 = vadd.f32 %v3227_v9, %v1189_v59 }
 0x14d   :  { %v1287_v17 = vadd.f32 %v1286_v11, %v1238_v13  ;;  %v1241_v33 = vadd.f32 %v3230_v12, %v1192_v61 }
 0x14f   :  { %v1301_v18 = vmax.f32 %v4481_v29, %v1287_v17  ;;  %v1290_v19 = vadd.f32 %v1289_v15, %v1241_v33  ;;  %v3231_v20 = vpop.f32.mrb[24].mxu1 }
 0x150   :  { %v3232_v21 = vpop.f32.mrb[25].mxu1 }
 0x151   :  { %v1302_v22 = vmax.f32 %v4483_v31, %v1290_v19  ;;  %v3233_v23 = vadd.f32 %v3232_v21, %v3231_v20  ;;  %v3234_v24 = vpop.f32.mrb[26].mxu1 }
 0x152   :  { %v3235_v25 = vpop.f32.mrb[27].mxu1 }
 0x153   :  { %v1246_v26 = vadd.f32 %v3233_v23, %v1197_v3  ;;  %v3236_v27 = vadd.f32 %v3235_v25, %v3234_v24 }
 0x155   :  { %v1295_v28 = vadd.f32 %v3431_v8, %v1246_v26  ;;  %v1249_v30 = vadd.f32 %v3236_v27, %v1200_v6 }
 0x157   :  { %v4491_v36 = vadd.f32 %v3432_v32, %v1249_v30  ;;  %v1303_v37 = vmax.f32 %v4485_v34, %v1295_v28 }
 0x159   :  { %v1304_v38 = vmax.f32 %v4487_v42, %v4491_v36 }
 0x166   :  { %v3257_v39 = vpop.f32.mrb[28].mxu0 }
 0x167   :  { %v3285_v29 = vpop.f32.mrb[28].mxu1  ;;  %v3258_v35 = vpop.f32.mrb[29].mxu0 }
 0x168   :  { %v3286_v40 = vpop.f32.mrb[29].mxu1  ;;  %v3259_v45 = vadd.f32 %v3258_v35, %v3257_v39  ;;  %v3260_v44 = vpop.f32.mrb[30].mxu0 }
 0x169   :  { %v3287_v41 = vadd.f32 %v3286_v40, %v3285_v29  ;;  %v3288_v31 = vpop.f32.mrb[30].mxu1  ;;  %v3261_v50 = vpop.f32.mrb[31].mxu0 }
 0x16a   :  { %v3289_v43 = vpop.f32.mrb[31].mxu1  ;;  %v3262_v47 = vadd.f32 %v3261_v50, %v3260_v44 }
 0x16b   :  { %v3290_v5 = vadd.f32 %v3289_v43, %v3288_v31  ;;  %v1790_v46 = vadd.f32 %v3287_v41, %v3259_v45 }
 0x16d   :  { %v1793_v48 = vadd.f32 %v3290_v5, %v3262_v47 }
 0x16e   :  { %v3263_v49 = vpop.f32.mrb[32].mxu0 }
 0x16f   :  { %v3291_v53 = vpop.f32.mrb[32].mxu1  ;;  %v3264_v51 = vpop.f32.mrb[33].mxu0 }
 0x170   :  { %v3292_v34 = vpop.f32.mrb[33].mxu1  ;;  %v3265_v54 = vadd.f32 %v3264_v51, %v3263_v49  ;;  %v3266_v55 = vpop.f32.mrb[34].mxu0 }
 0x171   :  { %v3293_v52 = vadd.f32 %v3292_v34, %v3291_v53  ;;  %v3294_v42 = vpop.f32.mrb[34].mxu1  ;;  %v3267_v57 = vpop.f32.mrb[35].mxu0 }
 0x172   :  { %v3295_v56 = vpop.f32.mrb[35].mxu1  ;;  %v3268_v60 = vadd.f32 %v3267_v57, %v3266_v55  ;;  %v2514_v55 = vpop.permute.xlu0 %2513 }
 0x173   :  { %v3296_v58 = vadd.f32 %v3295_v56, %v3294_v42  ;;  %v1798_v59 = vadd.f32 %v3293_v52, %v3265_v54 }
 0x175   :  { %v1801_v61 = vadd.f32 %v3296_v58, %v3268_v60 }
 0x177   :  { %v3439_v62 = vpop.f32.mrb[36].mxu1 }
 0x178   :  { %v1887_v63 = vpop.f32.mrb[37].mxu1 }
 0x179   :  { %v3440_v0 = vpop.f32.mrb[38].mxu1 }
 0x17a   :  { %v1890_v1 = vpop.f32.mrb[39].mxu1 }
 0x186   :  { %v3313_v2 = vpop.f32.mrb[36].mxu0 }
 0x187   :  { %v3314_v3 = vpop.f32.mrb[37].mxu0 }
 0x188   :  { %v3315_v4 = vadd.f32 %v3314_v3, %v3313_v2  ;;  %v3316_v6 = vpop.f32.mrb[38].mxu0 }
 0x189   :  { %v3317_v7 = vpop.f32.mrb[39].mxu0 }
 0x18a   :  { %v1839_v14 = vadd.f32 %v3315_v4, %v1790_v46  ;;  %v3318_v8 = vadd.f32 %v3317_v7, %v3316_v6 }
 0x18c   :  { %v1888_v9 = vadd.f32 %v1887_v63, %v1839_v14  ;;  %v1842_v10 = vadd.f32 %v3318_v8, %v1793_v48  ;;  %v2519_v8 = vpop.permute.xlu0 %2518 }
 0x18e   :  { %v1891_v11 = vadd.f32 %v1890_v1, %v1842_v10  ;;  %v3319_v16 = vpop.f32.mrb[40].mxu0  ;;  %v1902_v32 = vmax.f32 %v1301_v18, %v1888_v9 }
 0x18f   :  { %v3320_v12 = vpop.f32.mrb[41].mxu0 }
 0x190   :  { %v3321_v13 = vadd.f32 %v3320_v12, %v3319_v16  ;;  %v3322_v15 = vpop.f32.mrb[42].mxu0  ;;  %v4496_v17 = vmax.f32 %v1302_v22, %v1891_v11 }
 0x191   :  { %v3323_v33 = vpop.f32.mrb[43].mxu0 }
 0x192   :  { %v1847_v19 = vadd.f32 %v3321_v13, %v1798_v59  ;;  %v3324_v20 = vadd.f32 %v3323_v33, %v3322_v15 }
 0x194   :  { %v1896_v21 = vadd.f32 %v3439_v62, %v1847_v19  ;;  %v1850_v23 = vadd.f32 %v3324_v20, %v1801_v61  ;;  %v2524_v19 = vpop.permute.xlu1 %2523 }
 0x196   :  { %v1899_v25 = vadd.f32 %v3440_v0, %v1850_v23  ;;  %v4498_v27 = vmax.f32 %v1303_v37, %v1896_v21 }
 0x197   :  { %v3345_v24 = vpop.f32.mrb[40].mxu1 }
 0x198   :  { %v3346_v26 = vpop.f32.mrb[41].mxu1  ;;  %v4500_v29 = vmax.f32 %v1304_v38, %v1899_v25  ;;  %v2529_v25 = vpop.permute.xlu1 %2528 }
 0x199   :  { %v3347_v28 = vadd.f32 %v3346_v26, %v3345_v24  ;;  %v3348_v30 = vpop.f32.mrb[42].mxu1 }
 0x19a   :  { %v3349_v36 = vpop.f32.mrb[43].mxu1 }
 0x19b   :  { %v3350_v18 = vadd.f32 %v3349_v36, %v3348_v30 }
 0x19f   :  { %v3351_v39 = vpop.f32.mrb[44].mxu1 }
 0x1a0   :  { %v3352_v40 = vpop.f32.mrb[45].mxu1 }
 0x1a1   :  { %v3353_v22 = vadd.f32 %v3352_v40, %v3351_v39  ;;  %v3354_v35 = vpop.f32.mrb[46].mxu1 }
 0x1a2   :  { %v3355_v41 = vpop.f32.mrb[47].mxu1 }
 0x1a3   :  { %v3356_v31 = vadd.f32 %v3355_v41, %v3354_v35 }
 0x1a6   :  { %v3373_v45 = vpop.f32.mrb[44].mxu0 }
 0x1a7   :  { %v3374_v44 = vpop.f32.mrb[45].mxu0 }
 0x1a8   :  { %v3375_v43 = vadd.f32 %v3374_v44, %v3373_v45  ;;  %v3376_v50 = vpop.f32.mrb[46].mxu0 }
 0x1a9   :  { %v3377_v5 = vpop.f32.mrb[47].mxu0 }
 0x1aa   :  { %v2391_v46 = vadd.f32 %v3375_v43, %v3347_v28  ;;  %v3378_v37 = vadd.f32 %v3377_v5, %v3376_v50 }
 0x1ac   :  { %v2394_v47 = vadd.f32 %v3378_v37, %v3350_v18 }
 0x1ae   :  { %v3379_v48 = vpop.f32.mrb[48].mxu0 }
 0x1af   :  { %v3380_v53 = vpop.f32.mrb[49].mxu0 }
 0x1b0   :  { %v3381_v49 = vadd.f32 %v3380_v53, %v3379_v48  ;;  %v3382_v38 = vpop.f32.mrb[50].mxu0 }
 0x1b1   :  { %v3383_v34 = vpop.f32.mrb[51].mxu0 }
 0x1b2   :  { %v2399_v51 = vadd.f32 %v3381_v49, %v3353_v22  ;;  %v3384_v52 = vadd.f32 %v3383_v34, %v3382_v38 }
 0x1b4   :  { %v2402_v42 = vadd.f32 %v3384_v52, %v3356_v31 }
 0x1b6   :  { %v3447_v57 = vpop.f32.mrb[52].mxu0 }
 0x1b7   :  { %v3401_v54 = vpop.f32.mrb[48].mxu1  ;;  %v2488_v60 = vpop.f32.mrb[53].mxu0 }
 0x1b8   :  { %v3402_v56 = vpop.f32.mrb[49].mxu1  ;;  %v3448_v62 = vpop.f32.mrb[54].mxu0 }
 0x1b9   :  { %v3403_v58 = vadd.f32 %v3402_v56, %v3401_v54  ;;  %v3404_v59 = vpop.f32.mrb[50].mxu1  ;;  %v2491_v1 = vpop.f32.mrb[55].mxu0 }
 0x1ba   :  { %v3405_v61 = vpop.f32.mrb[51].mxu1 }
 0x1bb   :  { %v3406_v63 = vadd.f32 %v3405_v61, %v3404_v59  ;;  %v2440_v0 = vadd.f32 %v3403_v58, %v2391_v46 }
 0x1bd   :  { %v2489_v2 = vadd.f32 %v2488_v60, %v2440_v0  ;;  %v2443_v3 = vadd.f32 %v3406_v63, %v2394_v47 }
 0x1bf   :  { %v2503_v4 = vmax.f32 %v1902_v32, %v2489_v2  ;;  %v2492_v6 = vadd.f32 %v2491_v1, %v2443_v3  ;;  %v3407_v7 = vpop.f32.mrb[52].mxu1 }
 0x1c0   :  { %v3408_v14 = vpop.f32.mrb[53].mxu1 }
 0x1c1   :  { %v2531_v9 = vadd.f32 %v2514_v55, %v2503_v4  ;;  %v3409_v10 = vadd.f32 %v3408_v14, %v3407_v7  ;;  %v3410_v11 = vpop.f32.mrb[54].mxu1  ;;  %v2504_v16 = vmax.f32 %v4496_v17, %v2492_v6 }
 0x1c2   :  { %v3411_v12 = vpop.f32.mrb[55].mxu1 }
 0x1c3   :  { %2535 = vst [vmem:[%s4520_s3] sm:$0xff] %v2531_v9  ;;  %v2448_v13 = vadd.f32 %v3409_v10, %v2399_v51  ;;  %v2532_v15 = vadd.f32 %v2519_v8, %v2504_v16  ;;  %v3412_v33 = vadd.f32 %v3411_v12, %v3410_v11 }
 0x1c5   :  { %2536 = vst [vmem:[%s4520_s3 + $0x8] sm:$0xff] %v2532_v15  ;;  %v2451_v32 = vadd.f32 %v3412_v33, %v2402_v42  ;;  %v2497_v20 = vadd.f32 %v3447_v57, %v2448_v13 }
 0x1c7   :  { %v2505_v21 = vmax.f32 %v4498_v27, %v2497_v20  ;;  %v2500_v23 = vadd.f32 %v3448_v62, %v2451_v32 }
 0x1c9   :  { %v2533_v24 = vadd.f32 %v2524_v19, %v2505_v21  ;;  %v2506_v17 = vmax.f32 %v4500_v29, %v2500_v23 }
 0x1cb   :  { %2537 = vst [vmem:[%s4520_s3 + $0x10] sm:$0xff] %v2533_v24  ;;  %v2534_v26 = vadd.f32 %v2529_v25, %v2506_v17 }
 0x1cd   :  { %2538 = vst [vmem:[%s4520_s3 + $0x18] sm:$0xff] %v2534_v26 }

// kernel: tudui_forward.6
= control target key start
LH: loop header
LB: loop body
LE: loop exit
PB: predicated region body
PF: predicated region fallthrough
CT: control target
= control target key end

     0   :  { %vm587_vm0 = vcmask 261120   ;;  %s5514_s1 = inlined_call_operand.vmem [shape: bf16[4,800,32], index: 1, kind: input, shape index: {}]   ;;  %s5515_s0 = inlined_call_operand.vmem [shape: bf16[64,800], index: 0, kind: input, shape index: {}]   ;;  %s5516_s2 = inlined_call_operand.vmem [shape: f32[64,1], index: 2, kind: input, shape index: {}]   ;;  %s5517_s3 = inlined_call_operand.vmem [shape: f32[64,32], index: 3, kind: output, shape index: {}]  }
   0x1   :  { %v4050_v0 = vld [vmem:[%s5514_s1 + $0x40] sm:$0xff]   ;;  %v4054_v4 = vld [vmem:[%s5514_s1 + $0x48] sm:$0xff]   ;;  %v4058_v8 = vld [vmem:[%s5514_s1 + $0x50] sm:$0xff]  }
   0x2   :  { %v4051_v1 = vld [vmem:[%s5514_s1 + $0xc0] sm:$0xff]   ;;  %3479 = vmatprep.subr.bf16.mxu0 %v4050_v0  ;;  %v4055_v5 = vld [vmem:[%s5514_s1 + $0xc8] sm:$0xff]   ;;  %v4059_v9 = vld [vmem:[%s5514_s1 + $0xd0] sm:$0xff]  }
   0x3   :  { %v4052_v2 = vld [vmem:[%s5514_s1] sm:$0xff]   ;;  %3519 = vmatprep.subr.bf16.mxu1 %v4051_v1  ;;  %v4056_v6 = vld [vmem:[%s5514_s1 + $0x8] sm:$0xff]   ;;  %v4060_v10 = vld [vmem:[%s5514_s1 + $0x10] sm:$0xff]  }
   0x4   :  { %v4053_v3 = vld [vmem:[%s5514_s1 + $0x80] sm:$0xff]   ;;  %3480 = vmatpush3.bf16.msra.mxu0 %v4052_v2  ;;  %v4057_v7 = vld [vmem:[%s5514_s1 + $0x88] sm:$0xff]   ;;  %v4061_v11 = vld [vmem:[%s5514_s1 + $0x90] sm:$0xff]  }
   0x5   :  { %3520 = vmatpush3.bf16.msra.mxu1 %v4053_v3  ;;  %3481 = vmatprep.subr.bf16.mxu0 %v4054_v4  ;;  %v4062_v12 = vld [vmem:[%s5514_s1 + $0x58] sm:$0xff]   ;;  %v4066_v16 = vld [vmem:[%s5514_s1 + $0x60] sm:$0xff]   ;;  %v4070_v20 = vld [vmem:[%s5514_s1 + $0x68] sm:$0xff]  }
   0x6   :  { %3521 = vmatprep.subr.bf16.mxu1 %v4055_v5  ;;  %v4063_v13 = vld [vmem:[%s5514_s1 + $0xd8] sm:$0xff]   ;;  %v4067_v17 = vld [vmem:[%s5514_s1 + $0xe0] sm:$0xff]   ;;  %v4071_v21 = vld [vmem:[%s5514_s1 + $0xe8] sm:$0xff]  }
   0x7   :  { %v4064_v14 = vld [vmem:[%s5514_s1 + $0x18] sm:$0xff]   ;;  %v4068_v18 = vld [vmem:[%s5514_s1 + $0x20] sm:$0xff]   ;;  %v4072_v22 = vld [vmem:[%s5514_s1 + $0x28] sm:$0xff]  }
   0x8   :  { %3482 = vmatpush3.bf16.msra.mxu0 %v4056_v6  ;;  %v4065_v15 = vld [vmem:[%s5514_s1 + $0x98] sm:$0xff]   ;;  %v4069_v19 = vld [vmem:[%s5514_s1 + $0xa0] sm:$0xff]   ;;  %v4073_v23 = vld [vmem:[%s5514_s1 + $0xa8] sm:$0xff]  }
   0x9   :  { %3522 = vmatpush3.bf16.msra.mxu1 %v4057_v7  ;;  %3483 = vmatprep.subr.bf16.mxu0 %v4058_v8  ;;  %v4074_v24 = vld [vmem:[%s5514_s1 + $0x70] sm:$0xff]   ;;  %v4078_v28 = vld [vmem:[%s5514_s1 + $0x78] sm:$0xff]   ;;  %v4438_v32 = vld [vmem:[%s5515_s0 + $0x4] ss:$28 sps:$4 sm:$0xff]  }
   0xa   :  { %3523 = vmatprep.subr.bf16.mxu1 %v4059_v9  ;;  %v4075_v25 = vld [vmem:[%s5514_s1 + $0xf0] sm:$0xff]   ;;  %v4079_v29 = vld [vmem:[%s5514_s1 + $0xf8] sm:$0xff]   ;;  %v4443_v33 = vld [vmem:[%s5515_s0 + $0xc] ss:$28 sps:$4 sm:$0xff]   ;;  %632 = vmatprep.mubr.bf16.mxu0 %v4438_v32 }
   0xb   :  { %v4076_v26 = vld [vmem:[%s5514_s1 + $0x30] sm:$0xff]   ;;  %v4080_v30 = vld [vmem:[%s5514_s1 + $0x38] sm:$0xff]   ;;  %v4454_v35 = vld [vmem:[%s5515_s0 + $0x8] ss:$28 sps:$4 sm:$0xff]   ;;  %697 = vmatprep.mubr.bf16.mxu1 %v4443_v33 }
   0xc   :  { %3484 = vmatpush3.bf16.msra.mxu0 %v4060_v10  ;;  %v4077_v27 = vld [vmem:[%s5514_s1 + $0xb0] sm:$0xff]   ;;  %v4081_v31 = vld [vmem:[%s5514_s1 + $0xb8] sm:$0xff]   ;;  %v4088_v36 = vld [vmem:[%s5514_s1 + $0x140] sm:$0xff]  }
   0xd   :  { %3524 = vmatpush3.bf16.msra.mxu1 %v4061_v11  ;;  %3485 = vmatprep.subr.bf16.mxu0 %v4062_v12  ;;  %v4449_v34 = vld [vmem:[%s5515_s0] ss:$28 sps:$4 sm:$0xff]   ;;  %v4090_v38 = vld [vmem:[%s5514_s1 + $0x148] sm:$0xff]   ;;  %v4488_v43 = vld [vmem:[%s5515_s0 + $0x38] ss:$28 sps:$4 sm:$0xff]  }
   0xe   :  { %3525 = vmatprep.subr.bf16.mxu1 %v4063_v13  ;;  %v4089_v37 = vld [vmem:[%s5514_s1 + $0x100] sm:$0xff]   ;;  %v4091_v39 = vld [vmem:[%s5514_s1 + $0x108] sm:$0xff]   ;;  %v4474_v40 = vld [vmem:[%s5515_s0 + $0x3c] ss:$28 sps:$4 sm:$0xff]  }
   0xf   :  { %v4479_v41 = vld [vmem:[%s5515_s0 + $0x44] ss:$28 sps:$4 sm:$0xff]   ;;  %v4099_v45 = vld [vmem:[%s5514_s1 + $0x150] sm:$0xff]   ;;  %v4101_v47 = vld [vmem:[%s5514_s1 + $0x158] sm:$0xff]  }
  0x10   :  { %3486 = vmatpush3.bf16.msra.mxu0 %v4064_v14  ;;  %v4096_v42 = vld [vmem:[%s5514_s1 + $0x180] sm:$0xff]   ;;  %v4100_v46 = vld [vmem:[%s5514_s1 + $0x110] sm:$0xff]   ;;  %v4102_v48 = vld [vmem:[%s5514_s1 + $0x118] sm:$0xff]  }
  0x11   :  { %3526 = vmatpush3.bf16.msra.mxu1 %v4065_v15  ;;  %3487 = vmatprep.subr.bf16.mxu0 %v4066_v16  ;;  %v4494_v44 = vld [vmem:[%s5515_s0 + $0x40] ss:$28 sps:$4 sm:$0xff]   ;;  %v4513_v49 = vld [vmem:[%s5515_s0 + $0x74] ss:$28 sps:$4 sm:$0xff]   ;;  %v4111_v55 = vld [vmem:[%s5514_s1 + $0x168] sm:$0xff]  }
  0x12   :  { %3527 = vmatprep.subr.bf16.mxu1 %v4067_v17  ;;  %v4518_v50 = vld [vmem:[%s5515_s0 + $0x7c] ss:$28 sps:$4 sm:$0xff]   ;;  %v4523_v51 = vld [vmem:[%s5515_s0 + $0x70] ss:$28 sps:$4 sm:$0xff]   ;;  %v4109_v53 = vld [vmem:[%s5514_s1 + $0x160] sm:$0xff]  }
  0x13   :  { %v4528_v52 = vld [vmem:[%s5515_s0 + $0x78] ss:$28 sps:$4 sm:$0xff]   ;;  %v4110_v54 = vld [vmem:[%s5514_s1 + $0x120] sm:$0xff]   ;;  %v4112_v56 = vld [vmem:[%s5514_s1 + $0x128] sm:$0xff]  }
  0x14   :  { %3488 = vmatpush3.bf16.msra.mxu0 %v4068_v18  ;;  %v4549_v57 = vld [vmem:[%s5515_s0 + $0xac] ss:$28 sps:$4 sm:$0xff]   ;;  %v4554_v58 = vld [vmem:[%s5515_s0 + $0xb4] ss:$28 sps:$4 sm:$0xff]   ;;  %v4122_v0 = vld [vmem:[%s5514_s1 + $0x178] sm:$0xff]  }
  0x15   :  { %3528 = vmatpush3.bf16.msra.mxu1 %v4069_v19  ;;  %3489 = vmatprep.subr.bf16.mxu0 %v4070_v20  ;;  %v4117_v59 = vld [vmem:[%s5514_s1 + $0x188] sm:$0xff]   ;;  %v4120_v62 = vld [vmem:[%s5514_s1 + $0x170] sm:$0xff]   ;;  %v4123_v1 = vld [vmem:[%s5514_s1 + $0x138] sm:$0xff]  }
  0x16   :  { %3529 = vmatprep.subr.bf16.mxu1 %v4071_v21  ;;  %v4564_v60 = vld [vmem:[%s5515_s0 + $0xa8] ss:$28 sps:$4 sm:$0xff]   ;;  %v4569_v61 = vld [vmem:[%s5515_s0 + $0xb0] ss:$28 sps:$4 sm:$0xff]   ;;  %v4593_v3 = vld [vmem:[%s5515_s0 + $0x18] ss:$28 sps:$4 sm:$0xff]  }
  0x17   :  { %v4121_v63 = vld [vmem:[%s5514_s1 + $0x130] sm:$0xff]   ;;  %v4133_v10 = vld [vmem:[%s5514_s1 + $0x258] sm:$0xff]   ;;  %v4638_v14 = vld [vmem:[%s5515_s0 + $0x4c] ss:$28 sps:$4 sm:$0xff]  }
  0x18   :  { %3490 = vmatpush3.bf16.msra.mxu0 %v4072_v22  ;;  %v4588_v2 = vld [vmem:[%s5515_s0 + $0x14] ss:$28 sps:$4 sm:$0xff]   ;;  %v4134_v11 = vld [vmem:[%s5514_s1 + $0x1d8] sm:$0xff]   ;;  %v4139_v15 = vld [vmem:[%s5514_s1 + $0x260] sm:$0xff]  }
  0x19   :  { %3530 = vmatpush3.bf16.msra.mxu1 %v4073_v23  ;;  %3491 = vmatprep.subr.bf16.mxu0 %v4074_v24  ;;  %v4598_v4 = vld [vmem:[%s5515_s0 + $0x10] ss:$28 sps:$4 sm:$0xff]   ;;  %v4135_v12 = vld [vmem:[%s5514_s1 + $0x218] sm:$0xff]   ;;  %v4647_v16 = vld [vmem:[%s5515_s0 + $0x48] ss:$28 sps:$4 sm:$0xff]  }
  0x1a   :  { %3531 = vmatprep.subr.bf16.mxu1 %v4075_v25  ;;  %v4128_v5 = vld [vmem:[%s5514_s1 + $0x250] sm:$0xff]   ;;  %v4136_v13 = vld [vmem:[%s5514_s1 + $0x198] sm:$0xff]   ;;  %v4141_v17 = vld [vmem:[%s5514_s1 + $0x1e0] sm:$0xff]  }
  0x1b   :  { %v4609_v6 = vld [vmem:[%s5515_s0 + $0x50] ss:$28 sps:$4 sm:$0xff]   ;;  %v4142_v18 = vld [vmem:[%s5514_s1 + $0x220] sm:$0xff]  }
  0x1c   :  { %3492 = vmatpush3.bf16.msra.mxu0 %v4076_v26  ;;  %v4130_v7 = vld [vmem:[%s5514_s1 + $0x1d0] sm:$0xff]   ;;  %v4143_v19 = vld [vmem:[%s5514_s1 + $0x1a0] sm:$0xff]   ;;  %v4144_v20 = vld [vmem:[%s5514_s1 + $0x268] sm:$0xff]  }
  0x1d   :  { %3532 = vmatpush3.bf16.msra.mxu1 %v4077_v27  ;;  %3493 = vmatprep.subr.bf16.mxu0 %v4078_v28  ;;  %v4131_v8 = vld [vmem:[%s5514_s1 + $0x210] sm:$0xff]   ;;  %v4145_v21 = vld [vmem:[%s5514_s1 + $0x1e8] sm:$0xff]   ;;  %v4674_v24 = vld [vmem:[%s5515_s0 + $0x84] ss:$28 sps:$4 sm:$0xff]  }
  0x1e   :  { %3533 = vmatprep.subr.bf16.mxu1 %v4079_v29  ;;  %v4132_v9 = vld [vmem:[%s5514_s1 + $0x190] sm:$0xff]   ;;  %v4146_v22 = vld [vmem:[%s5514_s1 + $0x228] sm:$0xff]   ;;  %v4682_v26 = vld [vmem:[%s5515_s0 + $0x80] ss:$28 sps:$4 sm:$0xff]  }
  0x1f   :  { %v4147_v23 = vld [vmem:[%s5514_s1 + $0x1a8] sm:$0xff]   ;;  %v4150_v25 = vld [vmem:[%s5514_s1 + $0x270] sm:$0xff]  }
  0x20   :  { %3494 = vmatpush3.bf16.msra.mxu0 %v4080_v30  ;;  %v4152_v27 = vld [vmem:[%s5514_s1 + $0x1f0] sm:$0xff]   ;;  %v4698_v30 = vld [vmem:[%s5515_s0 + $0x88] ss:$28 sps:$4 sm:$0xff]  }
  0x21   :  { %3534 = vmatpush3.bf16.msra.mxu1 %v4081_v31  ;;  %3559 = vmatprep.subr.bf16.mxu0 %v4088_v36  ;;  %v4153_v28 = vld [vmem:[%s5514_s1 + $0x230] sm:$0xff]   ;;  %v4156_v31 = vld [vmem:[%s5514_s1 + $0x278] sm:$0xff]  }
  0x22   :  { %3983 = vmatprep.subr.bf16.mxu1 %v4096_v42  ;;  %v4154_v29 = vld [vmem:[%s5514_s1 + $0x1b0] sm:$0xff]   ;;  %v4708_v36 = vld [vmem:[%s5515_s0 + $0xc0] ss:$28 sps:$4 sm:$0xff]  }
  0x23   :  { %633 = vmatmul.mubr.bf16.vlgmr.msra.gmra.mrb[0].mxu0 %v4449_v34 }
  0x24   :  { %698 = vmatmul.mubr.bf16.vlgmr.msra.gmra.mrb[0].mxu1 %v4454_v35  ;;  %3560 = vmatpush3.bf16.msra.mxu0 %v4089_v37  ;;  %v4158_v37 = vld [vmem:[%s5514_s1 + $0x1f8] sm:$0xff]  }
  0x25   :  { %3561 = vmatprep.subr.bf16.mxu0 %v4090_v38  ;;  %640 = vmatprep.mubr.bf16.mxu0 %v4474_v40  ;;  %v4159_v38 = vld [vmem:[%s5514_s1 + $0x238] sm:$0xff]  }
  0x26   :  { %705 = vmatprep.mubr.bf16.mxu1 %v4479_v41  ;;  %3984 = vmatpush3.bf16.msra.mxu1 %v4096_v42  ;;  %v4725_v42 = vld [vmem:[%s5515_s0 + $0xbc] ss:$28 sps:$4 sm:$0xff]  }
  0x27   :  { %3985 = vmatprep.subr.bf16.mxu1 %v4117_v59 }
  0x28   :  { %3562 = vmatpush3.bf16.msra.mxu0 %v4091_v39  ;;  %v4160_v39 = vld [vmem:[%s5514_s1 + $0x1b8] sm:$0xff]  }
  0x29   :  { %3563 = vmatprep.subr.bf16.mxu0 %v4099_v45  ;;  %v4163_v45 = vld [vmem:[%s5514_s1 + $0x280] sm:$0xff]  }
  0x2a   :  { %3986 = vmatpush3.bf16.msra.mxu1 %v4117_v59  ;;  %v4172_v59 = vld [vmem:[%s5514_s1 + $0x2d0] sm:$0xff]  }
  0x2b   :  { %641 = vmatmul.mubr.bf16.gmra.mrb[4].mxu0 %v4488_v43  ;;  %3645 = vmatprep.subr.bf16.mxu1 %v4128_v5  ;;  %v4185_v5 = vld [vmem:[%s5514_s1 + $0x318] sm:$0xff]  }
  0x2c   :  { %706 = vmatmul.mubr.bf16.gmra.mrb[4].mxu1 %v4494_v44  ;;  %3564 = vmatpush3.bf16.msra.mxu0 %v4100_v46  ;;  %v4733_v46 = vld [vmem:[%s5515_s0 + $0xb8] ss:$28 sps:$4 sm:$0xff]  }
  0x2d   :  { %3565 = vmatprep.subr.bf16.mxu0 %v4101_v47  ;;  %648 = vmatprep.mubr.bf16.mxu0 %v4513_v49  ;;  %v4165_v47 = vld [vmem:[%s5514_s1 + $0x200] sm:$0xff]  }
  0x2e   :  { %713 = vmatprep.mubr.bf16.mxu1 %v4518_v50 }
  0x30   :  { %3566 = vmatpush3.bf16.msra.mxu0 %v4102_v48  ;;  %v4166_v48 = vld [vmem:[%s5514_s1 + $0x240] sm:$0xff]  }
  0x31   :  { %3567 = vmatprep.subr.bf16.mxu0 %v4109_v53  ;;  %v4167_v53 = vld [vmem:[%s5514_s1 + $0x1c0] sm:$0xff]  }
  0x33   :  { %649 = vmatmul.mubr.bf16.gmra.mrb[8].mxu0 %v4523_v51 }
  0x34   :  { %714 = vmatmul.mubr.bf16.gmra.mrb[8].mxu1 %v4528_v52  ;;  %3568 = vmatpush3.bf16.msra.mxu0 %v4110_v54  ;;  %v4168_v54 = vld [vmem:[%s5514_s1 + $0x288] sm:$0xff]  }
  0x35   :  { %3569 = vmatprep.subr.bf16.mxu0 %v4111_v55  ;;  %656 = vmatprep.mubr.bf16.mxu0 %v4549_v57  ;;  %v4169_v55 = vld [vmem:[%s5514_s1 + $0x208] sm:$0xff]  }
  0x36   :  { %721 = vmatprep.mubr.bf16.mxu1 %v4554_v58 }
  0x38   :  { %3570 = vmatpush3.bf16.msra.mxu0 %v4112_v56  ;;  %v4170_v56 = vld [vmem:[%s5514_s1 + $0x248] sm:$0xff]  }
  0x39   :  { %3571 = vmatprep.subr.bf16.mxu0 %v4120_v62  ;;  %v4173_v62 = vld [vmem:[%s5514_s1 + $0x290] sm:$0xff]  }
  0x3b   :  { %657 = vmatmul.mubr.bf16.gmra.mrb[12].mxu0 %v4564_v60 }
  0x3c   :  { %722 = vmatmul.mubr.bf16.gmra.mrb[12].mxu1 %v4569_v61  ;;  %3572 = vmatpush3.bf16.msra.mxu0 %v4121_v63  ;;  %v4174_v63 = vld [vmem:[%s5514_s1 + $0x2d8] sm:$0xff]  }
  0x3d   :  { %3573 = vmatprep.subr.bf16.mxu0 %v4122_v0  ;;  %762 = vmatprep.mubr.bf16.mxu0 %v4588_v2  ;;  %v4176_v0 = vld [vmem:[%s5514_s1 + $0x310] sm:$0xff]  }
  0x3e   :  { %3987 = vmatprep.mubr.msk.bf16.mxu1 %vm587_vm0, %v4593_v3 }
  0x40   :  { %3574 = vmatpush3.bf16.msra.mxu0 %v4123_v1  ;;  %v4175_v1 = vld [vmem:[%s5514_s1 + $0x298] sm:$0xff]  }
  0x41   :  { %3605 = vmatprep.subr.bf16.mxu0 %v4130_v7  ;;  %v4184_v7 = vld [vmem:[%s5514_s1 + $0x2b8] sm:$0xff]  }
  0x43   :  { %763 = vmatmul.mubr.bf16.vlgmr.msra.gmra.mrb[16].mxu0 %v4598_v4 }
  0x44   :  { %3988 = vmatmul.mubr.msk.bf16.vlgmr.msra.gmra.mrb[16].mxu1 %vm587_vm0, %v4609_v6  ;;  %3606 = vmatpush3.bf16.msra.mxu0 %v4132_v9  ;;  %v4195_v9 = vld [vmem:[%s5514_s1 + $0x3a8] sm:$0xff]  }
  0x45   :  { %3646 = vmatpush3.bf16.msra.mxu1 %v4131_v8  ;;  %3607 = vmatprep.subr.bf16.mxu0 %v4134_v11  ;;  %v4186_v8 = vld [vmem:[%s5514_s1 + $0x300] sm:$0xff]   ;;  %v4198_v11 = vld [vmem:[%s5514_s1 + $0x3f0] sm:$0xff]  }
  0x46   :  { %3647 = vmatprep.subr.bf16.mxu1 %v4133_v10  ;;  %770 = vmatprep.mubr.bf16.mxu0 %v4638_v14  ;;  %v4197_v10 = vld [vmem:[%s5514_s1 + $0x328] sm:$0xff]  }
  0x47   :  { %3991 = vmatprep.mubr.msk.bf16.mxu1 %vm587_vm0, %v4698_v30 }
  0x48   :  { %3608 = vmatpush3.bf16.msra.mxu0 %v4136_v13  ;;  %v4202_v13 = vld [vmem:[%s5514_s1 + $0x3f8] sm:$0xff]  }
  0x49   :  { %3648 = vmatpush3.bf16.msra.mxu1 %v4135_v12  ;;  %3609 = vmatprep.subr.bf16.mxu0 %v4141_v17  ;;  %v4201_v12 = vld [vmem:[%s5514_s1 + $0x330] sm:$0xff]   ;;  %v4205_v17 = vld [vmem:[%s5514_s1 + $0x338] sm:$0xff]  }
  0x4a   :  { %3649 = vmatprep.subr.bf16.mxu1 %v4139_v15  ;;  %v4203_v15 = vld [vmem:[%s5514_s1 + $0x3b8] sm:$0xff]  }
  0x4b   :  { %771 = vmatmul.mubr.bf16.gmra.mrb[20].mxu0 %v4647_v16 }
  0x4c   :  { %3610 = vmatpush3.bf16.msra.mxu0 %v4143_v19  ;;  %778 = vmatprep.mubr.bf16.mxu0 %v4674_v24  ;;  %v4208_v19 = vld [vmem:[%s5514_s1 + $0x380] sm:$0xff]  }
  0x4d   :  { %3650 = vmatpush3.bf16.msra.mxu1 %v4142_v18  ;;  %3611 = vmatprep.subr.bf16.mxu0 %v4145_v21  ;;  %v4206_v18 = vld [vmem:[%s5514_s1 + $0x400] sm:$0xff]   ;;  %v4210_v21 = vld [vmem:[%s5514_s1 + $0x408] sm:$0xff]  }
  0x4e   :  { %3651 = vmatprep.subr.bf16.mxu1 %v4144_v20  ;;  %3992 = vmatmul.mubr.msk.bf16.gmra.mrb[20].mxu1 %vm587_vm0, %v4708_v36  ;;  %v4209_v20 = vld [vmem:[%s5514_s1 + $0x340] sm:$0xff]  }
  0x4f   :  { %1358 = vmatprep.mubr.bf16.mxu1 %v4443_v33 }
  0x50   :  { %3612 = vmatpush3.bf16.msra.mxu0 %v4147_v23  ;;  %v4213_v23 = vld [vmem:[%s5514_s1 + $0x348] sm:$0xff]  }
  0x51   :  { %3652 = vmatpush3.bf16.msra.mxu1 %v4146_v22  ;;  %3613 = vmatprep.subr.bf16.mxu0 %v4152_v27  ;;  %v4212_v22 = vld [vmem:[%s5514_s1 + $0x388] sm:$0xff]   ;;  %v4217_v27 = vld [vmem:[%s5514_s1 + $0x350] sm:$0xff]  }
  0x52   :  { %3653 = vmatprep.subr.bf16.mxu1 %v4150_v25  ;;  %v4216_v25 = vld [vmem:[%s5514_s1 + $0x390] sm:$0xff]  }
  0x53   :  { %779 = vmatmul.mubr.bf16.gmra.mrb[24].mxu0 %v4682_v26 }
  0x54   :  { %3614 = vmatpush3.bf16.msra.mxu0 %v4154_v29  ;;  %786 = vmatprep.mubr.bf16.mxu0 %v4725_v42  ;;  %v4220_v29 = vld [vmem:[%s5514_s1 + $0x398] sm:$0xff]  }
  0x55   :  { %3654 = vmatpush3.bf16.msra.mxu1 %v4153_v28  ;;  %3615 = vmatprep.subr.bf16.mxu0 %v4158_v37  ;;  %v4218_v28 = vld [vmem:[%s5514_s1 + $0x418] sm:$0xff]  }
  0x56   :  { %3655 = vmatprep.subr.bf16.mxu1 %v4156_v31  ;;  %v4219_v31 = vld [vmem:[%s5514_s1 + $0x3d8] sm:$0xff]  }
  0x57   :  { %v4221_v37 = vld [vmem:[%s5514_s1 + $0x358] sm:$0xff]  }
  0x58   :  { %3616 = vmatpush3.bf16.msra.mxu0 %v4160_v39  ;;  %v4946_v39 = vld [vmem:[%s5515_s0 + $0x4] ss:$28 sps:$4 sm:$0xff]  }
  0x59   :  { %3656 = vmatpush3.bf16.msra.mxu1 %v4159_v38  ;;  %3617 = vmatprep.subr.bf16.mxu0 %v4165_v47  ;;  %v4226_v38 = vld [vmem:[%s5514_s1 + $0x4a0] sm:$0xff]  }
  0x5a   :  { %3657 = vmatprep.subr.bf16.mxu1 %v4163_v45  ;;  %v4223_v45 = vld [vmem:[%s5514_s1 + $0x420] sm:$0xff]  }
  0x5b   :  { %787 = vmatmul.mubr.bf16.gmra.mrb[28].mxu0 %v4733_v46  ;;  %v4961_v47 = vld [vmem:[%s5515_s0 + $0x8] ss:$28 sps:$4 sm:$0xff]  }
  0x5c   :  { %1293 = vmatprep.mubr.bf16.mxu0 %v4438_v32  ;;  %3618 = vmatpush3.bf16.msra.mxu0 %v4167_v53  ;;  %v4171_v32 = vld [vmem:[%s5514_s1 + $0x1c8] sm:$0xff]   ;;  %v4970_v53 = vld [vmem:[%s5515_s0] ss:$28 sps:$4 sm:$0xff]  }
  0x5d   :  { %3658 = vmatpush3.bf16.msra.mxu1 %v4166_v48  ;;  %3619 = vmatprep.subr.bf16.mxu0 %v4169_v55  ;;  %v4235_v48 = vld [vmem:[%s5514_s1 + $0x4a8] sm:$0xff]  }
  0x5e   :  { %3659 = vmatprep.subr.bf16.mxu1 %v4168_v54  ;;  %v4976_v54 = vld [vmem:[%s5515_s0 + $0x44] ss:$28 sps:$4 sm:$0xff]   ;;  %v4225_v55 = vld [vmem:[%s5514_s1 + $0x428] sm:$0xff]  }
  0x60   :  { %3620 = vmatpush3.bf16.msra.mxu0 %v4171_v32  ;;  %v4988_v32 = vld [vmem:[%s5515_s0 + $0x3c] ss:$28 sps:$4 sm:$0xff]  }
  0x61   :  { %3660 = vmatpush3.bf16.msra.mxu1 %v4170_v56  ;;  %3685 = vmatprep.subr.bf16.mxu0 %v4172_v59  ;;  %v4227_v56 = vld [vmem:[%s5514_s1 + $0x470] sm:$0xff]  }
  0x62   :  { %3995 = vmatprep.subr.bf16.mxu1 %v4176_v0  ;;  %v4240_v59 = vld [vmem:[%s5514_s1 + $0x570] sm:$0xff]  }
  0x63   :  { %1294 = vmatmul.mubr.bf16.vlgmr.msra.gmra.mrb[32].mxu0 %v4449_v34  ;;  %v4178_v34 = vld [vmem:[%s5514_s1 + $0x2a0] sm:$0xff]  }
  0x64   :  { %1359 = vmatmul.mubr.bf16.vlgmr.msra.gmra.mrb[24].mxu1 %v4454_v35  ;;  %3686 = vmatpush3.bf16.msra.mxu0 %v4173_v62  ;;  %v4177_v35 = vld [vmem:[%s5514_s1 + $0x2e0] sm:$0xff]   ;;  %v4228_v62 = vld [vmem:[%s5514_s1 + $0x430] sm:$0xff]  }
  0x65   :  { %1366 = vmatprep.mubr.bf16.mxu1 %v4479_v41  ;;  %1301 = vmatprep.mubr.bf16.mxu0 %v4474_v40  ;;  %v4179_v41 = vld [vmem:[%s5514_s1 + $0x2e8] sm:$0xff]  }
  0x66   :  { %3687 = vmatprep.subr.bf16.mxu0 %v4174_v63  ;;  %3996 = vmatpush3.bf16.msra.mxu1 %v4176_v0  ;;  %v4180_v40 = vld [vmem:[%s5514_s1 + $0x2a8] sm:$0xff]   ;;  %v4229_v63 = vld [vmem:[%s5514_s1 + $0x478] sm:$0xff]  }
  0x67   :  { %3997 = vmatprep.subr.bf16.mxu1 %v4185_v5  ;;  %v5003_v0 = vld [vmem:[%s5515_s0 + $0x40] ss:$28 sps:$4 sm:$0xff]  }
  0x68   :  { %3688 = vmatpush3.bf16.msra.mxu0 %v4175_v1  ;;  %v5009_v1 = vld [vmem:[%s5515_s0 + $0x38] ss:$28 sps:$4 sm:$0xff]  }
  0x69   :  { %3689 = vmatprep.subr.bf16.mxu0 %v4177_v35  ;;  %v5015_v35 = vld [vmem:[%s5515_s0 + $0x7c] ss:$28 sps:$4 sm:$0xff]  }
  0x6a   :  { %3998 = vmatpush3.bf16.msra.mxu1 %v4185_v5  ;;  %v4232_v5 = vld [vmem:[%s5514_s1 + $0x440] sm:$0xff]  }
  0x6b   :  { %1302 = vmatmul.mubr.bf16.gmra.mrb[36].mxu0 %v4488_v43  ;;  %v4182_v43 = vld [vmem:[%s5514_s1 + $0x2b0] sm:$0xff]  }
  0x6c   :  { %1367 = vmatmul.mubr.bf16.gmra.mrb[28].mxu1 %v4494_v44  ;;  %3690 = vmatpush3.bf16.msra.mxu0 %v4178_v34  ;;  %v4181_v44 = vld [vmem:[%s5514_s1 + $0x2f0] sm:$0xff]   ;;  %v4230_v34 = vld [vmem:[%s5514_s1 + $0x438] sm:$0xff]  }
  0x6d   :  { %1374 = vmatprep.mubr.bf16.mxu1 %v4518_v50  ;;  %1309 = vmatprep.mubr.bf16.mxu0 %v4513_v49  ;;  %v4183_v49 = vld [vmem:[%s5514_s1 + $0x2f8] sm:$0xff]   ;;  %v4190_v50 = vld [vmem:[%s5514_s1 + $0x3e0] sm:$0xff]  }
  0x6e   :  { %3691 = vmatprep.subr.bf16.mxu0 %v4179_v41  ;;  %3771 = vmatprep.subr.bf16.mxu1 %v4190_v50  ;;  %v5024_v41 = vld [vmem:[%s5515_s0 + $0x74] ss:$28 sps:$4 sm:$0xff]  }
  0x6f   :  { %v5051_v50 = vld [vmem:[%s5515_s0 + $0xb4] ss:$28 sps:$4 sm:$0xff]  }
  0x70   :  { %3692 = vmatpush3.bf16.msra.mxu0 %v4180_v40  ;;  %v4231_v40 = vld [vmem:[%s5514_s1 + $0x480] sm:$0xff]  }
  0x71   :  { %3693 = vmatprep.subr.bf16.mxu0 %v4181_v44  ;;  %v4233_v44 = vld [vmem:[%s5514_s1 + $0x488] sm:$0xff]  }
  0x73   :  { %1310 = vmatmul.mubr.bf16.gmra.mrb[40].mxu0 %v4523_v51  ;;  %v4187_v51 = vld [vmem:[%s5514_s1 + $0x2c0] sm:$0xff]  }
  0x74   :  { %1375 = vmatmul.mubr.bf16.gmra.mrb[32].mxu1 %v4528_v52  ;;  %3694 = vmatpush3.bf16.msra.mxu0 %v4182_v43  ;;  %v4188_v52 = vld [vmem:[%s5514_s1 + $0x308] sm:$0xff]   ;;  %v5039_v43 = vld [vmem:[%s5515_s0 + $0x78] ss:$28 sps:$4 sm:$0xff]  }
  0x75   :  { %1382 = vmatprep.mubr.bf16.mxu1 %v4554_v58  ;;  %1317 = vmatprep.mubr.bf16.mxu0 %v4549_v57  ;;  %v4189_v57 = vld [vmem:[%s5514_s1 + $0x2c8] sm:$0xff]   ;;  %v4192_v58 = vld [vmem:[%s5514_s1 + $0x360] sm:$0xff]  }
  0x76   :  { %3695 = vmatprep.subr.bf16.mxu0 %v4183_v49  ;;  %v5045_v49 = vld [vmem:[%s5515_s0 + $0x70] ss:$28 sps:$4 sm:$0xff]  }
  0x78   :  { %3696 = vmatpush3.bf16.msra.mxu0 %v4184_v7  ;;  %v4234_v7 = vld [vmem:[%s5514_s1 + $0x448] sm:$0xff]  }
  0x79   :  { %3697 = vmatprep.subr.bf16.mxu0 %v4186_v8  ;;  %v5060_v8 = vld [vmem:[%s5515_s0 + $0xac] ss:$28 sps:$4 sm:$0xff]  }
  0x7b   :  { %1318 = vmatmul.mubr.bf16.gmra.mrb[44].mxu0 %v4564_v60  ;;  %v4193_v60 = vld [vmem:[%s5514_s1 + $0x320] sm:$0xff]  }
  0x7c   :  { %1383 = vmatmul.mubr.bf16.gmra.mrb[36].mxu1 %v4569_v61  ;;  %3698 = vmatpush3.bf16.msra.mxu0 %v4187_v51  ;;  %v4191_v61 = vld [vmem:[%s5514_s1 + $0x3a0] sm:$0xff]   ;;  %v4236_v51 = vld [vmem:[%s5514_s1 + $0x490] sm:$0xff]  }
  0x7d   :  { %3999 = vmatprep.mubr.msk.bf16.mxu1 %vm587_vm0, %v4593_v3  ;;  %1423 = vmatprep.mubr.bf16.mxu0 %v4588_v2  ;;  %v4194_v3 = vld [vmem:[%s5514_s1 + $0x3e8] sm:$0xff]  }
  0x7e   :  { %3699 = vmatprep.subr.bf16.mxu0 %v4188_v52  ;;  %v4196_v2 = vld [vmem:[%s5514_s1 + $0x368] sm:$0xff]   ;;  %v4237_v52 = vld [vmem:[%s5514_s1 + $0x450] sm:$0xff]  }
  0x80   :  { %3700 = vmatpush3.bf16.msra.mxu0 %v4189_v57  ;;  %v4238_v57 = vld [vmem:[%s5514_s1 + $0x498] sm:$0xff]  }
  0x81   :  { %3731 = vmatprep.subr.bf16.mxu0 %v4192_v58  ;;  %v5075_v58 = vld [vmem:[%s5515_s0 + $0xb0] ss:$28 sps:$4 sm:$0xff]  }
  0x83   :  { %1424 = vmatmul.mubr.bf16.vlgmr.msra.gmra.mrb[48].mxu0 %v4598_v4  ;;  %v4199_v4 = vld [vmem:[%s5514_s1 + $0x3b0] sm:$0xff]  }
  0x84   :  { %4000 = vmatmul.mubr.msk.bf16.vlgmr.msra.gmra.mrb[40].mxu1 %vm587_vm0, %v4609_v6  ;;  %3732 = vmatpush3.bf16.msra.mxu0 %v4193_v60  ;;  %v4200_v6 = vld [vmem:[%s5514_s1 + $0x370] sm:$0xff]  }
  0x85   :  { %3772 = vmatpush3.bf16.msra.mxu1 %v4191_v61  ;;  %3733 = vmatprep.subr.bf16.mxu0 %v4196_v2  ;;  %v5081_v61 = vld [vmem:[%s5515_s0 + $0xa8] ss:$28 sps:$4 sm:$0xff]   ;;  %v5087_v60 = vld [vmem:[%s5515_s0 + $0x18] ss:$28 sps:$4 sm:$0xff]  }
  0x86   :  { %3773 = vmatprep.subr.bf16.mxu1 %v4194_v3  ;;  %1431 = vmatprep.mubr.bf16.mxu0 %v4638_v14  ;;  %v4204_v14 = vld [vmem:[%s5514_s1 + $0x378] sm:$0xff]   ;;  %v5097_v2 = vld [vmem:[%s5515_s0 + $0x14] ss:$28 sps:$4 sm:$0xff]  }
  0x87   :  { %4003 = vmatprep.mubr.msk.bf16.mxu1 %vm587_vm0, %v4698_v30  ;;  %v4239_v3 = vld [vmem:[%s5514_s1 + $0x458] sm:$0xff]  }
  0x88   :  { %3734 = vmatpush3.bf16.msra.mxu0 %v4197_v10  ;;  %v4241_v10 = vld [vmem:[%s5514_s1 + $0x530] sm:$0xff]  }
  0x89   :  { %3774 = vmatpush3.bf16.msra.mxu1 %v4195_v9  ;;  %3735 = vmatprep.subr.bf16.mxu0 %v4200_v6  ;;  %v4242_v9 = vld [vmem:[%s5514_s1 + $0x4f0] sm:$0xff]   ;;  %v4244_v6 = vld [vmem:[%s5514_s1 + $0x578] sm:$0xff]  }
  0x8a   :  { %3775 = vmatprep.subr.bf16.mxu1 %v4198_v11  ;;  %v4243_v11 = vld [vmem:[%s5514_s1 + $0x4b0] sm:$0xff]  }
  0x8b   :  { %1432 = vmatmul.mubr.bf16.gmra.mrb[52].mxu0 %v4647_v16  ;;  %v4207_v16 = vld [vmem:[%s5514_s1 + $0x3c0] sm:$0xff]  }
  0x8c   :  { %4004 = vmatmul.mubr.msk.bf16.gmra.mrb[44].mxu1 %vm587_vm0, %v4708_v36  ;;  %3736 = vmatpush3.bf16.msra.mxu0 %v4201_v12  ;;  %v5118_v12 = vld [vmem:[%s5515_s0 + $0x50] ss:$28 sps:$4 sm:$0xff]  }
  0x8d   :  { %3776 = vmatpush3.bf16.msra.mxu1 %v4199_v4  ;;  %3737 = vmatprep.subr.bf16.mxu0 %v4204_v14  ;;  %v4246_v4 = vld [vmem:[%s5514_s1 + $0x4f8] sm:$0xff]   ;;  %v5128_v14 = vld [vmem:[%s5515_s0 + $0x10] ss:$28 sps:$4 sm:$0xff]  }
  0x8e   :  { %3777 = vmatprep.subr.bf16.mxu1 %v4202_v13  ;;  %1439 = vmatprep.mubr.bf16.mxu0 %v4674_v24  ;;  %v4214_v24 = vld [vmem:[%s5514_s1 + $0x410] sm:$0xff]   ;;  %v4245_v13 = vld [vmem:[%s5514_s1 + $0x538] sm:$0xff]  }
  0x8f   :  { %2027 = vmatprep.mubr.bf16.mxu1 %v4443_v33  ;;  %v4211_v33 = vld [vmem:[%s5514_s1 + $0x3c8] sm:$0xff]  }
  0x90   :  { %3738 = vmatpush3.bf16.msra.mxu0 %v4205_v17  ;;  %v4248_v17 = vld [vmem:[%s5514_s1 + $0x580] sm:$0xff]  }
  0x91   :  { %3778 = vmatpush3.bf16.msra.mxu1 %v4203_v15  ;;  %3739 = vmatprep.subr.bf16.mxu0 %v4208_v19  ;;  %v4247_v15 = vld [vmem:[%s5514_s1 + $0x4b8] sm:$0xff]   ;;  %v4250_v19 = vld [vmem:[%s5514_s1 + $0x500] sm:$0xff]  }
  0x92   :  { %3779 = vmatprep.subr.bf16.mxu1 %v4206_v18  ;;  %v5140_v18 = vld [vmem:[%s5515_s0 + $0x4c] ss:$28 sps:$4 sm:$0xff]  }
  0x93   :  { %1440 = vmatmul.mubr.bf16.gmra.mrb[56].mxu0 %v4682_v26  ;;  %v4215_v26 = vld [vmem:[%s5514_s1 + $0x3d0] sm:$0xff]  }
  0x94   :  { %3740 = vmatpush3.bf16.msra.mxu0 %v4209_v20  ;;  %1447 = vmatprep.mubr.bf16.mxu0 %v4725_v42  ;;  %v4222_v42 = vld [vmem:[%s5514_s1 + $0x460] sm:$0xff]  }
  0x95   :  { %3780 = vmatpush3.bf16.msra.mxu1 %v4207_v16  ;;  %3741 = vmatprep.subr.bf16.mxu0 %v4212_v22  ;;  %v4249_v16 = vld [vmem:[%s5514_s1 + $0x540] sm:$0xff]   ;;  %v4254_v22 = vld [vmem:[%s5514_s1 + $0x508] sm:$0xff]  }
  0x96   :  { %3781 = vmatprep.subr.bf16.mxu1 %v4210_v21  ;;  %v4251_v20 = vld [vmem:[%s5514_s1 + $0x4c0] sm:$0xff]   ;;  %v4252_v21 = vld [vmem:[%s5514_s1 + $0x588] sm:$0xff]  }
  0x98   :  { %3742 = vmatpush3.bf16.msra.mxu0 %v4213_v23  ;;  %v4255_v23 = vld [vmem:[%s5514_s1 + $0x4c8] sm:$0xff]  }
  0x99   :  { %3782 = vmatpush3.bf16.msra.mxu1 %v4211_v33  ;;  %3743 = vmatprep.subr.bf16.mxu0 %v4216_v25  ;;  %v5168_v33 = vld [vmem:[%s5515_s0 + $0x48] ss:$28 sps:$4 sm:$0xff]   ;;  %v4258_v25 = vld [vmem:[%s5514_s1 + $0x510] sm:$0xff]  }
  0x9a   :  { %3783 = vmatprep.subr.bf16.mxu1 %v4214_v24  ;;  %v4256_v24 = vld [vmem:[%s5514_s1 + $0x590] sm:$0xff]  }
  0x9b   :  { %1448 = vmatmul.mubr.bf16.gmra.mrb[60].mxu0 %v4733_v46  ;;  %v4224_v46 = vld [vmem:[%s5514_s1 + $0x468] sm:$0xff]  }
  0x9c   :  { %3744 = vmatpush3.bf16.msra.mxu0 %v4217_v27  ;;  %1962 = vmatprep.mubr.bf16.mxu0 %v4946_v39  ;;  %v4312_v27 = vld [vmem:[%s5515_s0 + $0xc] ss:$28 sps:$4 sm:$0xff]  }
  0x9d   :  { %3784 = vmatpush3.bf16.msra.mxu1 %v4215_v26  ;;  %3745 = vmatprep.subr.bf16.mxu0 %v4220_v29  ;;  %v4257_v26 = vld [vmem:[%s5514_s1 + $0x550] sm:$0xff]   ;;  %v4260_v29 = vld [vmem:[%s5514_s1 + $0x598] sm:$0xff]  }
  0x9e   :  { %3785 = vmatprep.subr.bf16.mxu1 %v4218_v28  ;;  %v4259_v28 = vld [vmem:[%s5514_s1 + $0x4d0] sm:$0xff]  }
  0xa0   :  { %3746 = vmatpush3.bf16.msra.mxu0 %v4221_v37  ;;  %v4261_v37 = vld [vmem:[%s5514_s1 + $0x558] sm:$0xff]  }
  0xa1   :  { %3786 = vmatpush3.bf16.msra.mxu1 %v4219_v31  ;;  %3811 = vmatprep.subr.bf16.mxu0 %v4222_v42  ;;  %v4262_v31 = vld [vmem:[%s5514_s1 + $0x518] sm:$0xff]  }
  0xa2   :  { %4007 = vmatprep.subr.bf16.mxu1 %v4226_v38  ;;  %v4263_v42 = vld [vmem:[%s5514_s1 + $0x4d8] sm:$0xff]  }
  0xa3   :  { %1963 = vmatmul.mubr.bf16.vlgmr.msra.gmra.mrb[64].mxu0 %v4970_v53 }
  0xa4   :  { %2028 = vmatmul.mubr.bf16.vlgmr.msra.gmra.mrb[48].mxu1 %v4961_v47  ;;  %3812 = vmatpush3.bf16.msra.mxu0 %v4223_v45  ;;  %v4264_v45 = vld [vmem:[%s5514_s1 + $0x5a0] sm:$0xff]  }
  0xa5   :  { %2035 = vmatprep.mubr.bf16.mxu1 %v4976_v54  ;;  %4008 = vmatpush3.bf16.msra.mxu1 %v4226_v38  ;;  %v5207_v38 = vld [vmem:[%s5515_s0 + $0x80] ss:$28 sps:$4 sm:$0xff]  }
  0xa6   :  { %3813 = vmatprep.subr.bf16.mxu0 %v4224_v46  ;;  %1970 = vmatprep.mubr.bf16.mxu0 %v4988_v32  ;;  %v5219_v46 = vld [vmem:[%s5515_s0 + $0xbc] ss:$28 sps:$4 sm:$0xff]  }
  0xa7   :  { %4009 = vmatprep.subr.bf16.mxu1 %v4235_v48 }
  0xa8   :  { %3814 = vmatpush3.bf16.msra.mxu0 %v4225_v55  ;;  %v4265_v55 = vld [vmem:[%s5514_s1 + $0x560] sm:$0xff]  }
  0xa9   :  { %4010 = vmatpush3.bf16.msra.mxu1 %v4235_v48  ;;  %3815 = vmatprep.subr.bf16.mxu0 %v4227_v56  ;;  %v4266_v48 = vld [vmem:[%s5514_s1 + $0x520] sm:$0xff]  }
  0xaa   :  { %3897 = vmatprep.subr.bf16.mxu1 %v4240_v59  ;;  %v4267_v56 = vld [vmem:[%s5514_s1 + $0x4e0] sm:$0xff]   ;;  %v4268_v59 = vld [vmem:[%s5514_s1 + $0x5a8] sm:$0xff]  }
  0xab   :  { %1971 = vmatmul.mubr.bf16.gmra.mrb[68].mxu0 %v5009_v1 }
  0xac   :  { %2036 = vmatmul.mubr.bf16.gmra.mrb[52].mxu1 %v5003_v0  ;;  %3816 = vmatpush3.bf16.msra.mxu0 %v4228_v62  ;;  %v4270_v62 = vld [vmem:[%s5514_s1 + $0x528] sm:$0xff]  }
  0xad   :  { %2043 = vmatprep.mubr.bf16.mxu1 %v5015_v35  ;;  %1978 = vmatprep.mubr.bf16.mxu0 %v5024_v41 }
  0xae   :  { %3817 = vmatprep.subr.bf16.mxu0 %v4229_v63  ;;  %v5240_v63 = vld [vmem:[%s5515_s0 + $0xb8] ss:$28 sps:$4 sm:$0xff]  }
  0xb0   :  { %3818 = vmatpush3.bf16.msra.mxu0 %v4230_v34  ;;  %v4269_v34 = vld [vmem:[%s5514_s1 + $0x568] sm:$0xff]  }
  0xb1   :  { %3819 = vmatprep.subr.bf16.mxu0 %v4231_v40  ;;  %v4271_v40 = vld [vmem:[%s5514_s1 + $0x4e8] sm:$0xff]  }
  0xb3   :  { %1979 = vmatmul.mubr.bf16.gmra.mrb[72].mxu0 %v5045_v49 }
  0xb4   :  { %2044 = vmatmul.mubr.bf16.gmra.mrb[56].mxu1 %v5039_v43  ;;  %3820 = vmatpush3.bf16.msra.mxu0 %v4232_v5  ;;  %v4272_v5 = vld [vmem:[%s5514_s1 + $0x5f0] sm:$0xff]  }
  0xb5   :  { %2051 = vmatprep.mubr.bf16.mxu1 %v5051_v50  ;;  %1986 = vmatprep.mubr.bf16.mxu0 %v5060_v8 }
  0xb6   :  { %3821 = vmatprep.subr.bf16.mxu0 %v4233_v44  ;;  %v2869_v44 = vld [vmem:[%s5516_s2 + $0x10] sm:$0xff] }
  0xb8   :  { %3822 = vmatpush3.bf16.msra.mxu0 %v4234_v7  ;;  %v4318_v7 = vmov 0  }
  0xb9   :  { %3823 = vmatprep.subr.bf16.mxu0 %v4236_v51  ;;  %4049 = vset.pattern.permute.xlu1 %v4318_v7  ;;  %v2867_v51 = vld [vmem:[%s5516_s2] sm:$0xff] }
  0xba   :  { %4048 = vset.pattern.permute.xlu0 %v4318_v7  ;;  %2887 = vperm.xlu1 %4049, %v2869_v44  }
  0xbb   :  { %1987 = vmatmul.mubr.bf16.gmra.mrb[76].mxu0 %v5081_v61  ;;  %2877 = vperm.xlu0 %4048, %v2867_v51  }
  0xbc   :  { %2052 = vmatmul.mubr.bf16.gmra.mrb[60].mxu1 %v5075_v58  ;;  %3824 = vmatpush3.bf16.msra.mxu0 %v4237_v52  ;;  %v4273_v52 = vld [vmem:[%s5514_s1 + $0x5b0] sm:$0xff]  }
  0xbd   :  { %4011 = vmatprep.mubr.msk.bf16.mxu1 %vm587_vm0, %v5087_v60  ;;  %2092 = vmatprep.mubr.bf16.mxu0 %v5097_v2 }
  0xbe   :  { %3825 = vmatprep.subr.bf16.mxu0 %v4238_v57  ;;  %v4274_v57 = vld [vmem:[%s5514_s1 + $0x5f8] sm:$0xff]  }
  0xc0   :  { %3826 = vmatpush3.bf16.msra.mxu0 %v4239_v3  ;;  %v2870_v3 = vld [vmem:[%s5516_s2 + $0x18] sm:$0xff] }
  0xc1   :  { %3857 = vmatprep.subr.bf16.mxu0 %v4242_v9  ;;  %v4276_v9 = vld [vmem:[%s5514_s1 + $0x600] sm:$0xff]   ;;  %2892 = vperm.xlu1 %4049, %v2870_v3  }
  0xc3   :  { %2093 = vmatmul.mubr.bf16.vlgmr.msra.gmra.mrb[80].mxu0 %v5128_v14 }
  0xc4   :  { %4012 = vmatmul.mubr.msk.bf16.vlgmr.msra.gmra.mrb[64].mxu1 %vm587_vm0, %v5118_v12  ;;  %3858 = vmatpush3.bf16.msra.mxu0 %v4243_v11  ;;  %v2871_v11 = vld [vmem:[%s5516_s2 + $0x20] sm:$0xff] }
  0xc5   :  { %3898 = vmatpush3.bf16.msra.mxu1 %v4241_v10  ;;  %3859 = vmatprep.subr.bf16.mxu0 %v4246_v4  ;;  %v2872_v10 = vld [vmem:[%s5516_s2 + $0x28] sm:$0xff]  ;;  %v2873_v4 = vld [vmem:[%s5516_s2 + $0x30] sm:$0xff] }
  0xc6   :  { %3899 = vmatprep.subr.bf16.mxu1 %v4244_v6  ;;  %2100 = vmatprep.mubr.bf16.mxu0 %v5140_v18  ;;  %v4280_v6 = vld [vmem:[%s5514_s1 + $0x610] sm:$0xff]  }
  0xc7   :  { %4015 = vmatprep.mubr.msk.bf16.mxu1 %vm587_vm0, %v4698_v30  ;;  %v4253_v30 = vld [vmem:[%s5514_s1 + $0x548] sm:$0xff]   ;;  %2902 = vperm.xlu1 %4049, %v2872_v10  }
  0xc8   :  { %3860 = vmatpush3.bf16.msra.mxu0 %v4247_v15 }
  0xc9   :  { %3900 = vmatpush3.bf16.msra.mxu1 %v4245_v13  ;;  %3861 = vmatprep.subr.bf16.mxu0 %v4250_v19 }
  0xca   :  { %3901 = vmatprep.subr.bf16.mxu1 %v4248_v17 }
  0xcb   :  { %2101 = vmatmul.mubr.bf16.gmra.mrb[84].mxu0 %v5168_v33 }
  0xcc   :  { %4016 = vmatmul.mubr.msk.bf16.gmra.mrb[68].mxu1 %vm587_vm0, %v4708_v36  ;;  %3862 = vmatpush3.bf16.msra.mxu0 %v4251_v20  ;;  %v5180_v36 = vld [vmem:[%s5515_s0 + $0x84] ss:$28 sps:$4 sm:$0xff]  }
  0xcd   :  { %3902 = vmatpush3.bf16.msra.mxu1 %v4249_v16  ;;  %3863 = vmatprep.subr.bf16.mxu0 %v4254_v22  ;;  %v4283_v22 = vld [vmem:[%s5514_s1 + $0x5d8] sm:$0xff]  }
  0xce   :  { %3903 = vmatprep.subr.bf16.mxu1 %v4252_v21  ;;  %2108 = vmatprep.mubr.bf16.mxu0 %v5180_v36 }
  0xcf   :  { %2696 = vmatprep.mubr.bf16.mxu1 %v4312_v27  ;;  %v4285_v27 = vld [vmem:[%s5514_s1 + $0x5e0] sm:$0xff]  }
  0xd0   :  { %3864 = vmatpush3.bf16.msra.mxu0 %v4255_v23 }
  0xd1   :  { %3904 = vmatpush3.bf16.msra.mxu1 %v4253_v30  ;;  %3865 = vmatprep.subr.bf16.mxu0 %v4258_v25 }
  0xd2   :  { %3905 = vmatprep.subr.bf16.mxu1 %v4256_v24 }
  0xd3   :  { %2109 = vmatmul.mubr.bf16.gmra.mrb[88].mxu0 %v5207_v38 }
  0xd4   :  { %3866 = vmatpush3.bf16.msra.mxu0 %v4259_v28  ;;  %2116 = vmatprep.mubr.bf16.mxu0 %v5219_v46  ;;  %v4286_v28 = vld [vmem:[%s5514_s1 + $0x628] sm:$0xff]  }
  0xd5   :  { %3906 = vmatpush3.bf16.msra.mxu1 %v4257_v26  ;;  %3867 = vmatprep.subr.bf16.mxu0 %v4262_v31 }
  0xd6   :  { %3907 = vmatprep.subr.bf16.mxu1 %v4260_v29 }
  0xd8   :  { %3868 = vmatpush3.bf16.msra.mxu0 %v4263_v42 }
  0xd9   :  { %3908 = vmatpush3.bf16.msra.mxu1 %v4261_v37  ;;  %3869 = vmatprep.subr.bf16.mxu0 %v4266_v48 }
  0xda   :  { %3909 = vmatprep.subr.bf16.mxu1 %v4264_v45 }
  0xdb   :  { %2117 = vmatmul.mubr.bf16.gmra.mrb[92].mxu0 %v5240_v63 }
  0xdc   :  { %3870 = vmatpush3.bf16.msra.mxu0 %v4267_v56  ;;  %2631 = vmatprep.mubr.bf16.mxu0 %v4946_v39  ;;  %v4275_v39 = vld [vmem:[%s5514_s1 + $0x5b8] sm:$0xff]  }
  0xdd   :  { %3910 = vmatpush3.bf16.msra.mxu1 %v4265_v55  ;;  %3871 = vmatprep.subr.bf16.mxu0 %v4270_v62  ;;  %v4287_v55 = vld [vmem:[%s5514_s1 + $0x5e8] sm:$0xff]  }
  0xde   :  { %3911 = vmatprep.subr.bf16.mxu1 %v4268_v59 }
  0xe0   :  { %3872 = vmatpush3.bf16.msra.mxu0 %v4271_v40 }
  0xe1   :  { %3912 = vmatpush3.bf16.msra.mxu1 %v4269_v34  ;;  %3937 = vmatprep.subr.bf16.mxu0 %v4272_v5 }
  0xe2   :  { %4031 = vmatprep.subr.bf16.mxu1 %v4272_v5  ;;  %v4289_v5 = vld [vmem:[%s5514_s1 + $0x638] sm:$0xff]  }
  0xe3   :  { %2632 = vmatmul.mubr.bf16.vlgmr.msra.gmra.mrb[96].mxu0 %v4970_v53  ;;  %v4277_v53 = vld [vmem:[%s5514_s1 + $0x5c0] sm:$0xff]  }
  0xe4   :  { %2697 = vmatmul.mubr.bf16.vlgmr.msra.gmra.mrb[72].mxu1 %v4961_v47  ;;  %3938 = vmatpush3.bf16.msra.mxu0 %v4273_v52  ;;  %v2868_v47 = vld [vmem:[%s5516_s2 + $0x8] sm:$0xff] }
  0xe5   :  { %4039 = vmatpush3.bf16.msra.mxu1 %v4273_v52  ;;  %2704 = vmatprep.mubr.bf16.mxu1 %v4976_v54  ;;  %v4278_v54 = vld [vmem:[%s5514_s1 + $0x608] sm:$0xff]  }
  0xe6   :  { %4032 = vmatprep.subr.bf16.mxu1 %v4274_v57  ;;  %3939 = vmatprep.subr.bf16.mxu0 %v4274_v57 }
  0xe7   :  { %2639 = vmatprep.mubr.bf16.mxu0 %v4988_v32  ;;  %2882 = vperm.xlu0 %4048, %v2868_v47   ;;  %v4279_v32 = vld [vmem:[%s5514_s1 + $0x5c8] sm:$0xff]  }
  0xe8   :  { %3940 = vmatpush3.bf16.msra.mxu0 %v4275_v39 }
  0xe9   :  { %4040 = vmatpush3.bf16.msra.mxu1 %v4275_v39  ;;  %3941 = vmatprep.subr.bf16.mxu0 %v4276_v9 }
  0xea   :  { %4033 = vmatprep.subr.bf16.mxu1 %v4276_v9 }
  0xeb   :  { %2640 = vmatmul.mubr.bf16.gmra.mrb[100].mxu0 %v5009_v1  ;;  %2897 = vperm.xlu0 %4048, %v2871_v11   ;;  %v4281_v1 = vld [vmem:[%s5514_s1 + $0x5d0] sm:$0xff]  }
  0xec   :  { %2705 = vmatmul.mubr.bf16.gmra.mrb[76].mxu1 %v5003_v0  ;;  %3942 = vmatpush3.bf16.msra.mxu0 %v4277_v53  ;;  %v2874_v0 = vld [vmem:[%s5516_s2 + $0x38] sm:$0xff] }
  0xed   :  { %4041 = vmatpush3.bf16.msra.mxu1 %v4277_v53  ;;  %2712 = vmatprep.mubr.bf16.mxu1 %v5015_v35  ;;  %v4282_v35 = vld [vmem:[%s5514_s1 + $0x618] sm:$0xff]  }
  0xee   :  { %4034 = vmatprep.subr.bf16.mxu1 %v4278_v54  ;;  %3943 = vmatprep.subr.bf16.mxu0 %v4278_v54 }
  0xef   :  { %2647 = vmatprep.mubr.bf16.mxu0 %v5024_v41  ;;  %2912 = vperm.xlu1 %4049, %v2874_v0  }
  0xf0   :  { %3944 = vmatpush3.bf16.msra.mxu0 %v4279_v32  ;;  %2907 = vperm.xlu0 %4048, %v2873_v4  }
  0xf1   :  { %4042 = vmatpush3.bf16.msra.mxu1 %v4279_v32  ;;  %3945 = vmatprep.subr.bf16.mxu0 %v4280_v6 }
  0xf2   :  { %4035 = vmatprep.subr.bf16.mxu1 %v4280_v6 }
  0xf3   :  { %2648 = vmatmul.mubr.bf16.gmra.mrb[104].mxu0 %v5045_v49 }
  0xf4   :  { %2713 = vmatmul.mubr.bf16.gmra.mrb[80].mxu1 %v5039_v43  ;;  %3946 = vmatpush3.bf16.msra.mxu0 %v4281_v1  ;;  %v4284_v43 = vld [vmem:[%s5514_s1 + $0x620] sm:$0xff]  }
  0xf5   :  { %4043 = vmatpush3.bf16.msra.mxu1 %v4281_v1  ;;  %2720 = vmatprep.mubr.bf16.mxu1 %v5051_v50 }
  0xf6   :  { %v3495_v13 = vpop.f32.mrb[0].mxu0  ;;  %4036 = vmatprep.subr.bf16.mxu1 %v4282_v35  ;;  %3947 = vmatprep.subr.bf16.mxu0 %v4282_v35 }
  0xf7   :  { %v3535_v15 = vpop.f32.mrb[0].mxu1  ;;  %v3496_v41 = vpop.f32.mrb[1].mxu0  ;;  %2655 = vmatprep.mubr.bf16.mxu0 %v5060_v8 }
  0xf8   :  { %v3536_v17 = vpop.f32.mrb[1].mxu1  ;;  %v3497_v19 = vadd.f32 %v3496_v41, %v3495_v13  ;;  %v3498_v20 = vpop.f32.mrb[2].mxu0  ;;  %3948 = vmatpush3.bf16.msra.mxu0 %v4283_v22 }
  0xf9   :  { %v3537_v16 = vadd.f32 %v3536_v17, %v3535_v15  ;;  %v3538_v21 = vpop.f32.mrb[2].mxu1  ;;  %v3499_v30 = vpop.f32.mrb[3].mxu0  ;;  %4044 = vmatpush3.bf16.msra.mxu1 %v4283_v22  ;;  %3949 = vmatprep.subr.bf16.mxu0 %v4284_v43 }
  0xfa   :  { %v3539_v23 = vpop.f32.mrb[3].mxu1  ;;  %v3500_v25 = vadd.f32 %v3499_v30, %v3498_v20  ;;  %4037 = vmatprep.subr.bf16.mxu1 %v4284_v43 }
  0xfb   :  { %v5320_v24 = vadd.f32 %v3537_v16, %v3497_v19  ;;  %v3540_v26 = vadd.f32 %v3539_v23, %v3538_v21  ;;  %2656 = vmatmul.mubr.bf16.gmra.mrb[108].mxu0 %v5081_v61 }
  0xfc   :  { %2721 = vmatmul.mubr.bf16.gmra.mrb[84].mxu1 %v5075_v58  ;;  %3950 = vmatpush3.bf16.msra.mxu0 %v4285_v27  ;;  %v4288_v58 = vld [vmem:[%s5514_s1 + $0x630] sm:$0xff]  }
  0xfd   :  { %v5326_v49 = vadd.f32 %v3540_v26, %v3500_v25  ;;  %4045 = vmatpush3.bf16.msra.mxu1 %v4285_v27  ;;  %3951 = vmatprep.subr.bf16.mxu0 %v4286_v28 }
  0xfe   :  { %v3501_v29 = vpop.f32.mrb[4].mxu0  ;;  %4038 = vmatprep.subr.bf16.mxu1 %v4286_v28  ;;  %2785 = vmatprep.mubr.bf16.mxu1 %v5219_v46 }
  0xff   :  { %v3541_v31 = vpop.f32.mrb[4].mxu1  ;;  %v3502_v50 = vpop.f32.mrb[5].mxu0  ;;  %2761 = vmatprep.mubr.bf16.mxu0 %v5097_v2 }
 0x100   :  { %v3542_v37 = vpop.f32.mrb[5].mxu1  ;;  %v3503_v42 = vadd.f32 %v3502_v50, %v3501_v29  ;;  %v3504_v45 = vpop.f32.mrb[6].mxu0  ;;  %3952 = vmatpush3.bf16.msra.mxu0 %v4287_v55 }
 0x101   :  { %v3543_v8 = vadd.f32 %v3542_v37, %v3541_v31  ;;  %v3544_v48 = vpop.f32.mrb[6].mxu1  ;;  %v3505_v56 = vpop.f32.mrb[7].mxu0  ;;  %4046 = vmatpush3.bf16.msra.mxu1 %v4287_v55 }
 0x102   :  { %v3545_v59 = vpop.f32.mrb[7].mxu1  ;;  %v3506_v34 = vadd.f32 %v3505_v56, %v3504_v45  ;;  %4019 = vmatprep.subr.bf16.mxu1 %v4288_v58 }
 0x103   :  { %v5340_v62 = vadd.f32 %v3543_v8, %v3503_v42  ;;  %v3546_v40 = vadd.f32 %v3545_v59, %v3544_v48  ;;  %2762 = vmatmul.mubr.bf16.vlgmr.msra.gmra.mrb[112].mxu0 %v5128_v14 }
 0x104   :  { %2786 = vmatmul.mubr.bf16.vlgmr.msra.gmra.mrb[88].mxu1 %v5240_v63  ;;  %2769 = vmatprep.mubr.bf16.mxu0 %v5140_v18 }
 0x105   :  { %v5346_v61 = vadd.f32 %v3546_v40, %v3506_v34  ;;  %4020 = vmatpush3.bf16.msra.mxu1 %v4288_v58  ;;  %4023 = vmatprep.mubr.msk.bf16.mxu1 %vm587_vm0, %v5087_v60  ;;  %v4316_v60 = vld [vmem:[%s5515_s0 + $0x88] ss:$28 sps:$4 sm:$0xff]  }
 0x106   :  { %v3507_v44 = vpop.f32.mrb[8].mxu0  ;;  %4021 = vmatprep.subr.bf16.mxu1 %v4289_v5 }
 0x107   :  { %v3547_v7 = vpop.f32.mrb[8].mxu1  ;;  %v3508_v51 = vpop.f32.mrb[9].mxu0 }
 0x108   :  { %v3548_v52 = vpop.f32.mrb[9].mxu1  ;;  %v3509_v57 = vadd.f32 %v3508_v51, %v3507_v44  ;;  %v3510_v46 = vpop.f32.mrb[10].mxu0 }
 0x109   :  { %v3549_v39 = vadd.f32 %v3548_v52, %v3547_v7  ;;  %v3550_v3 = vpop.f32.mrb[10].mxu1  ;;  %v3511_v2 = vpop.f32.mrb[11].mxu0  ;;  %4022 = vmatpush3.bf16.msra.mxu1 %v4289_v5 }
 0x10a   :  { %v3551_v9 = vpop.f32.mrb[11].mxu1  ;;  %v3512_v53 = vadd.f32 %v3511_v2, %v3510_v46 }
 0x10b   :  { %v716_v47 = vadd.f32 %v3549_v39, %v3509_v57  ;;  %v3552_v10 = vadd.f32 %v3551_v9, %v3550_v3  ;;  %2770 = vmatmul.mubr.bf16.gmra.mrb[116].mxu0 %v5168_v33  ;;  %v4317_v33 = vld [vmem:[%s5515_s0 + $0xc0] ss:$28 sps:$4 sm:$0xff]  }
 0x10c   :  { %4024 = vmatmul.mubr.msk.bf16.vlgmr.msra.gmra.mrb[92].mxu1 %vm587_vm0, %v5118_v12  ;;  %2777 = vmatprep.mubr.bf16.mxu0 %v5180_v36 }
 0x10d   :  { %v719_v54 = vadd.f32 %v3552_v10, %v3512_v53  ;;  %4027 = vmatprep.mubr.msk.bf16.mxu1 %vm587_vm0, %v4316_v60 }
 0x10e   :  { %v3513_v63 = vpop.f32.mrb[12].mxu0 }
 0x10f   :  { %v3553_v32 = vpop.f32.mrb[12].mxu1  ;;  %v3514_v11 = vpop.f32.mrb[13].mxu0 }
 0x110   :  { %v3554_v6 = vpop.f32.mrb[13].mxu1  ;;  %v3515_v14 = vadd.f32 %v3514_v11, %v3513_v63  ;;  %v3516_v1 = vpop.f32.mrb[14].mxu0 }
 0x111   :  { %v3555_v0 = vadd.f32 %v3554_v6, %v3553_v32  ;;  %v3556_v4 = vpop.f32.mrb[14].mxu1  ;;  %v3517_v18 = vpop.f32.mrb[15].mxu0 }
 0x112   :  { %v3557_v35 = vpop.f32.mrb[15].mxu1  ;;  %v3518_v15 = vadd.f32 %v3517_v18, %v3516_v1 }
 0x113   :  { %v724_v13 = vadd.f32 %v3555_v0, %v3515_v14  ;;  %v3558_v41 = vadd.f32 %v3557_v35, %v3556_v4  ;;  %2778 = vmatmul.mubr.bf16.gmra.mrb[120].mxu0 %v5207_v38 }
 0x114   :  { %4028 = vmatmul.mubr.msk.bf16.gmra.mrb[96].mxu1 %vm587_vm0, %v4317_v33 }
 0x115   :  { %v727_v12 = vadd.f32 %v3558_v41, %v3518_v15 }
 0x116   :  { %v3575_v19 = vpop.f32.mrb[16].mxu0 }
 0x117   :  { %v3989_v17 = vpop.f32.mrb[16].mxu1  ;;  %v3576_v20 = vpop.f32.mrb[17].mxu0 }
 0x118   :  { %v829_v16 = vpop.f32.mrb[17].mxu1  ;;  %v3577_v22 = vadd.f32 %v3576_v20, %v3575_v19  ;;  %v3578_v30 = vpop.f32.mrb[18].mxu0 }
 0x119   :  { %v3990_v21 = vpop.f32.mrb[18].mxu1  ;;  %v3579_v43 = vpop.f32.mrb[19].mxu0 }
 0x11a   :  { %v832_v23 = vpop.f32.mrb[19].mxu1  ;;  %v3580_v25 = vadd.f32 %v3579_v43, %v3578_v30  ;;  %v765_v36 = vadd.f32 %v3577_v22, %v5320_v24 }
 0x11c   :  { %v5371_v26 = vadd.f32 %v829_v16, %v765_v36  ;;  %v768_v27 = vadd.f32 %v3580_v25, %v5326_v49 }
 0x11e   :  { %v5374_v28 = vadd.f32 %v832_v23, %v768_v27  ;;  %v3581_v29 = vpop.f32.mrb[20].mxu0 }
 0x11f   :  { %v3582_v31 = vpop.f32.mrb[21].mxu0 }
 0x120   :  { %v3583_v50 = vadd.f32 %v3582_v31, %v3581_v29  ;;  %v3584_v37 = vpop.f32.mrb[22].mxu0 }
 0x121   :  { %v3585_v42 = vpop.f32.mrb[23].mxu0  ;;  %v3993_v5 = vpop.f32.mrb[20].mxu1 }
 0x122   :  { %v773_v38 = vadd.f32 %v3583_v50, %v5340_v62  ;;  %v3586_v8 = vadd.f32 %v3585_v42, %v3584_v37  ;;  %v845_v7 = vpop.f32.mrb[21].mxu1 }
 0x123   :  { %v3994_v62 = vpop.f32.mrb[22].mxu1 }
 0x124   :  { %v5377_v45 = vadd.f32 %v3989_v17, %v773_v38  ;;  %v776_v48 = vadd.f32 %v3586_v8, %v5346_v61  ;;  %v848_v52 = vpop.f32.mrb[23].mxu1 }
 0x126   :  { %v5380_v55 = vadd.f32 %v3990_v21, %v776_v48  ;;  %v3587_v24 = vpop.f32.mrb[24].mxu0 }
 0x127   :  { %v3588_v56 = vpop.f32.mrb[25].mxu0 }
 0x128   :  { %v3589_v59 = vadd.f32 %v3588_v56, %v3587_v24  ;;  %v3590_v49 = vpop.f32.mrb[26].mxu0 }
 0x129   :  { %v3591_v58 = vpop.f32.mrb[27].mxu0 }
 0x12a   :  { %v3592_v34 = vadd.f32 %v3591_v58, %v3590_v49  ;;  %v781_v40 = vadd.f32 %v3589_v59, %v716_v47 }
 0x12c   :  { %v784_v44 = vadd.f32 %v3592_v34, %v719_v54  ;;  %v5382_v51 = vadd.f32 %v845_v7, %v781_v40 }
 0x12e   :  { %v5384_v57 = vadd.f32 %v848_v52, %v784_v44  ;;  %v3593_v39 = vpop.f32.mrb[28].mxu0 }
 0x12f   :  { %v3594_v61 = vpop.f32.mrb[29].mxu0 }
 0x130   :  { %v3595_v46 = vadd.f32 %v3594_v61, %v3593_v39  ;;  %v3596_v3 = vpop.f32.mrb[30].mxu0 }
 0x131   :  { %v3597_v2 = vpop.f32.mrb[31].mxu0 }
 0x132   :  { %v789_v9 = vadd.f32 %v3595_v46, %v724_v13  ;;  %v3598_v53 = vadd.f32 %v3597_v2, %v3596_v3 }
 0x134   :  { %v5386_v10 = vadd.f32 %v3993_v5, %v789_v9  ;;  %v792_v63 = vadd.f32 %v3598_v53, %v727_v12 }
 0x136   :  { %v5388_v47 = vadd.f32 %v3994_v62, %v792_v63  ;;  %v3621_v32 = vpop.f32.mrb[32].mxu0 }
 0x137   :  { %v3661_v54 = vpop.f32.mrb[24].mxu1  ;;  %v3622_v6 = vpop.f32.mrb[33].mxu0 }
 0x138   :  { %v3662_v11 = vpop.f32.mrb[25].mxu1  ;;  %v3623_v1 = vadd.f32 %v3622_v6, %v3621_v32  ;;  %v3624_v4 = vpop.f32.mrb[34].mxu0 }
 0x139   :  { %v3663_v14 = vadd.f32 %v3662_v11, %v3661_v54  ;;  %v3664_v0 = vpop.f32.mrb[26].mxu1  ;;  %v3625_v18 = vpop.f32.mrb[35].mxu0 }
 0x13a   :  { %v3665_v60 = vpop.f32.mrb[27].mxu1  ;;  %v3626_v41 = vadd.f32 %v3625_v18, %v3624_v4 }
 0x13b   :  { %v3666_v35 = vadd.f32 %v3665_v60, %v3664_v0  ;;  %v1361_v15 = vadd.f32 %v3663_v14, %v3623_v1 }
 0x13d   :  { %v1364_v13 = vadd.f32 %v3666_v35, %v3626_v41 }
 0x13e   :  { %v3627_v19 = vpop.f32.mrb[36].mxu0 }
 0x13f   :  { %v3667_v17 = vpop.f32.mrb[28].mxu1  ;;  %v3628_v12 = vpop.f32.mrb[37].mxu0 }
 0x140   :  { %v3668_v16 = vpop.f32.mrb[29].mxu1  ;;  %v3629_v21 = vadd.f32 %v3628_v12, %v3627_v19  ;;  %v3630_v22 = vpop.f32.mrb[38].mxu0 }
 0x141   :  { %v3669_v33 = vadd.f32 %v3668_v16, %v3667_v17  ;;  %v3670_v20 = vpop.f32.mrb[30].mxu1  ;;  %v3631_v23 = vpop.f32.mrb[39].mxu0 }
 0x142   :  { %v3671_v30 = vpop.f32.mrb[31].mxu1  ;;  %v3632_v36 = vadd.f32 %v3631_v23, %v3630_v22 }
 0x143   :  { %v3672_v43 = vadd.f32 %v3671_v30, %v3670_v20  ;;  %v1369_v25 = vadd.f32 %v3669_v33, %v3629_v21 }
 0x145   :  { %v1372_v27 = vadd.f32 %v3672_v43, %v3632_v36 }
 0x146   :  { %v3633_v31 = vpop.f32.mrb[40].mxu0 }
 0x147   :  { %v3673_v29 = vpop.f32.mrb[32].mxu1  ;;  %v3634_v37 = vpop.f32.mrb[41].mxu0 }
 0x148   :  { %v3674_v50 = vpop.f32.mrb[33].mxu1  ;;  %v3635_v8 = vadd.f32 %v3634_v37, %v3633_v31  ;;  %v3636_v48 = vpop.f32.mrb[42].mxu0 }
 0x149   :  { %v3675_v42 = vadd.f32 %v3674_v50, %v3673_v29  ;;  %v3676_v38 = vpop.f32.mrb[34].mxu1  ;;  %v3637_v56 = vpop.f32.mrb[43].mxu0 }
 0x14a   :  { %v3677_v24 = vpop.f32.mrb[35].mxu1  ;;  %v3638_v58 = vadd.f32 %v3637_v56, %v3636_v48 }
 0x14b   :  { %v3678_v59 = vadd.f32 %v3677_v24, %v3676_v38  ;;  %v1377_v49 = vadd.f32 %v3675_v42, %v3635_v8 }
 0x14d   :  { %v1380_v34 = vadd.f32 %v3678_v59, %v3638_v58 }
 0x14e   :  { %v3639_v5 = vpop.f32.mrb[44].mxu0 }
 0x14f   :  { %v3679_v40 = vpop.f32.mrb[36].mxu1  ;;  %v3640_v7 = vpop.f32.mrb[45].mxu0 }
 0x150   :  { %v3680_v44 = vpop.f32.mrb[37].mxu1  ;;  %v3641_v39 = vadd.f32 %v3640_v7, %v3639_v5  ;;  %v3642_v61 = vpop.f32.mrb[46].mxu0 }
 0x151   :  { %v3681_v62 = vadd.f32 %v3680_v44, %v3679_v40  ;;  %v3682_v52 = vpop.f32.mrb[38].mxu1  ;;  %v3643_v3 = vpop.f32.mrb[47].mxu0 }
 0x152   :  { %v3683_v46 = vpop.f32.mrb[39].mxu1  ;;  %v3644_v53 = vadd.f32 %v3643_v3, %v3642_v61 }
 0x153   :  { %v3684_v2 = vadd.f32 %v3683_v46, %v3682_v52  ;;  %v1385_v9 = vadd.f32 %v3681_v62, %v3641_v39 }
 0x155   :  { %v1388_v63 = vadd.f32 %v3684_v2, %v3644_v53 }
 0x156   :  { %v3701_v32 = vpop.f32.mrb[48].mxu0 }
 0x157   :  { %v4001_v54 = vpop.f32.mrb[40].mxu1  ;;  %v3702_v6 = vpop.f32.mrb[49].mxu0 }
 0x158   :  { %v1490_v11 = vpop.f32.mrb[41].mxu1  ;;  %v3703_v0 = vadd.f32 %v3702_v6, %v3701_v32  ;;  %v3704_v1 = vpop.f32.mrb[50].mxu0 }
 0x159   :  { %v4002_v14 = vpop.f32.mrb[42].mxu1  ;;  %v3705_v60 = vpop.f32.mrb[51].mxu0 }
 0x15a   :  { %v1493_v4 = vpop.f32.mrb[43].mxu1  ;;  %v3706_v18 = vadd.f32 %v3705_v60, %v3704_v1  ;;  %v1426_v35 = vadd.f32 %v3703_v0, %v1361_v15 }
 0x15c   :  { %v5390_v41 = vadd.f32 %v1490_v11, %v1426_v35  ;;  %v1429_v17 = vadd.f32 %v3706_v18, %v1364_v13 }
 0x15e   :  { %v1521_v16 = vmax.f32 %v5371_v26, %v5390_v41  ;;  %v5394_v12 = vadd.f32 %v1493_v4, %v1429_v17  ;;  %v3707_v33 = vpop.f32.mrb[52].mxu0 }
 0x15f   :  { %v4005_v19 = vpop.f32.mrb[44].mxu1  ;;  %v3708_v21 = vpop.f32.mrb[53].mxu0 }
 0x160   :  { %v1506_v20 = vpop.f32.mrb[45].mxu1  ;;  %v1522_v30 = vmax.f32 %v5374_v28, %v5394_v12  ;;  %v3709_v23 = vadd.f32 %v3708_v21, %v3707_v33  ;;  %v3710_v43 = vpop.f32.mrb[54].mxu0 }
 0x161   :  { %v4006_v22 = vpop.f32.mrb[46].mxu1  ;;  %v3711_v15 = vpop.f32.mrb[55].mxu0 }
 0x162   :  { %v1509_v36 = vpop.f32.mrb[47].mxu1  ;;  %v1434_v29 = vadd.f32 %v3709_v23, %v1369_v25  ;;  %v3712_v31 = vadd.f32 %v3711_v15, %v3710_v43 }
 0x164   :  { %v5398_v13 = vadd.f32 %v4001_v54, %v1434_v29  ;;  %v1437_v50 = vadd.f32 %v3712_v31, %v1372_v27 }
 0x166   :  { %v1523_v37 = vmax.f32 %v5377_v45, %v5398_v13  ;;  %v5402_v42 = vadd.f32 %v4002_v14, %v1437_v50  ;;  %v3713_v38 = vpop.f32.mrb[56].mxu0 }
 0x167   :  { %v3714_v8 = vpop.f32.mrb[57].mxu0 }
 0x168   :  { %v1524_v48 = vmax.f32 %v5380_v55, %v5402_v42  ;;  %v3715_v24 = vadd.f32 %v3714_v8, %v3713_v38  ;;  %v3716_v56 = vpop.f32.mrb[58].mxu0 }
 0x169   :  { %v3717_v59 = vpop.f32.mrb[59].mxu0 }
 0x16a   :  { %v3718_v58 = vadd.f32 %v3717_v59, %v3716_v56  ;;  %v1442_v40 = vadd.f32 %v3715_v24, %v1377_v49 }
 0x16c   :  { %v5406_v25 = vadd.f32 %v1506_v20, %v1442_v40  ;;  %v1445_v5 = vadd.f32 %v3718_v58, %v1380_v34 }
 0x16e   :  { %v1525_v27 = vmax.f32 %v5382_v51, %v5406_v25  ;;  %v5410_v44 = vadd.f32 %v1509_v36, %v1445_v5  ;;  %v3719_v7 = vpop.f32.mrb[60].mxu0 }
 0x16f   :  { %v3720_v62 = vpop.f32.mrb[61].mxu0 }
 0x170   :  { %v1526_v52 = vmax.f32 %v5384_v57, %v5410_v44  ;;  %v3721_v39 = vadd.f32 %v3720_v62, %v3719_v7  ;;  %v3722_v61 = vpop.f32.mrb[62].mxu0 }
 0x171   :  { %v3723_v46 = vpop.f32.mrb[63].mxu0 }
 0x172   :  { %v1450_v3 = vadd.f32 %v3721_v39, %v1385_v9  ;;  %v3724_v2 = vadd.f32 %v3723_v46, %v3722_v61 }
 0x174   :  { %v5414_v53 = vadd.f32 %v4005_v19, %v1450_v3  ;;  %v1453_v49 = vadd.f32 %v3724_v2, %v1388_v63 }
 0x176   :  { %v5416_v34 = vadd.f32 %v4006_v22, %v1453_v49  ;;  %v3747_v32 = vpop.f32.mrb[64].mxu0  ;;  %v1527_v6 = vmax.f32 %v5386_v10, %v5414_v53 }
 0x177   :  { %v3787_v54 = vpop.f32.mrb[48].mxu1  ;;  %v3748_v14 = vpop.f32.mrb[65].mxu0 }
 0x178   :  { %v3788_v11 = vpop.f32.mrb[49].mxu1  ;;  %v3749_v4 = vadd.f32 %v3748_v14, %v3747_v32  ;;  %v3750_v60 = vpop.f32.mrb[66].mxu0  ;;  %v1528_v9 = vmax.f32 %v5388_v47, %v5416_v34 }
 0x179   :  { %v3789_v0 = vadd.f32 %v3788_v11, %v3787_v54  ;;  %v3790_v1 = vpop.f32.mrb[50].mxu1  ;;  %v3751_v35 = vpop.f32.mrb[67].mxu0 }
 0x17a   :  { %v3791_v18 = vpop.f32.mrb[51].mxu1  ;;  %v3752_v19 = vadd.f32 %v3751_v35, %v3750_v60 }
 0x17b   :  { %v3792_v17 = vadd.f32 %v3791_v18, %v3790_v1  ;;  %v2030_v63 = vadd.f32 %v3789_v0, %v3749_v4 }
 0x17d   :  { %v2033_v33 = vadd.f32 %v3792_v17, %v3752_v19 }
 0x17e   :  { %v3753_v21 = vpop.f32.mrb[68].mxu0 }
 0x17f   :  { %v3793_v20 = vpop.f32.mrb[52].mxu1  ;;  %v3754_v23 = vpop.f32.mrb[69].mxu0 }
 0x180   :  { %v3794_v22 = vpop.f32.mrb[53].mxu1  ;;  %v3755_v15 = vadd.f32 %v3754_v23, %v3753_v21  ;;  %v3756_v29 = vpop.f32.mrb[70].mxu0 }
 0x181   :  { %v3795_v43 = vadd.f32 %v3794_v22, %v3793_v20  ;;  %v3796_v36 = vpop.f32.mrb[54].mxu1  ;;  %v3757_v50 = vpop.f32.mrb[71].mxu0 }
 0x182   :  { %v3797_v31 = vpop.f32.mrb[55].mxu1  ;;  %v3758_v24 = vadd.f32 %v3757_v50, %v3756_v29 }
 0x183   :  { %v3798_v38 = vadd.f32 %v3797_v31, %v3796_v36  ;;  %v2038_v8 = vadd.f32 %v3795_v43, %v3755_v15 }
 0x185   :  { %v2041_v56 = vadd.f32 %v3798_v38, %v3758_v24 }
 0x186   :  { %v3759_v58 = vpop.f32.mrb[72].mxu0 }
 0x187   :  { %v3799_v59 = vpop.f32.mrb[56].mxu1  ;;  %v3760_v5 = vpop.f32.mrb[73].mxu0 }
 0x188   :  { %v3800_v40 = vpop.f32.mrb[57].mxu1  ;;  %v3761_v39 = vadd.f32 %v3760_v5, %v3759_v58  ;;  %v3762_v61 = vpop.f32.mrb[74].mxu0 }
 0x189   :  { %v3801_v7 = vadd.f32 %v3800_v40, %v3799_v59  ;;  %v3802_v62 = vpop.f32.mrb[58].mxu1  ;;  %v3763_v3 = vpop.f32.mrb[75].mxu0 }
 0x18a   :  { %v3803_v46 = vpop.f32.mrb[59].mxu1  ;;  %v3764_v54 = vadd.f32 %v3763_v3, %v3762_v61 }
 0x18b   :  { %v3804_v2 = vadd.f32 %v3803_v46, %v3802_v62  ;;  %v2046_v49 = vadd.f32 %v3801_v7, %v3761_v39 }
 0x18d   :  { %v2049_v32 = vadd.f32 %v3804_v2, %v3764_v54 }
 0x18e   :  { %v3765_v14 = vpop.f32.mrb[76].mxu0 }
 0x18f   :  { %v3805_v11 = vpop.f32.mrb[60].mxu1  ;;  %v3766_v1 = vpop.f32.mrb[77].mxu0 }
 0x190   :  { %v3806_v0 = vpop.f32.mrb[61].mxu1  ;;  %v3767_v18 = vadd.f32 %v3766_v1, %v3765_v14  ;;  %v3768_v35 = vpop.f32.mrb[78].mxu0 }
 0x191   :  { %v3807_v4 = vadd.f32 %v3806_v0, %v3805_v11  ;;  %v3808_v60 = vpop.f32.mrb[62].mxu1  ;;  %v3769_v19 = vpop.f32.mrb[79].mxu0 }
 0x192   :  { %v3809_v17 = vpop.f32.mrb[63].mxu1  ;;  %v3770_v22 = vadd.f32 %v3769_v19, %v3768_v35 }
 0x193   :  { %v3810_v20 = vadd.f32 %v3809_v17, %v3808_v60  ;;  %v2054_v21 = vadd.f32 %v3807_v4, %v3767_v18 }
 0x195   :  { %v2057_v23 = vadd.f32 %v3810_v20, %v3770_v22 }
 0x196   :  { %v3827_v36 = vpop.f32.mrb[80].mxu0 }
 0x197   :  { %v4013_v43 = vpop.f32.mrb[64].mxu1  ;;  %v3828_v29 = vpop.f32.mrb[81].mxu0 }
 0x198   :  { %v2159_v15 = vpop.f32.mrb[65].mxu1  ;;  %v3829_v50 = vadd.f32 %v3828_v29, %v3827_v36  ;;  %v3830_v38 = vpop.f32.mrb[82].mxu0 }
 0x199   :  { %v4014_v31 = vpop.f32.mrb[66].mxu1  ;;  %v3831_v59 = vpop.f32.mrb[83].mxu0 }
 0x19a   :  { %v2162_v24 = vpop.f32.mrb[67].mxu1  ;;  %v3832_v58 = vadd.f32 %v3831_v59, %v3830_v38  ;;  %v2095_v40 = vadd.f32 %v3829_v50, %v2030_v63 }
 0x19c   :  { %v2160_v5 = vadd.f32 %v2159_v15, %v2095_v40  ;;  %v2098_v7 = vadd.f32 %v3832_v58, %v2033_v33 }
 0x19e   :  { %v5425_v39 = vmax.f32 %v1521_v16, %v2160_v5  ;;  %v2163_v61 = vadd.f32 %v2162_v24, %v2098_v7  ;;  %v3833_v46 = vpop.f32.mrb[84].mxu0 }
 0x19f   :  { %v4017_v62 = vpop.f32.mrb[68].mxu1  ;;  %v3834_v2 = vpop.f32.mrb[85].mxu0 }
 0x1a0   :  { %v2175_v3 = vpop.f32.mrb[69].mxu1  ;;  %v5430_v11 = vmax.f32 %v1522_v30, %v2163_v61  ;;  %v3835_v14 = vadd.f32 %v3834_v2, %v3833_v46  ;;  %v3836_v63 = vpop.f32.mrb[86].mxu0 }
 0x1a1   :  { %v4018_v54 = vpop.f32.mrb[70].mxu1  ;;  %v3837_v33 = vpop.f32.mrb[87].mxu0 }
 0x1a2   :  { %v2178_v0 = vpop.f32.mrb[71].mxu1  ;;  %v2103_v1 = vadd.f32 %v3835_v14, %v2038_v8  ;;  %v3838_v4 = vadd.f32 %v3837_v33, %v3836_v63 }
 0x1a4   :  { %v2168_v60 = vadd.f32 %v4013_v43, %v2103_v1  ;;  %v2106_v26 = vadd.f32 %v3838_v4, %v2041_v56 }
 0x1a6   :  { %v5435_v41 = vmax.f32 %v1523_v37, %v2168_v60  ;;  %v2171_v16 = vadd.f32 %v4014_v31, %v2106_v26  ;;  %v3839_v18 = vpop.f32.mrb[88].mxu0 }
 0x1a7   :  { %v3840_v35 = vpop.f32.mrb[89].mxu0 }
 0x1a8   :  { %v5440_v28 = vmax.f32 %v1524_v48, %v2171_v16  ;;  %v3841_v12 = vadd.f32 %v3840_v35, %v3839_v18  ;;  %v3842_v30 = vpop.f32.mrb[90].mxu0 }
 0x1a9   :  { %v3843_v17 = vpop.f32.mrb[91].mxu0 }
 0x1aa   :  { %v3844_v8 = vadd.f32 %v3843_v17, %v3842_v30  ;;  %v2111_v19 = vadd.f32 %v3841_v12, %v2046_v49 }
 0x1ac   :  { %v2176_v20 = vadd.f32 %v2175_v3, %v2111_v19  ;;  %v2114_v56 = vadd.f32 %v3844_v8, %v2049_v32 }
 0x1ae   :  { %v5445_v45 = vmax.f32 %v1525_v27, %v2176_v20  ;;  %v2179_v13 = vadd.f32 %v2178_v0, %v2114_v56  ;;  %v3845_v37 = vpop.f32.mrb[92].mxu0 }
 0x1af   :  { %v3846_v22 = vpop.f32.mrb[93].mxu0 }
 0x1b0   :  { %v5450_v55 = vmax.f32 %v1526_v52, %v2179_v13  ;;  %v3847_v42 = vadd.f32 %v3846_v22, %v3845_v37  ;;  %v3848_v48 = vpop.f32.mrb[94].mxu0 }
 0x1b1   :  { %v3849_v43 = vpop.f32.mrb[95].mxu0 }
 0x1b2   :  { %v2119_v36 = vadd.f32 %v3847_v42, %v2054_v21  ;;  %v3850_v49 = vadd.f32 %v3849_v43, %v3848_v48 }
 0x1b4   :  { %v2184_v15 = vadd.f32 %v4017_v62, %v2119_v36  ;;  %v2122_v32 = vadd.f32 %v3850_v49, %v2057_v23 }
 0x1b6   :  { %v2187_v31 = vadd.f32 %v4018_v54, %v2122_v32  ;;  %v3873_v51 = vpop.f32.mrb[96].mxu0  ;;  %v5455_v27 = vmax.f32 %v1527_v6, %v2184_v15 }
 0x1b7   :  { %v3913_v29 = vpop.f32.mrb[72].mxu1  ;;  %v3874_v50 = vpop.f32.mrb[97].mxu0 }
 0x1b8   :  { %v3914_v25 = vpop.f32.mrb[73].mxu1  ;;  %v3875_v52 = vadd.f32 %v3874_v50, %v3873_v51  ;;  %v3876_v38 = vpop.f32.mrb[98].mxu0  ;;  %v5460_v21 = vmax.f32 %v1528_v9, %v2187_v31 }
 0x1b9   :  { %v3915_v57 = vadd.f32 %v3914_v25, %v3913_v29  ;;  %v3916_v44 = vpop.f32.mrb[74].mxu1  ;;  %v3877_v23 = vpop.f32.mrb[99].mxu0 }
 0x1ba   :  { %v3917_v24 = vpop.f32.mrb[75].mxu1  ;;  %v3878_v40 = vadd.f32 %v3877_v23, %v3876_v38  ;;  %v2888_v31 = vpop.permute.xlu1 %2887 }
 0x1bb   :  { %v3918_v59 = vadd.f32 %v3917_v24, %v3916_v44  ;;  %v2699_v58 = vadd.f32 %v3915_v57, %v3875_v52  ;;  %v2878_v25 = vpop.permute.xlu0 %2877 }
 0x1bd   :  { %v2702_v5 = vadd.f32 %v3918_v59, %v3878_v40 }
 0x1be   :  { %v3879_v10 = vpop.f32.mrb[100].mxu0 }
 0x1bf   :  { %v3919_v7 = vpop.f32.mrb[76].mxu1  ;;  %v3880_v6 = vpop.f32.mrb[101].mxu0 }
 0x1c0   :  { %v3920_v53 = vpop.f32.mrb[77].mxu1  ;;  %v3881_v46 = vadd.f32 %v3880_v6, %v3879_v10  ;;  %v3882_v3 = vpop.f32.mrb[102].mxu0 }
 0x1c1   :  { %v3921_v62 = vadd.f32 %v3920_v53, %v3919_v7  ;;  %v3922_v61 = vpop.f32.mrb[78].mxu1  ;;  %v3883_v54 = vpop.f32.mrb[103].mxu0 }
 0x1c2   :  { %v3923_v2 = vpop.f32.mrb[79].mxu1  ;;  %v3884_v47 = vadd.f32 %v3883_v54, %v3882_v3 }
 0x1c3   :  { %v3924_v14 = vadd.f32 %v3923_v2, %v3922_v61  ;;  %v5462_v63 = vadd.f32 %v3921_v62, %v3881_v46  ;;  %v2893_v61 = vpop.permute.xlu1 %2892  ;;  %v2883_v2 = vpop.permute.xlu0 %2882 }
 0x1c5   :  { %v5464_v34 = vadd.f32 %v3924_v14, %v3884_v47 }
 0x1c6   :  { %v3885_v0 = vpop.f32.mrb[104].mxu0 }
 0x1c7   :  { %v3925_v9 = vpop.f32.mrb[80].mxu1  ;;  %v3886_v1 = vpop.f32.mrb[105].mxu0 }
 0x1c8   :  { %v3926_v33 = vpop.f32.mrb[81].mxu1  ;;  %v3887_v26 = vadd.f32 %v3886_v1, %v3885_v0  ;;  %v3888_v16 = vpop.f32.mrb[106].mxu0 }
 0x1c9   :  { %v3927_v4 = vadd.f32 %v3926_v33, %v3925_v9  ;;  %v3928_v60 = vpop.f32.mrb[82].mxu1  ;;  %v3889_v35 = vpop.f32.mrb[107].mxu0 }
 0x1ca   :  { %v3929_v18 = vpop.f32.mrb[83].mxu1  ;;  %v3890_v17 = vadd.f32 %v3889_v35, %v3888_v16 }
 0x1cb   :  { %v3930_v12 = vadd.f32 %v3929_v18, %v3928_v60  ;;  %v5466_v30 = vadd.f32 %v3927_v4, %v3887_v26 }
 0x1cd   :  { %v5468_v8 = vadd.f32 %v3930_v12, %v3890_v17  ;;  %v2898_v12 = vpop.permute.xlu0 %2897 }
 0x1ce   :  { %v3891_v20 = vpop.f32.mrb[108].mxu0 }
 0x1cf   :  { %v3931_v19 = vpop.f32.mrb[84].mxu1  ;;  %v3892_v13 = vpop.f32.mrb[109].mxu0 }
 0x1d0   :  { %v3932_v56 = vpop.f32.mrb[85].mxu1  ;;  %v3893_v42 = vadd.f32 %v3892_v13, %v3891_v20  ;;  %v3894_v48 = vpop.f32.mrb[110].mxu0 }
 0x1d1   :  { %v3933_v37 = vadd.f32 %v3932_v56, %v3931_v19  ;;  %v3934_v22 = vpop.f32.mrb[86].mxu1  ;;  %v3895_v36 = vpop.f32.mrb[111].mxu0 }
 0x1d2   :  { %v3935_v43 = vpop.f32.mrb[87].mxu1  ;;  %v3896_v32 = vadd.f32 %v3895_v36, %v3894_v48  ;;  %v2903_v56 = vpop.permute.xlu1 %2902 }
 0x1d3   :  { %v3936_v49 = vadd.f32 %v3935_v43, %v3934_v22  ;;  %v2723_v15 = vadd.f32 %v3933_v37, %v3893_v42 }
 0x1d5   :  { %v2726_v29 = vadd.f32 %v3936_v49, %v3896_v32 }
 0x1d6   :  { %v3953_v57 = vpop.f32.mrb[112].mxu0 }
 0x1d7   :  { %v3971_v51 = vpop.f32.mrb[88].mxu1  ;;  %v3954_v38 = vpop.f32.mrb[113].mxu0 }
 0x1d8   :  { %v3972_v50 = vpop.f32.mrb[89].mxu1  ;;  %v3955_v23 = vadd.f32 %v3954_v38, %v3953_v57  ;;  %v3956_v59 = vpop.f32.mrb[114].mxu0 }
 0x1d9   :  { %v3973_v44 = vadd.f32 %v3972_v50, %v3971_v51  ;;  %v3974_v52 = vpop.f32.mrb[90].mxu1  ;;  %v3957_v7 = vpop.f32.mrb[115].mxu0 }
 0x1da   :  { %v3975_v24 = vpop.f32.mrb[91].mxu1  ;;  %v3958_v53 = vadd.f32 %v3957_v7, %v3956_v59  ;;  %v2764_v6 = vadd.f32 %v3955_v23, %v2699_v58 }
 0x1db   :  { %v3976_v40 = vadd.f32 %v3975_v24, %v3974_v52  ;;  %v2788_v10 = vadd.f32 %v3973_v44, %v2723_v15  ;;  %v2913_v44 = vpop.permute.xlu1 %2912 }
 0x1dc   :  { %v2767_v46 = vadd.f32 %v3958_v53, %v2702_v5 }
 0x1dd   :  { %v2791_v62 = vadd.f32 %v3976_v40, %v2726_v29 }
 0x1de   :  { %v3959_v14 = vpop.f32.mrb[116].mxu0 }
 0x1df   :  { %v4025_v3 = vpop.f32.mrb[92].mxu1  ;;  %v3960_v0 = vpop.f32.mrb[117].mxu0 }
 0x1e0   :  { %v2828_v54 = vpop.f32.mrb[93].mxu1  ;;  %v3961_v1 = vadd.f32 %v3960_v0, %v3959_v14  ;;  %v3962_v4 = vpop.f32.mrb[118].mxu0 }
 0x1e1   :  { %v2829_v47 = vadd.f32 %v2828_v54, %v2764_v6  ;;  %v4026_v9 = vpop.f32.mrb[94].mxu1  ;;  %v3963_v16 = vpop.f32.mrb[119].mxu0 }
 0x1e2   :  { %v2831_v33 = vpop.f32.mrb[95].mxu1  ;;  %v2772_v18 = vadd.f32 %v3961_v1, %v5462_v63  ;;  %v3964_v58 = vadd.f32 %v3963_v16, %v3962_v4 }
 0x1e3   :  { %v2859_v60 = vmax.f32 %v5425_v39, %v2829_v47  ;;  %v2832_v26 = vadd.f32 %v2831_v33, %v2767_v46 }
 0x1e4   :  { %v2837_v17 = vadd.f32 %v4025_v3, %v2772_v18  ;;  %v2775_v19 = vadd.f32 %v3964_v58, %v5464_v34 }
 0x1e5   :  { %v2915_v35 = vadd.f32 %v2878_v25, %v2859_v60  ;;  %v2860_v5 = vmax.f32 %v5430_v11, %v2832_v26 }
 0x1e6   :  { %v2861_v13 = vmax.f32 %v5435_v41, %v2837_v17  ;;  %v2840_v37 = vadd.f32 %v4026_v9, %v2775_v19  ;;  %v3965_v42 = vpop.f32.mrb[120].mxu0  ;;  %v2908_v41 = vpop.permute.xlu0 %2907 }
 0x1e7   :  { %2923 = vst.msk [vmem:[%s5517_s3] sm:$0xff] %vm587_vm0, %v2915_v35  ;;  %v2916_v20 = vadd.f32 %v2883_v2, %v2860_v5  ;;  %v4029_v39 = vpop.f32.mrb[96].mxu1  ;;  %v3966_v34 = vpop.f32.mrb[121].mxu0 }
 0x1e8   :  { %v2853_v63 = vadd.f32 %v4029_v39, %v2788_v10  ;;  %v2844_v22 = vpop.f32.mrb[97].mxu1  ;;  %v2917_v48 = vadd.f32 %v2888_v31, %v2861_v13  ;;  %v2862_v43 = vmax.f32 %v5440_v28, %v2840_v37  ;;  %v3968_v15 = vpop.f32.mrb[122].mxu0  ;;  %v3967_v29 = vadd.f32 %v3966_v34, %v3965_v42 }
 0x1e9   :  { %2924 = vst.msk [vmem:[%s5517_s3 + $0x8] sm:$0xff] %vm587_vm0, %v2916_v20  ;;  %v4030_v11 = vpop.f32.mrb[98].mxu1  ;;  %v3969_v51 = vpop.f32.mrb[123].mxu0 }
 0x1ea   :  { %v2856_v36 = vadd.f32 %v4030_v11, %v2791_v62  ;;  %v2865_v49 = vmax.f32 %v5455_v27, %v2853_v63  ;;  %v2847_v32 = vpop.f32.mrb[99].mxu1  ;;  %2925 = vst.msk [vmem:[%s5517_s3 + $0x10] sm:$0xff] %vm587_vm0, %v2917_v48  ;;  %v2918_v25 = vadd.f32 %v2893_v61, %v2862_v43  ;;  %v3970_v31 = vadd.f32 %v3969_v51, %v3968_v15 }
 0x1eb   :  { %v2780_v28 = vadd.f32 %v3967_v29, %v5466_v30 }
 0x1ec   :  { %v2866_v50 = vmax.f32 %v5460_v21, %v2856_v36  ;;  %v2921_v57 = vadd.f32 %v2908_v41, %v2865_v49  ;;  %2926 = vst.msk [vmem:[%s5517_s3 + $0x18] sm:$0xff] %vm587_vm0, %v2918_v25  ;;  %v2783_v52 = vadd.f32 %v3970_v31, %v5468_v8 }
 0x1ed   :  { %v2845_v38 = vadd.f32 %v2844_v22, %v2780_v28 }
 0x1ee   :  { %v2922_v27 = vadd.f32 %v2913_v44, %v2866_v50  ;;  %2929 = vst.msk [vmem:[%s5517_s3 + $0x30] sm:$0xff] %vm587_vm0, %v2921_v57  ;;  %v2848_v21 = vadd.f32 %v2847_v32, %v2783_v52 }
 0x1ef   :  { %v2863_v30 = vmax.f32 %v5445_v45, %v2845_v38 }
 0x1f0   :  { %2930 = vst.msk [vmem:[%s5517_s3 + $0x38] sm:$0xff] %vm587_vm0, %v2922_v27  ;;  %v2864_v24 = vmax.f32 %v5450_v55, %v2848_v21 }
 0x1f1   :  { %v2919_v23 = vadd.f32 %v2898_v12, %v2863_v30 }
 0x1f2   :  { %v2920_v59 = vadd.f32 %v2903_v56, %v2864_v24 }
 0x1f3   :  { %2927 = vst.msk [vmem:[%s5517_s3 + $0x20] sm:$0xff] %vm587_vm0, %v2919_v23 }
 0x1f4   :  { %2928 = vst.msk [vmem:[%s5517_s3 + $0x28] sm:$0xff] %vm587_vm0, %v2920_v59 }

// kernel: tudui_forward.7
= control target key start
LH: loop header
LB: loop body
LE: loop exit
PB: predicated region body
PF: predicated region fallthrough
CT: control target
= control target key end

     0   :  { %v163_v28 = vlaneseq  ;;  %v1133_v36 = vmov 1966171168   ;;  %s1405_s0 = inlined_call_operand.vmem [shape: bf16[2,1024], index: 0, kind: input, shape index: {}]   ;;  %s1406_s1 = inlined_call_operand.vmem [shape: bf16[1024,64], index: 1, kind: input, shape index: {}]   ;;  %s1407_s2 = inlined_call_operand.vmem [shape: f32[1,64], index: 2, kind: input, shape index: {}]   ;;  %s1408_s3 = inlined_call_operand.vmem [shape: bf16[64,10], index: 3, kind: input, shape index: {}]   ;;  %s1409_s4 = inlined_call_operand.vmem [shape: f32[1,10], index: 4, kind: input, shape index: {}]   ;;  %s1410_s5 = inlined_call_operand.hbm [shape: f32[2,10], index: 5, kind: output, shape index: {}]  }
   0x1   :  { %v1040_v0 = vld [vmem:[%s1406_s1 + $0x40] sm:$0xff]   ;;  %v1044_v4 = vld [vmem:[%s1406_s1 + $0x48] sm:$0xff]   ;;  %v1048_v8 = vld [vmem:[%s1406_s1 + $0x50] sm:$0xff]   ;;  %v161_v37 = vunpack.c.l.s4 %v1133_v36 }
   0x2   :  { %v1041_v1 = vld [vmem:[%s1406_s1 + $0xc0] sm:$0xff]   ;;  %931 = vmatprep.subr.bf16.mxu0 %v1040_v0  ;;  %v1045_v5 = vld [vmem:[%s1406_s1 + $0xc8] sm:$0xff]   ;;  %v1049_v9 = vld [vmem:[%s1406_s1 + $0xd0] sm:$0xff]   ;;  %v164_v33 = vshrl.u32 %v163_v28, 7 }
   0x3   :  { %v1042_v2 = vld [vmem:[%s1406_s1] sm:$0xff]   ;;  %953 = vmatprep.subr.bf16.mxu1 %v1041_v1  ;;  %v1046_v6 = vld [vmem:[%s1406_s1 + $0x8] sm:$0xff]   ;;  %v1050_v10 = vld [vmem:[%s1406_s1 + $0x10] sm:$0xff]   ;;  %v162_v40 = vunpack.c.0.s8 %v161_v37 }
   0x4   :  { %v1043_v3 = vld [vmem:[%s1406_s1 + $0x80] sm:$0xff]   ;;  %932 = vmatpush3.bf16.msra.mxu0 %v1042_v2  ;;  %v1047_v7 = vld [vmem:[%s1406_s1 + $0x88] sm:$0xff]   ;;  %v1051_v11 = vld [vmem:[%s1406_s1 + $0x90] sm:$0xff]  }
   0x5   :  { %954 = vmatpush3.bf16.msra.mxu1 %v1043_v3  ;;  %933 = vmatprep.subr.bf16.mxu0 %v1044_v4  ;;  %v1052_v12 = vld [vmem:[%s1406_s1 + $0x58] sm:$0xff]   ;;  %v1056_v16 = vld [vmem:[%s1406_s1 + $0x60] sm:$0xff]   ;;  %v1060_v20 = vld [vmem:[%s1406_s1 + $0x68] sm:$0xff]   ;;  %v1272_v41 = vsub.s32 %v162_v40, %v164_v33 }
   0x6   :  { %955 = vmatprep.subr.bf16.mxu1 %v1045_v5  ;;  %v1053_v13 = vld [vmem:[%s1406_s1 + $0xd8] sm:$0xff]   ;;  %v1057_v17 = vld [vmem:[%s1406_s1 + $0xe0] sm:$0xff]   ;;  %v1061_v21 = vld [vmem:[%s1406_s1 + $0xe8] sm:$0xff]  }
   0x7   :  { %v1054_v14 = vld [vmem:[%s1406_s1 + $0x18] sm:$0xff]   ;;  %v1058_v18 = vld [vmem:[%s1406_s1 + $0x20] sm:$0xff]   ;;  %v1062_v22 = vld [vmem:[%s1406_s1 + $0x28] sm:$0xff]  }
   0x8   :  { %934 = vmatpush3.bf16.msra.mxu0 %v1046_v6  ;;  %v1055_v15 = vld [vmem:[%s1406_s1 + $0x98] sm:$0xff]   ;;  %v1059_v19 = vld [vmem:[%s1406_s1 + $0xa0] sm:$0xff]   ;;  %v1063_v23 = vld [vmem:[%s1406_s1 + $0xa8] sm:$0xff]  }
   0x9   :  { %956 = vmatpush3.bf16.msra.mxu1 %v1047_v7  ;;  %935 = vmatprep.subr.bf16.mxu0 %v1048_v8  ;;  %v1064_v24 = vld [vmem:[%s1406_s1 + $0x70] sm:$0xff]   ;;  %v1068_v29 = vld [vmem:[%s1406_s1 + $0x78] sm:$0xff]   ;;  %v22_v34 = vld [vmem:[%s1405_s0] sm:$0xff] }
   0xa   :  { %957 = vmatprep.subr.bf16.mxu1 %v1049_v9  ;;  %v1065_v25 = vld [vmem:[%s1406_s1 + $0xf0] sm:$0xff]   ;;  %v1069_v30 = vld [vmem:[%s1406_s1 + $0xf8] sm:$0xff]   ;;  %v1073_v35 = vld [vmem:[%s1406_s1 + $0x140] sm:$0xff]   ;;  %v159_v39 = vcombine.high %v22_v34, %v22_v34  ;;  %v166_v42 = vrot.slane %v22_v34, %v1272_v41 }
   0xb   :  { %v1066_v26 = vld [vmem:[%s1406_s1 + $0x30] sm:$0xff]   ;;  %v1070_v31 = vld [vmem:[%s1406_s1 + $0x38] sm:$0xff]   ;;  %v1074_v38 = vld [vmem:[%s1406_s1 + $0x1c0] sm:$0xff]  }
   0xc   :  { %936 = vmatpush3.bf16.msra.mxu0 %v1050_v10  ;;  %v1067_v27 = vld [vmem:[%s1406_s1 + $0xb0] sm:$0xff]   ;;  %v1071_v32 = vld [vmem:[%s1406_s1 + $0xb8] sm:$0xff]   ;;  %v1276_v43 = vrot.slane %v159_v39, %v1272_v41  ;;  %v174_v44 = vcombine.high %v166_v42, %v166_v42  ;;  %v182_v45 = vrot.slane %v166_v42, %v1272_v41  ;;  %v1075_v47 = vld [vmem:[%s1406_s1 + $0x100] sm:$0xff]  }
   0xd   :  { %958 = vmatpush3.bf16.msra.mxu1 %v1051_v11  ;;  %937 = vmatprep.subr.bf16.mxu0 %v1052_v12  ;;  %v1076_v49 = vld [vmem:[%s1406_s1 + $0x180] sm:$0xff]   ;;  %v1077_v52 = vld [vmem:[%s1406_s1 + $0x148] sm:$0xff]   ;;  %v1081_v58 = vld [vmem:[%s1406_s1 + $0x150] sm:$0xff]  }
   0xe   :  { %959 = vmatprep.subr.bf16.mxu1 %v1053_v13  ;;  %v175_v46 = vcombine.high %v1276_v43, %v1276_v43  ;;  %v196_v48 = vrot.slane %v174_v44, %v1272_v41  ;;  %v204_v51 = vcombine.high %v182_v45, %v182_v45  ;;  %v1078_v54 = vld [vmem:[%s1406_s1 + $0x1c8] sm:$0xff]   ;;  %v1082_v59 = vld [vmem:[%s1406_s1 + $0x1d0] sm:$0xff]   ;;  %v1085_v62 = vld [vmem:[%s1406_s1 + $0x158] sm:$0xff]  }
   0xf   :  { %v1079_v55 = vld [vmem:[%s1406_s1 + $0x108] sm:$0xff]   ;;  %v1083_v60 = vld [vmem:[%s1406_s1 + $0x110] sm:$0xff]   ;;  %v1086_v63 = vld [vmem:[%s1406_s1 + $0x1d8] sm:$0xff]  }
  0x10   :  { %938 = vmatpush3.bf16.msra.mxu0 %v1054_v14  ;;  %v203_v50 = vrot.slane %v175_v46, %v1272_v41  ;;  %632 = vmatprep.mubr.bf16.mxu0 %v196_v48  ;;  %v206_v53 = vcombine.high %v196_v48, %v196_v48  ;;  %v1080_v57 = vld [vmem:[%s1406_s1 + $0x188] sm:$0xff]   ;;  %v1084_v61 = vld [vmem:[%s1406_s1 + $0x190] sm:$0xff]   ;;  %v1087_v0 = vld [vmem:[%s1406_s1 + $0x118] sm:$0xff]  }
  0x11   :  { %960 = vmatpush3.bf16.msra.mxu1 %v1055_v15  ;;  %939 = vmatprep.subr.bf16.mxu0 %v1056_v16  ;;  %v1088_v1 = vld [vmem:[%s1406_s1 + $0x198] sm:$0xff]   ;;  %v1089_v2 = vld [vmem:[%s1406_s1 + $0x160] sm:$0xff]   ;;  %v1093_v6 = vld [vmem:[%s1406_s1 + $0x168] sm:$0xff]  }
  0x12   :  { %961 = vmatprep.subr.bf16.mxu1 %v1057_v17  ;;  %v207_v56 = vcombine.high %v203_v50, %v203_v50  ;;  %672 = vmatprep.mubr.bf16.mxu1 %v206_v53  ;;  %v1090_v3 = vld [vmem:[%s1406_s1 + $0x1e0] sm:$0xff]   ;;  %v1094_v7 = vld [vmem:[%s1406_s1 + $0x1e8] sm:$0xff]   ;;  %v1097_v10 = vld [vmem:[%s1406_s1 + $0x170] sm:$0xff]  }
  0x13   :  { %v1091_v4 = vld [vmem:[%s1406_s1 + $0x120] sm:$0xff]   ;;  %v1095_v8 = vld [vmem:[%s1406_s1 + $0x128] sm:$0xff]   ;;  %v1098_v11 = vld [vmem:[%s1406_s1 + $0x1f0] sm:$0xff]  }
  0x14   :  { %940 = vmatpush3.bf16.msra.mxu0 %v1058_v18  ;;  %v1092_v5 = vld [vmem:[%s1406_s1 + $0x1a0] sm:$0xff]   ;;  %v1096_v9 = vld [vmem:[%s1406_s1 + $0x1a8] sm:$0xff]   ;;  %v1099_v12 = vld [vmem:[%s1406_s1 + $0x130] sm:$0xff]  }
  0x15   :  { %962 = vmatpush3.bf16.msra.mxu1 %v1059_v19  ;;  %941 = vmatprep.subr.bf16.mxu0 %v1060_v20 }
  0x16   :  { %963 = vmatprep.subr.bf16.mxu1 %v1061_v21 }
  0x18   :  { %942 = vmatpush3.bf16.msra.mxu0 %v1062_v22 }
  0x19   :  { %964 = vmatpush3.bf16.msra.mxu1 %v1063_v23  ;;  %943 = vmatprep.subr.bf16.mxu0 %v1064_v24 }
  0x1a   :  { %965 = vmatprep.subr.bf16.mxu1 %v1065_v25 }
  0x1c   :  { %944 = vmatpush3.bf16.msra.mxu0 %v1066_v26 }
  0x1d   :  { %966 = vmatpush3.bf16.msra.mxu1 %v1067_v27  ;;  %945 = vmatprep.subr.bf16.mxu0 %v1068_v29 }
  0x1e   :  { %967 = vmatprep.subr.bf16.mxu1 %v1069_v30 }
  0x20   :  { %946 = vmatpush3.bf16.msra.mxu0 %v1070_v31 }
  0x21   :  { %968 = vmatpush3.bf16.msra.mxu1 %v1071_v32  ;;  %975 = vmatprep.subr.bf16.mxu0 %v1073_v35 }
  0x22   :  { %997 = vmatprep.subr.bf16.mxu1 %v1074_v38 }
  0x23   :  { %633 = vmatmul.mubr.bf16.vlgmr.msra.gmra.mrb[0].mxu0 %v182_v45 }
  0x24   :  { %976 = vmatpush3.bf16.msra.mxu0 %v1075_v47  ;;  %673 = vmatmul.mubr.bf16.vlgmr.msra.gmra.mrb[0].mxu1 %v204_v51 }
  0x25   :  { %977 = vmatprep.subr.bf16.mxu0 %v1077_v52  ;;  %998 = vmatpush3.bf16.msra.mxu1 %v1076_v49 }
  0x26   :  { %712 = vmatprep.mubr.bf16.mxu0 %v203_v50  ;;  %999 = vmatprep.subr.bf16.mxu1 %v1078_v54 }
  0x27   :  { %752 = vmatprep.mubr.bf16.mxu1 %v207_v56 }
  0x28   :  { %978 = vmatpush3.bf16.msra.mxu0 %v1079_v55 }
  0x29   :  { %979 = vmatprep.subr.bf16.mxu0 %v1081_v58  ;;  %1000 = vmatpush3.bf16.msra.mxu1 %v1080_v57 }
  0x2a   :  { %1001 = vmatprep.subr.bf16.mxu1 %v1082_v59 }
  0x2c   :  { %980 = vmatpush3.bf16.msra.mxu0 %v1083_v60 }
  0x2d   :  { %981 = vmatprep.subr.bf16.mxu0 %v1085_v62  ;;  %1002 = vmatpush3.bf16.msra.mxu1 %v1084_v61 }
  0x2e   :  { %1003 = vmatprep.subr.bf16.mxu1 %v1086_v63 }
  0x30   :  { %982 = vmatpush3.bf16.msra.mxu0 %v1087_v0 }
  0x31   :  { %983 = vmatprep.subr.bf16.mxu0 %v1089_v2  ;;  %1004 = vmatpush3.bf16.msra.mxu1 %v1088_v1 }
  0x32   :  { %1005 = vmatprep.subr.bf16.mxu1 %v1090_v3 }
  0x34   :  { %984 = vmatpush3.bf16.msra.mxu0 %v1091_v4 }
  0x35   :  { %985 = vmatprep.subr.bf16.mxu0 %v1093_v6  ;;  %1006 = vmatpush3.bf16.msra.mxu1 %v1092_v5 }
  0x36   :  { %1007 = vmatprep.subr.bf16.mxu1 %v1094_v7 }
  0x38   :  { %986 = vmatpush3.bf16.msra.mxu0 %v1095_v8 }
  0x39   :  { %10 = vsyncpa [#allocation3], 0  ;;  %987 = vmatprep.subr.bf16.mxu0 %v1097_v10  ;;  %v1101_v13 = vld [vmem:[%s1406_s1 + $0x178] sm:$0xff]   ;;  %1008 = vmatpush3.bf16.msra.mxu1 %v1096_v9  ;;  %v1100_v14 = vld [vmem:[%s1406_s1 + $0x1b0] sm:$0xff]   ;;  %v189_v17 = vrot.slane %v1276_v43, %v1272_v41  ;;  %v1134_v21 = vmov 0.0   ;;  %vm1135_vm0 = vmmov 0  }
  0x3a   :  { %1009 = vmatprep.subr.bf16.mxu1 %v1098_v11  ;;  %v1102_v15 = vld [vmem:[%s1406_s1 + $0x1f8] sm:$0xff]   ;;  %v1105_v20 = vld [vmem:[%s1408_s3] sm:$0xff]   ;;  %v1106_v22 = vld [vmem:[%s1408_s3 + $0x8] sm:$0xff]   ;;  %vm800_vm1 = vcmask 523264   ;;  %s1136_s29 = smov [#allocation2]   ;;  %vm844_vm2 = vcmask 74752  }
  0x3b   :  { %v1103_v16 = vld [vmem:[%s1406_s1 + $0x138] sm:$0xff]   ;;  %v205_v19 = vcombine.high %v189_v17, %v189_v17  ;;  %v1107_v23 = vld [vmem:[%s1408_s3 + $0x10] sm:$0xff]   ;;  %v860_v26 = vld [vmem:[%s1407_s2] ss:$0 sm:$0xff]  ;;  %s852_s30 = sshll.u32 %s1136_s29, 4  ;;  %s853_s30 = int_to_ptr.vmem [resolvable:$true] %s852_s30 }
  0x3c   :  { %988 = vmatpush3.bf16.msra.mxu0 %v1099_v12  ;;  %v1104_v18 = vld [vmem:[%s1406_s1 + $0x1b8] sm:$0xff]   ;;  %v925_v51 = vld [vmem:[%s1409_s4] ss:$0 sm:$0xff]  ;;  %s1109_s6 = scalar_lea.vmem %s853_s30, 32  ;;  %p1114_p1 = scmp.lt.s32.totalorder %s853_s30, %s853_s30 }
  0x3d   :  { %989 = vmatprep.subr.bf16.mxu0 %v1101_v13  ;;  %1010 = vmatpush3.bf16.msra.mxu1 %v1100_v14  ;;  %v1108_v24 = vld [vmem:[%s1408_s3 + $0x18] sm:$0xff]   ;;  %p1110_p0 = scmp.ne.s32.totalorder %s853_s30, %s1109_s6  ;;  %p1115_p2 = scmp.lt.s32.totalorder %s1109_s6, %s1109_s6 }
  0x3e   :  { %1011 = vmatprep.subr.bf16.mxu1 %v1102_v15 }
  0x3f   :  { %p1116_p3 = por %p1115_p2, %p1114_p1 }
  0x40   :  { %990 = vmatpush3.bf16.msra.mxu0 %v1103_v16 }
  0x41   :  { %1012 = vmatpush3.bf16.msra.mxu1 %v1104_v18  ;;  %1024 = vmatprep.subr.bf16.mxu0 %v1134_v21  ;;  %p1117_p4 = pnand %p1116_p3, %p1110_p0 }
  0x43   :  { %713 = vmatmul.mubr.bf16.vlgmr.msra.gmra.mrb[4].mxu0 %v189_v17 }
  0x44   :  { %753 = vmatmul.mubr.bf16.vlgmr.msra.gmra.mrb[4].mxu1 %v205_v19  ;;  %1025 = vmatpush3.bf16.msra.mxu0 %v1105_v20 }
  0x45   :  { %1026 = vmatprep.subr.bf16.mxu0 %v1134_v21  ;;  %1032 = vmatprep.mubr.msk.bf16.mxu0 %vm1135_vm0, %v1134_v21 }
  0x48   :  { %1027 = vmatpush3.bf16.msra.mxu0 %v1106_v22 }
  0x49   :  { %1028 = vmatprep.subr.bf16.mxu0 %v1134_v21 }
  0x4c   :  { %1029 = vmatpush3.bf16.msra.mxu0 %v1107_v23 }
  0x4d   :  { %1030 = vmatprep.subr.bf16.mxu0 %v1134_v21 }
  0x50   :  { %1031 = vmatpush3.bf16.msra.mxu0 %v1108_v24 }
  0xf6   :  { %v947_v25 = vpop.f32.mrb[0].mxu0 }
  0xf7   :  { %v948_v27 = vpop.f32.mrb[1].mxu0  ;;  %v969_v28 = vpop.f32.mrb[0].mxu1 }
  0xf8   :  { %v949_v29 = vadd.f32 %v948_v27, %v947_v25  ;;  %v950_v30 = vpop.f32.mrb[2].mxu0  ;;  %v970_v31 = vpop.f32.mrb[1].mxu1 }
  0xf9   :  { %v951_v32 = vpop.f32.mrb[3].mxu0  ;;  %v971_v34 = vadd.f32 %v970_v31, %v969_v28  ;;  %v972_v35 = vpop.f32.mrb[2].mxu1 }
  0xfa   :  { %v635_v33 = vadd.f32 %v949_v29, %v860_v26  ;;  %v973_v36 = vpop.f32.mrb[3].mxu1 }
  0xfc   :  { %v675_v37 = vadd.f32 %v971_v34, %v635_v33 }
 0x116   :  { %v991_v38 = vpop.f32.mrb[4].mxu0 }
 0x117   :  { %v992_v39 = vpop.f32.mrb[5].mxu0  ;;  %v1013_v40 = vpop.f32.mrb[4].mxu1 }
 0x118   :  { %v993_v41 = vadd.f32 %v992_v39, %v991_v38  ;;  %v994_v42 = vpop.f32.mrb[6].mxu0  ;;  %v1014_v43 = vpop.f32.mrb[5].mxu1 }
 0x119   :  { %v995_v44 = vpop.f32.mrb[7].mxu0  ;;  %v1015_v46 = vadd.f32 %v1014_v43, %v1013_v40  ;;  %v1016_v47 = vpop.f32.mrb[6].mxu1 }
 0x11a   :  { %v715_v45 = vadd.f32 %v993_v41, %v675_v37  ;;  %v1017_v48 = vpop.f32.mrb[7].mxu1 }
 0x11c   :  { %v755_v49 = vadd.f32 %v1015_v46, %v715_v45 }
 0x11e   :  { %v760_v50 = vpack.c.bf16 %v755_v49, %v755_v49 }
 0x120   :  { %1033 = vmatmul.mubr.msk.bf16.vlgmr.msra.gmra.mrb[8].mxu0 %vm800_vm1, %v760_v50 }
 0x1f3   :  { %v838_v52 = vpop.f32.mrb[8].mxu0 }
 0x1f4   :  { %v839_v53 = vadd.f32 %v925_v51, %v838_v52  ;;  %v1034_v54 = vpop.f32.mrb[9].mxu0 }
 0x1f5   :  { %v841_v55 = vpop.f32.mrb[10].mxu0 }
 0x1f6   :  { %v1035_v56 = vpop.f32.mrb[11].mxu0  ;;  %845 = vst.msk [vmem:[#allocation2] sm:$0x3] %vm844_vm2, %v839_v53 }
 0x1f7   :  { %1120 = shalt.err (!%p1117_p4)
}
 0x1f8   :  { %s1121_s4 = scalar_lea.hbm %s1410_s5, 32 }
 0x1f9   :  { %p1122_p5 = scmp.ne.s32.totalorder %s1410_s5, %s1121_s4  ;;  %p1125_p6 = scmp.lt.u32.totalorder %s1121_s4, %s1410_s5 }
 0x1fb   :  { %p1127_p7 = pnand %p1125_p6, %p1122_p5 }
 0x1fd   :  { %1130 = shalt.err (!%p1127_p7)
}
 0x1fe   :  { %855 = dma.vmem_to_hbm [thread:$0]  %s853_s30, 32, %s1410_s5, [#allocation3]  }
 0x1ff   :  { %1131 = dma.done.wait [#allocation3], 32  }
 0x200   :  { %1132 = vsyncadd [#allocation3], 4294967264 }
 0x201   :  { %859 = vsyncpa [#allocation3], 1 }

</bundles_post_ra>
